<compile_context>
chip_gen: v6e
topology: v6e:2x2x1
jax: 0.10.0
libtpu: 0.0.40
codegen_flags: <defaults>
</compile_context>

<pallas_src>
import math

import jax
import jax.numpy as jnp
from jax.experimental import pallas as pl
from jax.experimental.pallas import tpu as pltpu


def _round_up(x, m):
    return ((x + m - 1) // m) * m


def _bf16_eup_ok():
    # bf16 transcendentals only help (and are natively supported) on v6e / v7x;
    # keep f32 sigmoids on v5e and older / unknown chips.
    try:
        kind = jax.devices()[0].device_kind.lower()
    except Exception:
        return False
    return ("v6" in kind) or ("v7" in kind) or ("tpu7" in kind)


# --------------------------------------------------------------------------
# Fused per-level head-tower kernel
# --------------------------------------------------------------------------

def _make_level_kernel(H, W, cin, c2, c3, no, use_bf16_sigmoid):
    """Fused cv2[i] ++ cv3[i] tower for one level; one batch element per grid step.

    Channel-major layout: activations are (C, spatial) with the spatial axis
    flattened at row pitch P = W + 2 so the zero padding required by the 3x3
    convs is part of the axis and every (kh, kw) tap is a contiguous window.
    The spatial/lane axis is rounded up to a multiple of 128 (lane-dense stores).
    """
    c12 = c2 + c3
    c2g = c2 // 4
    P = W + 2
    n_act = H * P                                   # valid pitch-layout lanes
    n_lanes = _round_up(n_act, 128)                 # lane-dense slab width
    off = _round_up(P + 1, 128)                     # 128-aligned interior offset
    n_in = _round_up(n_lanes + 2 * P + 2, 128)      # padded-input lanes (1st conv)
    n_pad = _round_up(off + n_lanes + P + 1, 128)   # pad-scratch lanes (2nd conv)

    if use_bf16_sigmoid:
        def _sig(v):
            return jax.nn.sigmoid(v.astype(jnp.bfloat16)).astype(jnp.float32)
    else:
        def _sig(v):
            return jax.nn.sigmoid(v)

    def silu(v):
        return v * _sig(v)

    def folded_rhs(src_ref, ch_lo, ch_hi, base):
        # stack the 9 shifted (kh, kw) tap windows along the contraction axis
        return jnp.concatenate(
            [src_ref[ch_lo:ch_hi, base + kh * P + kw: base + kh * P + kw + n_lanes]
             for kh in range(3) for kw in range(3)], axis=0)

    def kernel(x_ref, mask_ref, w1_ref, b1_ref, w2g_ref, w2b_ref, b2_ref,
               w3_ref, b3_ref, out_ref, pad_ref):
        # ---- merged first 3x3 Conv+BN+SiLU (cv2[0] ++ cv3[0]) ----------------
        # taps folded into K: ONE MXU matmul with K = 9*cin
        rhs1 = folded_rhs(x_ref, 0, cin, 0)                   # (9*cin, n_lanes) bf16
        y1 = silu(jnp.dot(w1_ref[...], rhs1,
                          preferred_element_type=jnp.float32) + b1_ref[...])
        y1 = y1 * mask_ref[...]          # zero pitch-pad columns + alignment lanes

        # zero the scratch borders only once; the interior is fully rewritten
        # every grid step (grid dim is 'arbitrary' => step 0 runs first).
        @pl.when(pl.program_id(0) == 0)
        def _():
            pad_ref[...] = jnp.zeros_like(pad_ref)

        # lane-aligned, lane-dense interior store (off is a multiple of 128)
        pad_ref[:, off:off + n_lanes] = y1.astype(jnp.bfloat16)

        # ---- second 3x3 Conv+BN+SiLU: cv2[1] (g=4) + cv3[1], split dense -----
        base = off - P - 1
        parts = []
        for g in range(4):                                    # 4 cv2[1] groups
            rhs = folded_rhs(pad_ref, g * c2g, (g + 1) * c2g, base)
            parts.append(jnp.dot(w2g_ref[g], rhs,
                                 preferred_element_type=jnp.float32))
        rhs_c3 = folded_rhs(pad_ref, c2, c12, base)           # cv3[1] (dense)
        parts.append(jnp.dot(w2b_ref[...], rhs_c3,
                             preferred_element_type=jnp.float32))
        y2 = silu(jnp.concatenate(parts, axis=0) + b2_ref[...])

        # ---- merged 1x1 Conv2d with bias (cv2[2], g=4 ++ cv3[2]) -------------
        out = jnp.dot(w3_ref[...], y2.astype(jnp.bfloat16),
                      preferred_element_type=jnp.float32) + b3_ref[...]
        out_ref[...] = out            # single unmasked lane-dense (no, n_lanes) store

    return kernel, n_lanes, n_in, n_pad


def _level_forward(x_nchw, params, dims, use_bf16_sigmoid, vmem_limit):
    """x_nchw: (B, Cin, H, W) -> raw head output (B, no, H, W) for one level."""
    B, cin, H, W = x_nchw.shape
    c2, c3, no = dims
    c12 = c2 + c3
    P = W + 2
    kernel, n_lanes, n_in, n_pad = _make_level_kernel(
        H, W, cin, c2, c3, no, use_bf16_sigmoid)

    # zero-pad spatial dims, flatten to pitch layout, pad to n_in lanes, cast bf16
    # TODO(synk): the input padding could also be done in-kernel via a pre-zeroed
    #             VMEM scratch to save one HBM materialization (minor).
    x_sp = jnp.pad(x_nchw, ((0, 0), (0, 0), (1, 1), (1, 1)))    # (B, Cin, H+2, P)
    x_flat = x_sp.reshape(B, cin, (H + 2) * P)
    x_flat = jnp.pad(x_flat, ((0, 0), (0, 0), (0, n_in - (H + 2) * P)))
    x_flat = x_flat.astype(jnp.bfloat16)                        # (B, Cin, n_in)

    # validity mask: lane r is a real pixel iff (r % P < W) and (r < H*P)
    r = jnp.arange(n_lanes, dtype=jnp.int32)
    mask = (((r % P) < W) & (r < H * P)).astype(jnp.float32).reshape(1, n_lanes)

    def resident(a):
        return pl.BlockSpec(a.shape, lambda b: (0,) * a.ndim)

    slab = pl.pallas_call(
        kernel,
        out_shape=jax.ShapeDtypeStruct((B, no, n_lanes), jnp.float32),
        grid=(B,),
        in_specs=[pl.BlockSpec((None, cin, n_in), lambda b: (b, 0, 0)),
                  resident(mask)] + [resident(p) for p in params],
        out_specs=pl.BlockSpec((None, no, n_lanes), lambda b: (b, 0, 0)),
        scratch_shapes=[pltpu.VMEM((c12, n_pad), jnp.bfloat16)],
        compiler_params=pltpu.CompilerParams(
            dimension_semantics=("arbitrary",),   # sequential: step-0 scratch init
            vmem_limit_bytes=vmem_limit),
    )(x_flat, mask, *params)

    # strip alignment lanes + pitch-pad columns: (B, no, n_lanes) -> (B, no, H, W)
    return slab[:, :, :H * P].reshape(B, no, H, P)[:, :, :, :W]


# --------------------------------------------------------------------------
# Detection-decode kernel (DFL + dist2bbox + stride scale + class sigmoid)
# --------------------------------------------------------------------------

def _make_decode_kernel(nc, reg_max, use_bf16_sigmoid):
    R = reg_max

    if use_bf16_sigmoid:
        def _sig(v):
            return jax.nn.sigmoid(v.astype(jnp.bfloat16)).astype(jnp.float32)
    else:
        def _sig(v):
            return jax.nn.sigmoid(v)

    def kernel(xcat_ref, anc_ref, str_ref, out_ref):
        # xcat: (1, no, T)   anc: (2, T)   str: (1, T)   out: (1, 4+nc, T)
        x = xcat_ref[...]
        # tiny DFL projection vector, broadcast over lanes (no (B,R,A) blow-up)
        proj = jax.lax.broadcasted_iota(jnp.int32, (1, R, 1), 1).astype(jnp.float32)
        sides = []
        for k in range(4):                                    # l, t, r, b distances
            bk = x[:, k * R:(k + 1) * R, :]                   # (1, R, T)
            m = jnp.max(bk, axis=1, keepdims=True)
            e = jnp.exp(bk - m)
            s_e = jnp.sum(e, axis=1, keepdims=True)
            s_ep = jnp.sum(e * proj, axis=1, keepdims=True)
            sides.append(s_ep * pl.reciprocal(s_e, approx=True))   # DFL expectation
        lt_x, lt_y, rb_x, rb_y = sides

        s = str_ref[...][None]                                # (1, 1, T)
        ax = anc_ref[0:1, :][None]
        ay = anc_ref[1:2, :][None]
        cx = (ax + 0.5 * (rb_x - lt_x)) * s                   # xywh decode
        cy = (ay + 0.5 * (rb_y - lt_y)) * s
        bw = (lt_x + rb_x) * s
        bh = (lt_y + rb_y) * s
        cls = _sig(x[:, 4 * R:, :])                           # (1, nc, T)

        # single full-block (unmasked, lane-dense) store
        out_ref[...] = jnp.concatenate([cx, cy, bw, bh, cls], axis=1)

    return kernel


# --------------------------------------------------------------------------
# Parameter construction (deterministic, synthetic) and anchors
# --------------------------------------------------------------------------

def make_divisible(x, divisor):
    return math.ceil(x / divisor) * divisor


def _fold3x3(w):
    """Dense (cout, cin, 3, 3) conv weight -> (cout, 9*cin); K ordered tap-major
    (tap t = kh*3 + kw, channels within) to match the in-kernel window stacking."""
    cout, cin = w.shape[0], w.shape[1]
    return jnp.transpose(w, (0, 2, 3, 1)).reshape(cout, 9 * cin)


def _init_conv_bn(key, cin, cout, k, g, eps=1e-5):
    """Conv2d(bias=False, groups=g) + BatchNorm2d; BN folded into (W, b)."""
    k1, k2, k3, k4, k5 = jax.random.split(key, 5)
    w = jax.random.normal(k1, (cout, cin // g, k, k), jnp.float32) * 0.1
    gamma = 1.0 + 0.1 * jax.random.normal(k2, (cout,), jnp.float32)
    beta = 0.05 * jax.random.normal(k3, (cout,), jnp.float32)
    mean = 0.05 * jax.random.normal(k4, (cout,), jnp.float32)
    var = 1.0 + 0.1 * jax.random.uniform(k5, (cout,), jnp.float32)
    scale = gamma / jnp.sqrt(var + eps)
    return w * scale[:, None, None, None], beta - mean * scale


def _init_conv2d(key, cin, cout, k, g):
    """Plain Conv2d with bias (the head's last layers)."""
    k1, k2 = jax.random.split(key)
    w = jax.random.normal(k1, (cout, cin // g, k, k), jnp.float32) * 0.1
    b = 0.05 * jax.random.normal(k2, (cout,), jnp.float32)
    return w, b


def make_anchors(hw_shapes, strides, offset=0.5):
    anchor_points, stride_tensor = [], []
    for (h, w), s in zip(hw_shapes, strides):
        sx = jnp.arange(w, dtype=jnp.float32) + offset
        sy = jnp.arange(h, dtype=jnp.float32) + offset
        syy, sxx = jnp.meshgrid(sy, sx, indexing='ij')
        anchor_points.append(jnp.stack((sxx, syy), -1).reshape(-1, 2))
        stride_tensor.append(jnp.full((h * w, 1), s, dtype=jnp.float32))
    return jnp.concatenate(anchor_points, 0), jnp.concatenate(stride_tensor, 0)


# --------------------------------------------------------------------------
# DDetect head
# --------------------------------------------------------------------------

class DDetectPallas:
    def __init__(self, nc=8, ch=(16, 32), strides=(8.0, 16.0), key=jax.random.PRNGKey(0)):
        self.nc = nc
        self.nl = len(ch)
        self.reg_max = 16
        self.no = nc + self.reg_max * 4
        # NOTE: DDetect.__init__ sets stride = zeros(nl); the model builder fills it.
        self.strides = tuple(float(s) for s in strides)
        self.use_bf16_sigmoid = _bf16_eup_ok()
        self.vmem_limit = 48 * 1024 * 1024       # below v7x's 64 MiB physical VMEM

        c2 = make_divisible(max(ch[0] // 4, self.reg_max * 4, 16), 4)
        c3 = max(ch[0], min(self.nc * 2, 128))
        self.c2, self.c3 = c2, c3
        c2g = c2 // 4
        rg = (4 * self.reg_max) // 4             # cv2[2] per-group out channels

        self.level_params = []
        for i, cin in enumerate(ch):
            ks = jax.random.split(jax.random.fold_in(key, i), 6)
            # cv2: Conv(cin,c2,3), Conv(c2,c2,3,g=4), Conv2d(c2, 4*reg_max, 1, g=4)
            w2_1, b2_1 = _init_conv_bn(ks[0], cin, c2, 3, 1)
            w2_2, b2_2 = _init_conv_bn(ks[1], c2, c2, 3, 4)
            w2_3, b2_3 = _init_conv2d(ks[2], c2, 4 * self.reg_max, 1, 4)
            # cv3: Conv(cin,c3,3), Conv(c3,c3,3), Conv2d(c3, nc, 1)
            w3_1, b3_1 = _init_conv_bn(ks[3], cin, c3, 3, 1)
            w3_2, b3_2 = _init_conv_bn(ks[4], c3, c3, 3, 1)
            w3_3, b3_3 = _init_conv2d(ks[5], c3, self.nc, 1, 1)

            # merged first 3x3 conv (shared input, concatenated outputs), taps->K
            w1 = _fold3x3(jnp.concatenate([w2_1, w3_1], axis=0))     # (c12, 9*cin)
            b1 = jnp.concatenate([b2_1, b3_1])

            # second 3x3 conv, split into dense folded blocks: 4 cv2 groups + cv3
            w2g = jnp.stack([_fold3x3(w2_2[g * c2g:(g + 1) * c2g]) for g in range(4)])
            w2b = _fold3x3(w3_2)                                     # (c3, 9*c3)
            b2 = jnp.concatenate([b2_2, b3_2])

            # merged 1x1 conv with bias (block structure kept: single small matmul,
            # output lands in cat() channel order for one lane-dense store)
            w3 = jnp.zeros((self.no, c2 + c3), jnp.float32)
            for g in range(4):
                w3 = w3.at[g * rg:(g + 1) * rg, g * c2g:(g + 1) * c2g].set(
                    w2_3[g * rg:(g + 1) * rg, :, 0, 0])
            w3 = w3.at[4 * self.reg_max:, c2:].set(w3_3[:, :, 0, 0])
            b3 = jnp.concatenate([b2_3, b3_3])

            self.level_params.append((
                w1.astype(jnp.bfloat16),
                b1.reshape(-1, 1).astype(jnp.float32),
                w2g.astype(jnp.bfloat16),
                w2b.astype(jnp.bfloat16),
                b2.reshape(-1, 1).astype(jnp.float32),
                w3.astype(jnp.bfloat16),
                b3.reshape(-1, 1).astype(jnp.float32),
            ))

    def __call__(self, x):
        # TODO(synk): training-mode return path, `dynamic` shape caching and the
        #             tf / tf-int8 export branches are not implemented
        #             (static inference path only).
        x = list(x)
        dims = (self.c2, self.c3, self.no)
        feats, slabs, hw_shapes = [], [], []
        for i in range(self.nl):
            B = x[i].shape[0]
            H, W = x[i].shape[2], x[i].shape[3]
            hw_shapes.append((H, W))
            fi = _level_forward(x[i].astype(jnp.float32), self.level_params[i],
                                dims, self.use_bf16_sigmoid, self.vmem_limit)
            feats.append(fi)
            slabs.append(fi.reshape(B, self.no, H * W))

        B = feats[0].shape[0]
        # TODO(synk): the per-level strip/reshape/concat is still an XLA pass;
        #             fusing it into the decode kernel (per-level A offsets) is a
        #             further optimization not applied here.
        x_cat = jnp.concatenate(slabs, axis=2)                 # (B, no, A)
        A = x_cat.shape[2]

        anchor_points, stride_tensor = make_anchors(hw_shapes, self.strides, 0.5)
        anchors = anchor_points.T                              # (2, A)
        strides_t = stride_tensor.T                            # (1, A)

        # lane-align and tile the anchor axis; grid the decode kernel over (B, A)
        a_blocks = pl.cdiv(A, 128)
        tile_blocks = max(d for d in range(1, min(a_blocks, 16) + 1)
                          if a_blocks % d == 0)
        tile_a = 128 * tile_blocks
        A_pad = a_blocks * 128                                 # multiple of tile_a
        pad_a = A_pad - A
        x_cat_p = jnp.pad(x_cat, ((0, 0), (0, 0), (0, pad_a)))
        anchors_p = jnp.pad(anchors, ((0, 0), (0, pad_a)))
        strides_p = jnp.pad(strides_t, ((0, 0), (0, pad_a)))

        y_pad = pl.pallas_call(
            _make_decode_kernel(self.nc, self.reg_max, self.use_bf16_sigmoid),
            out_shape=jax.ShapeDtypeStruct((B, 4 + self.nc, A_pad), jnp.float32),
            grid=(B, A_pad // tile_a),
            in_specs=[pl.BlockSpec((1, self.no, tile_a), lambda b, a: (b, 0, a)),
                      pl.BlockSpec((2, tile_a), lambda b, a: (0, a)),
                      pl.BlockSpec((1, tile_a), lambda b, a: (0, a))],
            out_specs=pl.BlockSpec((1, 4 + self.nc, tile_a), lambda b, a: (b, 0, a)),
            compiler_params=pltpu.CompilerParams(
                dimension_semantics=("parallel", "parallel"),
                vmem_limit_bytes=self.vmem_limit),
        )(x_cat_p, anchors_p, strides_p)

        y = y_pad[:, :, :A]
        return y, feats


# --------------------------------------------------------------------------

if __name__ == "__main__":
    key = jax.random.PRNGKey(0)
    k_in0, k_in1, k_par = jax.random.split(key, 3)

    # Two feature levels (strides 8 and 16 of a 64x64 image): NCHW inputs.
    x0 = jax.random.normal(k_in0, (2, 16, 8, 8), jnp.float32)
    x1 = jax.random.normal(k_in1, (2, 32, 4, 4), jnp.float32)

    head = DDetectPallas(nc=8, ch=(16, 32), strides=(8.0, 16.0), key=k_par)

    fwd = jax.jit(lambda a, b: head([a, b]))
    y, feats = fwd(x0, x1)

    jax.block_until_ready(y)
    for f in feats:
        jax.block_until_ready(f)

    assert y.shape == (2, 4 + 8, 8 * 8 + 4 * 4)
    assert feats[0].shape == (2, 8 + 64, 8, 8)
    assert feats[1].shape == (2, 8 + 64, 4, 4)
    print("KERNEL_OK")
</pallas_src>

<mosaic_0001>
module attributes {stable_mosaic.version = 11 : i64} {
  func.func @kernel(%arg0: i32, %arg1: memref<1x16x256xbf16, #tpu.memory_space<vmem>>, %arg2: memref<1x128xf32, #tpu.memory_space<vmem>>, %arg3: memref<80x144xbf16, #tpu.memory_space<vmem>>, %arg4: memref<80x1xf32, #tpu.memory_space<vmem>>, %arg5: memref<4x16x144xbf16, #tpu.memory_space<vmem>>, %arg6: memref<16x144xbf16, #tpu.memory_space<vmem>>, %arg7: memref<80x1xf32, #tpu.memory_space<vmem>>, %arg8: memref<72x80xbf16, #tpu.memory_space<vmem>>, %arg9: memref<72x1xf32, #tpu.memory_space<vmem>>, %arg10: memref<1x72x128xf32, #tpu.memory_space<vmem>>, %arg11: memref<80x384xbf16, #tpu.memory_space<vmem>>) attributes {dimension_semantics = [#tpu.dimension_semantics<arbitrary>], iteration_bounds = array<i64: 2>, scalar_prefetch = 0 : i64, scratch_operands = 1 : i64, tpu.core_type = #tpu.core_type<tc>, window_params = [{transform_indices = @transform_0, window_bounds = array<i64: 1, 16, 256>}, {pipeline_mode = #tpu.pipeline_mode<synchronous>, transform_indices = @transform_1, window_bounds = array<i64: 1, 128>}, {pipeline_mode = #tpu.pipeline_mode<synchronous>, transform_indices = @transform_2, window_bounds = array<i64: 80, 144>}, {pipeline_mode = #tpu.pipeline_mode<synchronous>, transform_indices = @transform_3, window_bounds = array<i64: 80, 1>}, {pipeline_mode = #tpu.pipeline_mode<synchronous>, transform_indices = @transform_4, window_bounds = array<i64: 4, 16, 144>}, {pipeline_mode = #tpu.pipeline_mode<synchronous>, transform_indices = @transform_5, window_bounds = array<i64: 16, 144>}, {pipeline_mode = #tpu.pipeline_mode<synchronous>, transform_indices = @transform_6, window_bounds = array<i64: 80, 1>}, {pipeline_mode = #tpu.pipeline_mode<synchronous>, transform_indices = @transform_7, window_bounds = array<i64: 72, 80>}, {pipeline_mode = #tpu.pipeline_mode<synchronous>, transform_indices = @transform_8, window_bounds = array<i64: 72, 1>}, {transform_indices = @transform_9, window_bounds = array<i64: 1, 72, 128>}]} {
    %c0 = arith.constant 0 : index
    %c0_0 = arith.constant 0 : index
    %c0_1 = arith.constant 0 : index
    %0 = vector.load %arg1[%c0, %c0_0, %c0_1] : memref<1x16x256xbf16, #tpu.memory_space<vmem>>, vector<1x16x128xbf16>
    %1 = vector.shape_cast %0 : vector<1x16x128xbf16> to vector<16x128xbf16>
    %c0_2 = arith.constant 0 : index
    %c0_3 = arith.constant 0 : index
    %c1 = arith.constant 1 : index
    %2 = vector.load %arg1[%c0_2, %c0_3, %c1] : memref<1x16x256xbf16, #tpu.memory_space<vmem>>, vector<1x16x128xbf16>
    %3 = vector.shape_cast %2 : vector<1x16x128xbf16> to vector<16x128xbf16>
    %c0_4 = arith.constant 0 : index
    %c0_5 = arith.constant 0 : index
    %c2 = arith.constant 2 : index
    %4 = vector.load %arg1[%c0_4, %c0_5, %c2] : memref<1x16x256xbf16, #tpu.memory_space<vmem>>, vector<1x16x128xbf16>
    %5 = vector.shape_cast %4 : vector<1x16x128xbf16> to vector<16x128xbf16>
    %c0_6 = arith.constant 0 : index
    %c0_7 = arith.constant 0 : index
    %c10 = arith.constant 10 : index
    %6 = vector.load %arg1[%c0_6, %c0_7, %c10] : memref<1x16x256xbf16, #tpu.memory_space<vmem>>, vector<1x16x128xbf16>
    %7 = vector.shape_cast %6 : vector<1x16x128xbf16> to vector<16x128xbf16>
    %c0_8 = arith.constant 0 : index
    %c0_9 = arith.constant 0 : index
    %c11 = arith.constant 11 : index
    %8 = vector.load %arg1[%c0_8, %c0_9, %c11] : memref<1x16x256xbf16, #tpu.memory_space<vmem>>, vector<1x16x128xbf16>
    %9 = vector.shape_cast %8 : vector<1x16x128xbf16> to vector<16x128xbf16>
    %c0_10 = arith.constant 0 : index
    %c0_11 = arith.constant 0 : index
    %c12 = arith.constant 12 : index
    %10 = vector.load %arg1[%c0_10, %c0_11, %c12] : memref<1x16x256xbf16, #tpu.memory_space<vmem>>, vector<1x16x128xbf16>
    %11 = vector.shape_cast %10 : vector<1x16x128xbf16> to vector<16x128xbf16>
    %c0_12 = arith.constant 0 : index
    %c0_13 = arith.constant 0 : index
    %c20 = arith.constant 20 : index
    %12 = vector.load %arg1[%c0_12, %c0_13, %c20] : memref<1x16x256xbf16, #tpu.memory_space<vmem>>, vector<1x16x128xbf16>
    %13 = vector.shape_cast %12 : vector<1x16x128xbf16> to vector<16x128xbf16>
    %c0_14 = arith.constant 0 : index
    %c0_15 = arith.constant 0 : index
    %c21 = arith.constant 21 : index
    %14 = vector.load %arg1[%c0_14, %c0_15, %c21] : memref<1x16x256xbf16, #tpu.memory_space<vmem>>, vector<1x16x128xbf16>
    %15 = vector.shape_cast %14 : vector<1x16x128xbf16> to vector<16x128xbf16>
    %c0_16 = arith.constant 0 : index
    %c0_17 = arith.constant 0 : index
    %c22 = arith.constant 22 : index
    %16 = vector.load %arg1[%c0_16, %c0_17, %c22] : memref<1x16x256xbf16, #tpu.memory_space<vmem>>, vector<1x16x128xbf16>
    %17 = vector.shape_cast %16 : vector<1x16x128xbf16> to vector<16x128xbf16>
    %18 = tpu.concatenate %1, %3, %5, %7, %9, %11, %13, %15, %17 in 0 : vector<16x128xbf16>, vector<16x128xbf16>, vector<16x128xbf16>, vector<16x128xbf16>, vector<16x128xbf16>, vector<16x128xbf16>, vector<16x128xbf16>, vector<16x128xbf16>, vector<16x128xbf16> -> vector<144x128xbf16>
    %c0_18 = arith.constant 0 : index
    %c0_19 = arith.constant 0 : index
    %19 = vector.load %arg3[%c0_18, %c0_19] : memref<80x144xbf16, #tpu.memory_space<vmem>>, vector<80x144xbf16>
    %cst = arith.constant dense<0.000000e+00> : vector<80x128xf32>
    %20 = tpu.matmul %19, %18, %cst {dimension_numbers = #tpu.dot_dimension_numbers<[1], [0], [0], [1], [0, 0, 1, 1], [], []>} : vector<80x144xbf16>, vector<144x128xbf16>, vector<80x128xf32> -> vector<80x128xf32>
    %c0_20 = arith.constant 0 : index
    %c0_21 = arith.constant 0 : index
    %21 = vector.load %arg4[%c0_20, %c0_21] : memref<80x1xf32, #tpu.memory_space<vmem>>, vector<80x1xf32>
    %22 = vector.broadcast %21 : vector<80x1xf32> to vector<80x128xf32>
    %23 = arith.addf %20, %22 : vector<80x128xf32>
    %24 = arith.negf %23 : vector<80x128xf32>
    %25 = math.exp %24 : vector<80x128xf32>
    %cst_22 = arith.constant 1.000000e+00 : f32
    %26 = vector.broadcast %cst_22 : f32 to vector<80x128xf32>
    %27 = arith.addf %26, %25 : vector<80x128xf32>
    %28 = arith.divf %26, %27 : vector<80x128xf32>
    %29 = arith.mulf %23, %28 : vector<80x128xf32>
    %c0_23 = arith.constant 0 : index
    %c0_24 = arith.constant 0 : index
    %30 = vector.load %arg2[%c0_23, %c0_24] : memref<1x128xf32, #tpu.memory_space<vmem>>, vector<1x128xf32>
    %31 = vector.broadcast %30 : vector<1x128xf32> to vector<80x128xf32>
    %32 = arith.mulf %29, %31 : vector<80x128xf32>
    %c0_i32 = arith.constant 0 : i32
    %33 = arith.cmpi eq, %arg0, %c0_i32 : i32
    %34 = arith.extui %33 : i1 to i32
    %c0_i32_25 = arith.constant 0 : i32
    %35 = arith.cmpi ne, %34, %c0_i32_25 : i32
    scf.if %35 {
      %cst_134 = arith.constant 0.000000e+00 : bf16
      %121 = vector.broadcast %cst_134 : bf16 to vector<80x384xbf16>
      %c0_135 = arith.constant 0 : index
      %c0_136 = arith.constant 0 : index
      %122 = vector.load %arg11[%c0_135, %c0_136] : memref<80x384xbf16, #tpu.memory_space<vmem>>, vector<80x384xbf16>
      tpu.vector_store %arg11[%c0_135, %c0_136], %121 {strides = array<i32>} : memref<80x384xbf16, #tpu.memory_space<vmem>>, vector<80x384xbf16>,
    } else {
    }
    %36 = arith.truncf %32 : vector<80x128xf32> to vector<80x128xbf16>
    %c0_26 = arith.constant 0 : index
    %c128 = arith.constant 128 : index
    %37 = vector.load %arg11[%c0_26, %c128] : memref<80x384xbf16, #tpu.memory_space<vmem>>, vector<80x128xbf16>
    tpu.vector_store %arg11[%c0_26, %c128], %36 {strides = array<i32>} : memref<80x384xbf16, #tpu.memory_space<vmem>>, vector<80x128xbf16>,
    %c0_27 = arith.constant 0 : index
    %c117 = arith.constant 117 : index
    %38 = vector.load %arg11[%c0_27, %c117] : memref<80x384xbf16, #tpu.memory_space<vmem>>, vector<16x128xbf16>
    %c0_28 = arith.constant 0 : index
    %c118 = arith.constant 118 : index
    %39 = vector.load %arg11[%c0_28, %c118] : memref<80x384xbf16, #tpu.memory_space<vmem>>, vector<16x128xbf16>
    %c0_29 = arith.constant 0 : index
    %c119 = arith.constant 119 : index
    %40 = vector.load %arg11[%c0_29, %c119] : memref<80x384xbf16, #tpu.memory_space<vmem>>, vector<16x128xbf16>
    %c0_30 = arith.constant 0 : index
    %c127 = arith.constant 127 : index
    %41 = vector.load %arg11[%c0_30, %c127] : memref<80x384xbf16, #tpu.memory_space<vmem>>, vector<16x128xbf16>
    %c0_31 = arith.constant 0 : index
    %c128_32 = arith.constant 128 : index
    %42 = vector.load %arg11[%c0_31, %c128_32] : memref<80x384xbf16, #tpu.memory_space<vmem>>, vector<16x128xbf16>
    %c0_33 = arith.constant 0 : index
    %c129 = arith.constant 129 : index
    %43 = vector.load %arg11[%c0_33, %c129] : memref<80x384xbf16, #tpu.memory_space<vmem>>, vector<16x128xbf16>
    %c0_34 = arith.constant 0 : index
    %c137 = arith.constant 137 : index
    %44 = vector.load %arg11[%c0_34, %c137] : memref<80x384xbf16, #tpu.memory_space<vmem>>, vector<16x128xbf16>
    %c0_35 = arith.constant 0 : index
    %c138 = arith.constant 138 : index
    %45 = vector.load %arg11[%c0_35, %c138] : memref<80x384xbf16, #tpu.memory_space<vmem>>, vector<16x128xbf16>
    %c0_36 = arith.constant 0 : index
    %c139 = arith.constant 139 : index
    %46 = vector.load %arg11[%c0_36, %c139] : memref<80x384xbf16, #tpu.memory_space<vmem>>, vector<16x128xbf16>
    %47 = tpu.concatenate %38, %39, %40, %41, %42, %43, %44, %45, %46 in 0 : vector<16x128xbf16>, vector<16x128xbf16>, vector<16x128xbf16>, vector<16x128xbf16>, vector<16x128xbf16>, vector<16x128xbf16>, vector<16x128xbf16>, vector<16x128xbf16>, vector<16x128xbf16> -> vector<144x128xbf16>
    %c0_37 = arith.constant 0 : index
    %c0_38 = arith.constant 0 : index
    %c0_39 = arith.constant 0 : index
    %48 = vector.load %arg5[%c0_37, %c0_38, %c0_39] : memref<4x16x144xbf16, #tpu.memory_space<vmem>>, vector<1x16x144xbf16>
    %49 = vector.shape_cast %48 : vector<1x16x144xbf16> to vector<16x144xbf16>
    %cst_40 = arith.constant dense<0.000000e+00> : vector<16x128xf32>
    %50 = tpu.matmul %49, %47, %cst_40 {dimension_numbers = #tpu.dot_dimension_numbers<[1], [0], [0], [1], [0, 0, 1, 1], [], []>} : vector<16x144xbf16>, vector<144x128xbf16>, vector<16x128xf32> -> vector<16x128xf32>
    %c16 = arith.constant 16 : index
    %c117_41 = arith.constant 117 : index
    %51 = vector.load %arg11[%c16, %c117_41] : memref<80x384xbf16, #tpu.memory_space<vmem>>, vector<16x128xbf16>
    %c16_42 = arith.constant 16 : index
    %c118_43 = arith.constant 118 : index
    %52 = vector.load %arg11[%c16_42, %c118_43] : memref<80x384xbf16, #tpu.memory_space<vmem>>, vector<16x128xbf16>
    %c16_44 = arith.constant 16 : index
    %c119_45 = arith.constant 119 : index
    %53 = vector.load %arg11[%c16_44, %c119_45] : memref<80x384xbf16, #tpu.memory_space<vmem>>, vector<16x128xbf16>
    %c16_46 = arith.constant 16 : index
    %c127_47 = arith.constant 127 : index
    %54 = vector.load %arg11[%c16_46, %c127_47] : memref<80x384xbf16, #tpu.memory_space<vmem>>, vector<16x128xbf16>
    %c16_48 = arith.constant 16 : index
    %c128_49 = arith.constant 128 : index
    %55 = vector.load %arg11[%c16_48, %c128_49] : memref<80x384xbf16, #tpu.memory_space<vmem>>, vector<16x128xbf16>
    %c16_50 = arith.constant 16 : index
    %c129_51 = arith.constant 129 : index
    %56 = vector.load %arg11[%c16_50, %c129_51] : memref<80x384xbf16, #tpu.memory_space<vmem>>, vector<16x128xbf16>
    %c16_52 = arith.constant 16 : index
    %c137_53 = arith.constant 137 : index
    %57 = vector.load %arg11[%c16_52, %c137_53] : memref<80x384xbf16, #tpu.memory_space<vmem>>, vector<16x128xbf16>
    %c16_54 = arith.constant 16 : index
    %c138_55 = arith.constant 138 : index
    %58 = vector.load %arg11[%c16_54, %c138_55] : memref<80x384xbf16, #tpu.memory_space<vmem>>, vector<16x128xbf16>
    %c16_56 = arith.constant 16 : index
    %c139_57 = arith.constant 139 : index
    %59 = vector.load %arg11[%c16_56, %c139_57] : memref<80x384xbf16, #tpu.memory_space<vmem>>, vector<16x128xbf16>
    %60 = tpu.concatenate %51, %52, %53, %54, %55, %56, %57, %58, %59 in 0 : vector<16x128xbf16>, vector<16x128xbf16>, vector<16x128xbf16>, vector<16x128xbf16>, vector<16x128xbf16>, vector<16x128xbf16>, vector<16x128xbf16>, vector<16x128xbf16>, vector<16x128xbf16> -> vector<144x128xbf16>
    %c1_58 = arith.constant 1 : index
    %c0_59 = arith.constant 0 : index
    %c0_60 = arith.constant 0 : index
    %61 = vector.load %arg5[%c1_58, %c0_59, %c0_60] : memref<4x16x144xbf16, #tpu.memory_space<vmem>>, vector<1x16x144xbf16>
    %62 = vector.shape_cast %61 : vector<1x16x144xbf16> to vector<16x144xbf16>
    %cst_61 = arith.constant dense<0.000000e+00> : vector<16x128xf32>
    %63 = tpu.matmul %62, %60, %cst_61 {dimension_numbers = #tpu.dot_dimension_numbers<[1], [0], [0], [1], [0, 0, 1, 1], [], []>} : vector<16x144xbf16>, vector<144x128xbf16>, vector<16x128xf32> -> vector<16x128xf32>
    %c32 = arith.constant 32 : index
    %c117_62 = arith.constant 117 : index
    %64 = vector.load %arg11[%c32, %c117_62] : memref<80x384xbf16, #tpu.memory_space<vmem>>, vector<16x128xbf16>
    %c32_63 = arith.constant 32 : index
    %c118_64 = arith.constant 118 : index
    %65 = vector.load %arg11[%c32_63, %c118_64] : memref<80x384xbf16, #tpu.memory_space<vmem>>, vector<16x128xbf16>
    %c32_65 = arith.constant 32 : index
    %c119_66 = arith.constant 119 : index
    %66 = vector.load %arg11[%c32_65, %c119_66] : memref<80x384xbf16, #tpu.memory_space<vmem>>, vector<16x128xbf16>
    %c32_67 = arith.constant 32 : index
    %c127_68 = arith.constant 127 : index
    %67 = vector.load %arg11[%c32_67, %c127_68] : memref<80x384xbf16, #tpu.memory_space<vmem>>, vector<16x128xbf16>
    %c32_69 = arith.constant 32 : index
    %c128_70 = arith.constant 128 : index
    %68 = vector.load %arg11[%c32_69, %c128_70] : memref<80x384xbf16, #tpu.memory_space<vmem>>, vector<16x128xbf16>
    %c32_71 = arith.constant 32 : index
    %c129_72 = arith.constant 129 : index
    %69 = vector.load %arg11[%c32_71, %c129_72] : memref<80x384xbf16, #tpu.memory_space<vmem>>, vector<16x128xbf16>
    %c32_73 = arith.constant 32 : index
    %c137_74 = arith.constant 137 : index
    %70 = vector.load %arg11[%c32_73, %c137_74] : memref<80x384xbf16, #tpu.memory_space<vmem>>, vector<16x128xbf16>
    %c32_75 = arith.constant 32 : index
    %c138_76 = arith.constant 138 : index
    %71 = vector.load %arg11[%c32_75, %c138_76] : memref<80x384xbf16, #tpu.memory_space<vmem>>, vector<16x128xbf16>
    %c32_77 = arith.constant 32 : index
    %c139_78 = arith.constant 139 : index
    %72 = vector.load %arg11[%c32_77, %c139_78] : memref<80x384xbf16, #tpu.memory_space<vmem>>, vector<16x128xbf16>
    %73 = tpu.concatenate %64, %65, %66, %67, %68, %69, %70, %71, %72 in 0 : vector<16x128xbf16>, vector<16x128xbf16>, vector<16x128xbf16>, vector<16x128xbf16>, vector<16x128xbf16>, vector<16x128xbf16>, vector<16x128xbf16>, vector<16x128xbf16>, vector<16x128xbf16> -> vector<144x128xbf16>
    %c2_79 = arith.constant 2 : index
    %c0_80 = arith.constant 0 : index
    %c0_81 = arith.constant 0 : index
    %74 = vector.load %arg5[%c2_79, %c0_80, %c0_81] : memref<4x16x144xbf16, #tpu.memory_space<vmem>>, vector<1x16x144xbf16>
    %75 = vector.shape_cast %74 : vector<1x16x144xbf16> to vector<16x144xbf16>
    %cst_82 = arith.constant dense<0.000000e+00> : vector<16x128xf32>
    %76 = tpu.matmul %75, %73, %cst_82 {dimension_numbers = #tpu.dot_dimension_numbers<[1], [0], [0], [1], [0, 0, 1, 1], [], []>} : vector<16x144xbf16>, vector<144x128xbf16>, vector<16x128xf32> -> vector<16x128xf32>
    %c48 = arith.constant 48 : index
    %c117_83 = arith.constant 117 : index
    %77 = vector.load %arg11[%c48, %c117_83] : memref<80x384xbf16, #tpu.memory_space<vmem>>, vector<16x128xbf16>
    %c48_84 = arith.constant 48 : index
    %c118_85 = arith.constant 118 : index
    %78 = vector.load %arg11[%c48_84, %c118_85] : memref<80x384xbf16, #tpu.memory_space<vmem>>, vector<16x128xbf16>
    %c48_86 = arith.constant 48 : index
    %c119_87 = arith.constant 119 : index
    %79 = vector.load %arg11[%c48_86, %c119_87] : memref<80x384xbf16, #tpu.memory_space<vmem>>, vector<16x128xbf16>
    %c48_88 = arith.constant 48 : index
    %c127_89 = arith.constant 127 : index
    %80 = vector.load %arg11[%c48_88, %c127_89] : memref<80x384xbf16, #tpu.memory_space<vmem>>, vector<16x128xbf16>
    %c48_90 = arith.constant 48 : index
    %c128_91 = arith.constant 128 : index
    %81 = vector.load %arg11[%c48_90, %c128_91] : memref<80x384xbf16, #tpu.memory_space<vmem>>, vector<16x128xbf16>
    %c48_92 = arith.constant 48 : index
    %c129_93 = arith.constant 129 : index
    %82 = vector.load %arg11[%c48_92, %c129_93] : memref<80x384xbf16, #tpu.memory_space<vmem>>, vector<16x128xbf16>
    %c48_94 = arith.constant 48 : index
    %c137_95 = arith.constant 137 : index
    %83 = vector.load %arg11[%c48_94, %c137_95] : memref<80x384xbf16, #tpu.memory_space<vmem>>, vector<16x128xbf16>
    %c48_96 = arith.constant 48 : index
    %c138_97 = arith.constant 138 : index
    %84 = vector.load %arg11[%c48_96, %c138_97] : memref<80x384xbf16, #tpu.memory_space<vmem>>, vector<16x128xbf16>
    %c48_98 = arith.constant 48 : index
    %c139_99 = arith.constant 139 : index
    %85 = vector.load %arg11[%c48_98, %c139_99] : memref<80x384xbf16, #tpu.memory_space<vmem>>, vector<16x128xbf16>
    %86 = tpu.concatenate %77, %78, %79, %80, %81, %82, %83, %84, %85 in 0 : vector<16x128xbf16>, vector<16x128xbf16>, vector<16x128xbf16>, vector<16x128xbf16>, vector<16x128xbf16>, vector<16x128xbf16>, vector<16x128xbf16>, vector<16x128xbf16>, vector<16x128xbf16> -> vector<144x128xbf16>
    %c3 = arith.constant 3 : index
    %c0_100 = arith.constant 0 : index
    %c0_101 = arith.constant 0 : index
    %87 = vector.load %arg5[%c3, %c0_100, %c0_101] : memref<4x16x144xbf16, #tpu.memory_space<vmem>>, vector<1x16x144xbf16>
    %88 = vector.shape_cast %87 : vector<1x16x144xbf16> to vector<16x144xbf16>
    %cst_102 = arith.constant dense<0.000000e+00> : vector<16x128xf32>
    %89 = tpu.matmul %88, %86, %cst_102 {dimension_numbers = #tpu.dot_dimension_numbers<[1], [0], [0], [1], [0, 0, 1, 1], [], []>} : vector<16x144xbf16>, vector<144x128xbf16>, vector<16x128xf32> -> vector<16x128xf32>
    %c64 = arith.constant 64 : index
    %c117_103 = arith.constant 117 : index
    %90 = vector.load %arg11[%c64, %c117_103] : memref<80x384xbf16, #tpu.memory_space<vmem>>, vector<16x128xbf16>
    %c64_104 = arith.constant 64 : index
    %c118_105 = arith.constant 118 : index
    %91 = vector.load %arg11[%c64_104, %c118_105] : memref<80x384xbf16, #tpu.memory_space<vmem>>, vector<16x128xbf16>
    %c64_106 = arith.constant 64 : index
    %c119_107 = arith.constant 119 : index
    %92 = vector.load %arg11[%c64_106, %c119_107] : memref<80x384xbf16, #tpu.memory_space<vmem>>, vector<16x128xbf16>
    %c64_108 = arith.constant 64 : index
    %c127_109 = arith.constant 127 : index
    %93 = vector.load %arg11[%c64_108, %c127_109] : memref<80x384xbf16, #tpu.memory_space<vmem>>, vector<16x128xbf16>
    %c64_110 = arith.constant 64 : index
    %c128_111 = arith.constant 128 : index
    %94 = vector.load %arg11[%c64_110, %c128_111] : memref<80x384xbf16, #tpu.memory_space<vmem>>, vector<16x128xbf16>
    %c64_112 = arith.constant 64 : index
    %c129_113 = arith.constant 129 : index
    %95 = vector.load %arg11[%c64_112, %c129_113] : memref<80x384xbf16, #tpu.memory_space<vmem>>, vector<16x128xbf16>
    %c64_114 = arith.constant 64 : index
    %c137_115 = arith.constant 137 : index
    %96 = vector.load %arg11[%c64_114, %c137_115] : memref<80x384xbf16, #tpu.memory_space<vmem>>, vector<16x128xbf16>
    %c64_116 = arith.constant 64 : index
    %c138_117 = arith.constant 138 : index
    %97 = vector.load %arg11[%c64_116, %c138_117] : memref<80x384xbf16, #tpu.memory_space<vmem>>, vector<16x128xbf16>
    %c64_118 = arith.constant 64 : index
    %c139_119 = arith.constant 139 : index
    %98 = vector.load %arg11[%c64_118, %c139_119] : memref<80x384xbf16, #tpu.memory_space<vmem>>, vector<16x128xbf16>
    %99 = tpu.concatenate %90, %91, %92, %93, %94, %95, %96, %97, %98 in 0 : vector<16x128xbf16>, vector<16x128xbf16>, vector<16x128xbf16>, vector<16x128xbf16>, vector<16x128xbf16>, vector<16x128xbf16>, vector<16x128xbf16>, vector<16x128xbf16>, vector<16x128xbf16> -> vector<144x128xbf16>
    %c0_120 = arith.constant 0 : index
    %c0_121 = arith.constant 0 : index
    %100 = vector.load %arg6[%c0_120, %c0_121] : memref<16x144xbf16, #tpu.memory_space<vmem>>, vector<16x144xbf16>
    %cst_122 = arith.constant dense<0.000000e+00> : vector<16x128xf32>
    %101 = tpu.matmul %100, %99, %cst_122 {dimension_numbers = #tpu.dot_dimension_numbers<[1], [0], [0], [1], [0, 0, 1, 1], [], []>} : vector<16x144xbf16>, vector<144x128xbf16>, vector<16x128xf32> -> vector<16x128xf32>
    %102 = tpu.concatenate %50, %63, %76, %89, %101 in 0 : vector<16x128xf32>, vector<16x128xf32>, vector<16x128xf32>, vector<16x128xf32>, vector<16x128xf32> -> vector<80x128xf32>
    %c0_123 = arith.constant 0 : index
    %c0_124 = arith.constant 0 : index
    %103 = vector.load %arg7[%c0_123, %c0_124] : memref<80x1xf32, #tpu.memory_space<vmem>>, vector<80x1xf32>
    %104 = vector.broadcast %103 : vector<80x1xf32> to vector<80x128xf32>
    %105 = arith.addf %102, %104 : vector<80x128xf32>
    %106 = arith.negf %105 : vector<80x128xf32>
    %107 = math.exp %106 : vector<80x128xf32>
    %cst_125 = arith.constant 1.000000e+00 : f32
    %108 = vector.broadcast %cst_125 : f32 to vector<80x128xf32>
    %109 = arith.addf %108, %107 : vector<80x128xf32>
    %110 = arith.divf %108, %109 : vector<80x128xf32>
    %111 = arith.mulf %105, %110 : vector<80x128xf32>
    %c0_126 = arith.constant 0 : index
    %c0_127 = arith.constant 0 : index
    %112 = vector.load %arg8[%c0_126, %c0_127] : memref<72x80xbf16, #tpu.memory_space<vmem>>, vector<72x80xbf16>
    %113 = arith.truncf %111 : vector<80x128xf32> to vector<80x128xbf16>
    %cst_128 = arith.constant dense<0.000000e+00> : vector<72x128xf32>
    %114 = tpu.matmul %112, %113, %cst_128 {dimension_numbers = #tpu.dot_dimension_numbers<[1], [0], [0], [1], [0, 0, 1, 1], [], []>} : vector<72x80xbf16>, vector<80x128xbf16>, vector<72x128xf32> -> vector<72x128xf32>
    %c0_129 = arith.constant 0 : index
    %c0_130 = arith.constant 0 : index
    %115 = vector.load %arg9[%c0_129, %c0_130] : memref<72x1xf32, #tpu.memory_space<vmem>>, vector<72x1xf32>
    %116 = vector.broadcast %115 : vector<72x1xf32> to vector<72x128xf32>
    %117 = arith.addf %114, %116 : vector<72x128xf32>
    %c0_131 = arith.constant 0 : index
    %c0_132 = arith.constant 0 : index
    %c0_133 = arith.constant 0 : index
    %118 = vector.load %arg10[%c0_131, %c0_132, %c0_133] : memref<1x72x128xf32, #tpu.memory_space<vmem>>, vector<1x72x128xf32>
    %119 = vector.shape_cast %118 : vector<1x72x128xf32> to vector<72x128xf32>
    %120 = vector.shape_cast %117 : vector<72x128xf32> to vector<1x72x128xf32>
    tpu.vector_store %arg10[%c0_131, %c0_132, %c0_133], %120 {strides = array<i32>} : memref<1x72x128xf32, #tpu.memory_space<vmem>>, vector<1x72x128xf32>,
    return
  }
  func.func @transform_0(%arg0: i32) -> (i32, i32, i32) {
    %c0_i32 = arith.constant 0 : i32
    %c0_i32_0 = arith.constant 0 : i32
    %c0_i32_1 = arith.constant 0 : i32
    return %arg0, %c0_i32, %c0_i32_0 : i32, i32, i32
  }
  func.func @transform_1(%arg0: i32) -> (i32, i32) {
    %c0_i32 = arith.constant 0 : i32
    %c0_i32_0 = arith.constant 0 : i32
    %c0_i32_1 = arith.constant 0 : i32
    return %c0_i32, %c0_i32_0 : i32, i32
  }
  func.func @transform_2(%arg0: i32) -> (i32, i32) {
    %c0_i32 = arith.constant 0 : i32
    %c0_i32_0 = arith.constant 0 : i32
    %c0_i32_1 = arith.constant 0 : i32
    return %c0_i32, %c0_i32_0 : i32, i32
  }
  func.func @transform_3(%arg0: i32) -> (i32, i32) {
    %c0_i32 = arith.constant 0 : i32
    %c0_i32_0 = arith.constant 0 : i32
    %c0_i32_1 = arith.constant 0 : i32
    return %c0_i32, %c0_i32_0 : i32, i32
  }
  func.func @transform_4(%arg0: i32) -> (i32, i32, i32) {
    %c0_i32 = arith.constant 0 : i32
    %c0_i32_0 = arith.constant 0 : i32
    %c0_i32_1 = arith.constant 0 : i32
    %c0_i32_2 = arith.constant 0 : i32
    return %c0_i32, %c0_i32_0, %c0_i32_1 : i32, i32, i32
  }
  func.func @transform_5(%arg0: i32) -> (i32, i32) {
    %c0_i32 = arith.constant 0 : i32
    %c0_i32_0 = arith.constant 0 : i32
    %c0_i32_1 = arith.constant 0 : i32
    return %c0_i32, %c0_i32_0 : i32, i32
  }
  func.func @transform_6(%arg0: i32) -> (i32, i32) {
    %c0_i32 = arith.constant 0 : i32
    %c0_i32_0 = arith.constant 0 : i32
    %c0_i32_1 = arith.constant 0 : i32
    return %c0_i32, %c0_i32_0 : i32, i32
  }
  func.func @transform_7(%arg0: i32) -> (i32, i32) {
    %c0_i32 = arith.constant 0 : i32
    %c0_i32_0 = arith.constant 0 : i32
    %c0_i32_1 = arith.constant 0 : i32
    return %c0_i32, %c0_i32_0 : i32, i32
  }
  func.func @transform_8(%arg0: i32) -> (i32, i32) {
    %c0_i32 = arith.constant 0 : i32
    %c0_i32_0 = arith.constant 0 : i32
    %c0_i32_1 = arith.constant 0 : i32
    return %c0_i32, %c0_i32_0 : i32, i32
  }
  func.func @transform_9(%arg0: i32) -> (i32, i32, i32) {
    %c0_i32 = arith.constant 0 : i32
    %c0_i32_0 = arith.constant 0 : i32
    %c0_i32_1 = arith.constant 0 : i32
    return %arg0, %c0_i32, %c0_i32_0 : i32, i32, i32
  }
}

module attributes {stable_mosaic.version = 11 : i64} {
  func.func @kernel(%arg0: i32, %arg1: memref<1x32x256xbf16, #tpu.memory_space<vmem>>, %arg2: memref<1x128xf32, #tpu.memory_space<vmem>>, %arg3: memref<80x288xbf16, #tpu.memory_space<vmem>>, %arg4: memref<80x1xf32, #tpu.memory_space<vmem>>, %arg5: memref<4x16x144xbf16, #tpu.memory_space<vmem>>, %arg6: memref<16x144xbf16, #tpu.memory_space<vmem>>, %arg7: memref<80x1xf32, #tpu.memory_space<vmem>>, %arg8: memref<72x80xbf16, #tpu.memory_space<vmem>>, %arg9: memref<72x1xf32, #tpu.memory_space<vmem>>, %arg10: memref<1x72x128xf32, #tpu.memory_space<vmem>>, %arg11: memref<80x384xbf16, #tpu.memory_space<vmem>>) attributes {dimension_semantics = [#tpu.dimension_semantics<arbitrary>], iteration_bounds = array<i64: 2>, scalar_prefetch = 0 : i64, scratch_operands = 1 : i64, tpu.core_type = #tpu.core_type<tc>, window_params = [{transform_indices = @transform_0, window_bounds = array<i64: 1, 32, 256>}, {pipeline_mode = #tpu.pipeline_mode<synchronous>, transform_indices = @transform_1, window_bounds = array<i64: 1, 128>}, {pipeline_mode = #tpu.pipeline_mode<synchronous>, transform_indices = @transform_2, window_bounds = array<i64: 80, 288>}, {pipeline_mode = #tpu.pipeline_mode<synchronous>, transform_indices = @transform_3, window_bounds = array<i64: 80, 1>}, {pipeline_mode = #tpu.pipeline_mode<synchronous>, transform_indices = @transform_4, window_bounds = array<i64: 4, 16, 144>}, {pipeline_mode = #tpu.pipeline_mode<synchronous>, transform_indices = @transform_5, window_bounds = array<i64: 16, 144>}, {pipeline_mode = #tpu.pipeline_mode<synchronous>, transform_indices = @transform_6, window_bounds = array<i64: 80, 1>}, {pipeline_mode = #tpu.pipeline_mode<synchronous>, transform_indices = @transform_7, window_bounds = array<i64: 72, 80>}, {pipeline_mode = #tpu.pipeline_mode<synchronous>, transform_indices = @transform_8, window_bounds = array<i64: 72, 1>}, {transform_indices = @transform_9, window_bounds = array<i64: 1, 72, 128>}]} {
    %c0 = arith.constant 0 : index
    %c0_0 = arith.constant 0 : index
    %c0_1 = arith.constant 0 : index
    %0 = vector.load %arg1[%c0, %c0_0, %c0_1] : memref<1x32x256xbf16, #tpu.memory_space<vmem>>, vector<1x32x128xbf16>
    %1 = vector.shape_cast %0 : vector<1x32x128xbf16> to vector<32x128xbf16>
    %c0_2 = arith.constant 0 : index
    %c0_3 = arith.constant 0 : index
    %c1 = arith.constant 1 : index
    %2 = vector.load %arg1[%c0_2, %c0_3, %c1] : memref<1x32x256xbf16, #tpu.memory_space<vmem>>, vector<1x32x128xbf16>
    %3 = vector.shape_cast %2 : vector<1x32x128xbf16> to vector<32x128xbf16>
    %c0_4 = arith.constant 0 : index
    %c0_5 = arith.constant 0 : index
    %c2 = arith.constant 2 : index
    %4 = vector.load %arg1[%c0_4, %c0_5, %c2] : memref<1x32x256xbf16, #tpu.memory_space<vmem>>, vector<1x32x128xbf16>
    %5 = vector.shape_cast %4 : vector<1x32x128xbf16> to vector<32x128xbf16>
    %c0_6 = arith.constant 0 : index
    %c0_7 = arith.constant 0 : index
    %c6 = arith.constant 6 : index
    %6 = vector.load %arg1[%c0_6, %c0_7, %c6] : memref<1x32x256xbf16, #tpu.memory_space<vmem>>, vector<1x32x128xbf16>
    %7 = vector.shape_cast %6 : vector<1x32x128xbf16> to vector<32x128xbf16>
    %c0_8 = arith.constant 0 : index
    %c0_9 = arith.constant 0 : index
    %c7 = arith.constant 7 : index
    %8 = vector.load %arg1[%c0_8, %c0_9, %c7] : memref<1x32x256xbf16, #tpu.memory_space<vmem>>, vector<1x32x128xbf16>
    %9 = vector.shape_cast %8 : vector<1x32x128xbf16> to vector<32x128xbf16>
    %c0_10 = arith.constant 0 : index
    %c0_11 = arith.constant 0 : index
    %c8 = arith.constant 8 : index
    %10 = vector.load %arg1[%c0_10, %c0_11, %c8] : memref<1x32x256xbf16, #tpu.memory_space<vmem>>, vector<1x32x128xbf16>
    %11 = vector.shape_cast %10 : vector<1x32x128xbf16> to vector<32x128xbf16>
    %c0_12 = arith.constant 0 : index
    %c0_13 = arith.constant 0 : index
    %c12 = arith.constant 12 : index
    %12 = vector.load %arg1[%c0_12, %c0_13, %c12] : memref<1x32x256xbf16, #tpu.memory_space<vmem>>, vector<1x32x128xbf16>
    %13 = vector.shape_cast %12 : vector<1x32x128xbf16> to vector<32x128xbf16>
    %c0_14 = arith.constant 0 : index
    %c0_15 = arith.constant 0 : index
    %c13 = arith.constant 13 : index
    %14 = vector.load %arg1[%c0_14, %c0_15, %c13] : memref<1x32x256xbf16, #tpu.memory_space<vmem>>, vector<1x32x128xbf16>
    %15 = vector.shape_cast %14 : vector<1x32x128xbf16> to vector<32x128xbf16>
    %c0_16 = arith.constant 0 : index
    %c0_17 = arith.constant 0 : index
    %c14 = arith.constant 14 : index
    %16 = vector.load %arg1[%c0_16, %c0_17, %c14] : memref<1x32x256xbf16, #tpu.memory_space<vmem>>, vector<1x32x128xbf16>
    %17 = vector.shape_cast %16 : vector<1x32x128xbf16> to vector<32x128xbf16>
    %18 = tpu.concatenate %1, %3, %5, %7, %9, %11, %13, %15, %17 in 0 : vector<32x128xbf16>, vector<32x128xbf16>, vector<32x128xbf16>, vector<32x128xbf16>, vector<32x128xbf16>, vector<32x128xbf16>, vector<32x128xbf16>, vector<32x128xbf16>, vector<32x128xbf16> -> vector<288x128xbf16>
    %c0_18 = arith.constant 0 : index
    %c0_19 = arith.constant 0 : index
    %19 = vector.load %arg3[%c0_18, %c0_19] : memref<80x288xbf16, #tpu.memory_space<vmem>>, vector<80x288xbf16>
    %cst = arith.constant dense<0.000000e+00> : vector<80x128xf32>
    %20 = tpu.matmul %19, %18, %cst {dimension_numbers = #tpu.dot_dimension_numbers<[1], [0], [0], [1], [0, 0, 1, 1], [], []>} : vector<80x288xbf16>, vector<288x128xbf16>, vector<80x128xf32> -> vector<80x128xf32>
    %c0_20 = arith.constant 0 : index
    %c0_21 = arith.constant 0 : index
    %21 = vector.load %arg4[%c0_20, %c0_21] : memref<80x1xf32, #tpu.memory_space<vmem>>, vector<80x1xf32>
    %22 = vector.broadcast %21 : vector<80x1xf32> to vector<80x128xf32>
    %23 = arith.addf %20, %22 : vector<80x128xf32>
    %24 = arith.negf %23 : vector<80x128xf32>
    %25 = math.exp %24 : vector<80x128xf32>
    %cst_22 = arith.constant 1.000000e+00 : f32
    %26 = vector.broadcast %cst_22 : f32 to vector<80x128xf32>
    %27 = arith.addf %26, %25 : vector<80x128xf32>
    %28 = arith.divf %26, %27 : vector<80x128xf32>
    %29 = arith.mulf %23, %28 : vector<80x128xf32>
    %c0_23 = arith.constant 0 : index
    %c0_24 = arith.constant 0 : index
    %30 = vector.load %arg2[%c0_23, %c0_24] : memref<1x128xf32, #tpu.memory_space<vmem>>, vector<1x128xf32>
    %31 = vector.broadcast %30 : vector<1x128xf32> to vector<80x128xf32>
    %32 = arith.mulf %29, %31 : vector<80x128xf32>
    %c0_i32 = arith.constant 0 : i32
    %33 = arith.cmpi eq, %arg0, %c0_i32 : i32
    %34 = arith.extui %33 : i1 to i32
    %c0_i32_25 = arith.constant 0 : i32
    %35 = arith.cmpi ne, %34, %c0_i32_25 : i32
    scf.if %35 {
      %cst_134 = arith.constant 0.000000e+00 : bf16
      %121 = vector.broadcast %cst_134 : bf16 to vector<80x384xbf16>
      %c0_135 = arith.constant 0 : index
      %c0_136 = arith.constant 0 : index
      %122 = vector.load %arg11[%c0_135, %c0_136] : memref<80x384xbf16, #tpu.memory_space<vmem>>, vector<80x384xbf16>
      tpu.vector_store %arg11[%c0_135, %c0_136], %121 {strides = array<i32>} : memref<80x384xbf16, #tpu.memory_space<vmem>>, vector<80x384xbf16>,
    } else {
    }
    %36 = arith.truncf %32 : vector<80x128xf32> to vector<80x128xbf16>
    %c0_26 = arith.constant 0 : index
    %c128 = arith.constant 128 : index
    %37 = vector.load %arg11[%c0_26, %c128] : memref<80x384xbf16, #tpu.memory_space<vmem>>, vector<80x128xbf16>
    tpu.vector_store %arg11[%c0_26, %c128], %36 {strides = array<i32>} : memref<80x384xbf16, #tpu.memory_space<vmem>>, vector<80x128xbf16>,
    %c0_27 = arith.constant 0 : index
    %c121 = arith.constant 121 : index
    %38 = vector.load %arg11[%c0_27, %c121] : memref<80x384xbf16, #tpu.memory_space<vmem>>, vector<16x128xbf16>
    %c0_28 = arith.constant 0 : index
    %c122 = arith.constant 122 : index
    %39 = vector.load %arg11[%c0_28, %c122] : memref<80x384xbf16, #tpu.memory_space<vmem>>, vector<16x128xbf16>
    %c0_29 = arith.constant 0 : index
    %c123 = arith.constant 123 : index
    %40 = vector.load %arg11[%c0_29, %c123] : memref<80x384xbf16, #tpu.memory_space<vmem>>, vector<16x128xbf16>
    %c0_30 = arith.constant 0 : index
    %c127 = arith.constant 127 : index
    %41 = vector.load %arg11[%c0_30, %c127] : memref<80x384xbf16, #tpu.memory_space<vmem>>, vector<16x128xbf16>
    %c0_31 = arith.constant 0 : index
    %c128_32 = arith.constant 128 : index
    %42 = vector.load %arg11[%c0_31, %c128_32] : memref<80x384xbf16, #tpu.memory_space<vmem>>, vector<16x128xbf16>
    %c0_33 = arith.constant 0 : index
    %c129 = arith.constant 129 : index
    %43 = vector.load %arg11[%c0_33, %c129] : memref<80x384xbf16, #tpu.memory_space<vmem>>, vector<16x128xbf16>
    %c0_34 = arith.constant 0 : index
    %c133 = arith.constant 133 : index
    %44 = vector.load %arg11[%c0_34, %c133] : memref<80x384xbf16, #tpu.memory_space<vmem>>, vector<16x128xbf16>
    %c0_35 = arith.constant 0 : index
    %c134 = arith.constant 134 : index
    %45 = vector.load %arg11[%c0_35, %c134] : memref<80x384xbf16, #tpu.memory_space<vmem>>, vector<16x128xbf16>
    %c0_36 = arith.constant 0 : index
    %c135 = arith.constant 135 : index
    %46 = vector.load %arg11[%c0_36, %c135] : memref<80x384xbf16, #tpu.memory_space<vmem>>, vector<16x128xbf16>
    %47 = tpu.concatenate %38, %39, %40, %41, %42, %43, %44, %45, %46 in 0 : vector<16x128xbf16>, vector<16x128xbf16>, vector<16x128xbf16>, vector<16x128xbf16>, vector<16x128xbf16>, vector<16x128xbf16>, vector<16x128xbf16>, vector<16x128xbf16>, vector<16x128xbf16> -> vector<144x128xbf16>
    %c0_37 = arith.constant 0 : index
    %c0_38 = arith.constant 0 : index
    %c0_39 = arith.constant 0 : index
    %48 = vector.load %arg5[%c0_37, %c0_38, %c0_39] : memref<4x16x144xbf16, #tpu.memory_space<vmem>>, vector<1x16x144xbf16>
    %49 = vector.shape_cast %48 : vector<1x16x144xbf16> to vector<16x144xbf16>
    %cst_40 = arith.constant dense<0.000000e+00> : vector<16x128xf32>
    %50 = tpu.matmul %49, %47, %cst_40 {dimension_numbers = #tpu.dot_dimension_numbers<[1], [0], [0], [1], [0, 0, 1, 1], [], []>} : vector<16x144xbf16>, vector<144x128xbf16>, vector<16x128xf32> -> vector<16x128xf32>
    %c16 = arith.constant 16 : index
    %c121_41 = arith.constant 121 : index
    %51 = vector.load %arg11[%c16, %c121_41] : memref<80x384xbf16, #tpu.memory_space<vmem>>, vector<16x128xbf16>
    %c16_42 = arith.constant 16 : index
    %c122_43 = arith.constant 122 : index
    %52 = vector.load %arg11[%c16_42, %c122_43] : memref<80x384xbf16, #tpu.memory_space<vmem>>, vector<16x128xbf16>
    %c16_44 = arith.constant 16 : index
    %c123_45 = arith.constant 123 : index
    %53 = vector.load %arg11[%c16_44, %c123_45] : memref<80x384xbf16, #tpu.memory_space<vmem>>, vector<16x128xbf16>
    %c16_46 = arith.constant 16 : index
    %c127_47 = arith.constant 127 : index
    %54 = vector.load %arg11[%c16_46, %c127_47] : memref<80x384xbf16, #tpu.memory_space<vmem>>, vector<16x128xbf16>
    %c16_48 = arith.constant 16 : index
    %c128_49 = arith.constant 128 : index
    %55 = vector.load %arg11[%c16_48, %c128_49] : memref<80x384xbf16, #tpu.memory_space<vmem>>, vector<16x128xbf16>
    %c16_50 = arith.constant 16 : index
    %c129_51 = arith.constant 129 : index
    %56 = vector.load %arg11[%c16_50, %c129_51] : memref<80x384xbf16, #tpu.memory_space<vmem>>, vector<16x128xbf16>
    %c16_52 = arith.constant 16 : index
    %c133_53 = arith.constant 133 : index
    %57 = vector.load %arg11[%c16_52, %c133_53] : memref<80x384xbf16, #tpu.memory_space<vmem>>, vector<16x128xbf16>
    %c16_54 = arith.constant 16 : index
    %c134_55 = arith.constant 134 : index
    %58 = vector.load %arg11[%c16_54, %c134_55] : memref<80x384xbf16, #tpu.memory_space<vmem>>, vector<16x128xbf16>
    %c16_56 = arith.constant 16 : index
    %c135_57 = arith.constant 135 : index
    %59 = vector.load %arg11[%c16_56, %c135_57] : memref<80x384xbf16, #tpu.memory_space<vmem>>, vector<16x128xbf16>
    %60 = tpu.concatenate %51, %52, %53, %54, %55, %56, %57, %58, %59 in 0 : vector<16x128xbf16>, vector<16x128xbf16>, vector<16x128xbf16>, vector<16x128xbf16>, vector<16x128xbf16>, vector<16x128xbf16>, vector<16x128xbf16>, vector<16x128xbf16>, vector<16x128xbf16> -> vector<144x128xbf16>
    %c1_58 = arith.constant 1 : index
    %c0_59 = arith.constant 0 : index
    %c0_60 = arith.constant 0 : index
    %61 = vector.load %arg5[%c1_58, %c0_59, %c0_60] : memref<4x16x144xbf16, #tpu.memory_space<vmem>>, vector<1x16x144xbf16>
    %62 = vector.shape_cast %61 : vector<1x16x144xbf16> to vector<16x144xbf16>
    %cst_61 = arith.constant dense<0.000000e+00> : vector<16x128xf32>
    %63 = tpu.matmul %62, %60, %cst_61 {dimension_numbers = #tpu.dot_dimension_numbers<[1], [0], [0], [1], [0, 0, 1, 1], [], []>} : vector<16x144xbf16>, vector<144x128xbf16>, vector<16x128xf32> -> vector<16x128xf32>
    %c32 = arith.constant 32 : index
    %c121_62 = arith.constant 121 : index
    %64 = vector.load %arg11[%c32, %c121_62] : memref<80x384xbf16, #tpu.memory_space<vmem>>, vector<16x128xbf16>
    %c32_63 = arith.constant 32 : index
    %c122_64 = arith.constant 122 : index
    %65 = vector.load %arg11[%c32_63, %c122_64] : memref<80x384xbf16, #tpu.memory_space<vmem>>, vector<16x128xbf16>
    %c32_65 = arith.constant 32 : index
    %c123_66 = arith.constant 123 : index
    %66 = vector.load %arg11[%c32_65, %c123_66] : memref<80x384xbf16, #tpu.memory_space<vmem>>, vector<16x128xbf16>
    %c32_67 = arith.constant 32 : index
    %c127_68 = arith.constant 127 : index
    %67 = vector.load %arg11[%c32_67, %c127_68] : memref<80x384xbf16, #tpu.memory_space<vmem>>, vector<16x128xbf16>
    %c32_69 = arith.constant 32 : index
    %c128_70 = arith.constant 128 : index
    %68 = vector.load %arg11[%c32_69, %c128_70] : memref<80x384xbf16, #tpu.memory_space<vmem>>, vector<16x128xbf16>
    %c32_71 = arith.constant 32 : index
    %c129_72 = arith.constant 129 : index
    %69 = vector.load %arg11[%c32_71, %c129_72] : memref<80x384xbf16, #tpu.memory_space<vmem>>, vector<16x128xbf16>
    %c32_73 = arith.constant 32 : index
    %c133_74 = arith.constant 133 : index
    %70 = vector.load %arg11[%c32_73, %c133_74] : memref<80x384xbf16, #tpu.memory_space<vmem>>, vector<16x128xbf16>
    %c32_75 = arith.constant 32 : index
    %c134_76 = arith.constant 134 : index
    %71 = vector.load %arg11[%c32_75, %c134_76] : memref<80x384xbf16, #tpu.memory_space<vmem>>, vector<16x128xbf16>
    %c32_77 = arith.constant 32 : index
    %c135_78 = arith.constant 135 : index
    %72 = vector.load %arg11[%c32_77, %c135_78] : memref<80x384xbf16, #tpu.memory_space<vmem>>, vector<16x128xbf16>
    %73 = tpu.concatenate %64, %65, %66, %67, %68, %69, %70, %71, %72 in 0 : vector<16x128xbf16>, vector<16x128xbf16>, vector<16x128xbf16>, vector<16x128xbf16>, vector<16x128xbf16>, vector<16x128xbf16>, vector<16x128xbf16>, vector<16x128xbf16>, vector<16x128xbf16> -> vector<144x128xbf16>
    %c2_79 = arith.constant 2 : index
    %c0_80 = arith.constant 0 : index
    %c0_81 = arith.constant 0 : index
    %74 = vector.load %arg5[%c2_79, %c0_80, %c0_81] : memref<4x16x144xbf16, #tpu.memory_space<vmem>>, vector<1x16x144xbf16>
    %75 = vector.shape_cast %74 : vector<1x16x144xbf16> to vector<16x144xbf16>
    %cst_82 = arith.constant dense<0.000000e+00> : vector<16x128xf32>
    %76 = tpu.matmul %75, %73, %cst_82 {dimension_numbers = #tpu.dot_dimension_numbers<[1], [0], [0], [1], [0, 0, 1, 1], [], []>} : vector<16x144xbf16>, vector<144x128xbf16>, vector<16x128xf32> -> vector<16x128xf32>
    %c48 = arith.constant 48 : index
    %c121_83 = arith.constant 121 : index
    %77 = vector.load %arg11[%c48, %c121_83] : memref<80x384xbf16, #tpu.memory_space<vmem>>, vector<16x128xbf16>
    %c48_84 = arith.constant 48 : index
    %c122_85 = arith.constant 122 : index
    %78 = vector.load %arg11[%c48_84, %c122_85] : memref<80x384xbf16, #tpu.memory_space<vmem>>, vector<16x128xbf16>
    %c48_86 = arith.constant 48 : index
    %c123_87 = arith.constant 123 : index
    %79 = vector.load %arg11[%c48_86, %c123_87] : memref<80x384xbf16, #tpu.memory_space<vmem>>, vector<16x128xbf16>
    %c48_88 = arith.constant 48 : index
    %c127_89 = arith.constant 127 : index
    %80 = vector.load %arg11[%c48_88, %c127_89] : memref<80x384xbf16, #tpu.memory_space<vmem>>, vector<16x128xbf16>
    %c48_90 = arith.constant 48 : index
    %c128_91 = arith.constant 128 : index
    %81 = vector.load %arg11[%c48_90, %c128_91] : memref<80x384xbf16, #tpu.memory_space<vmem>>, vector<16x128xbf16>
    %c48_92 = arith.constant 48 : index
    %c129_93 = arith.constant 129 : index
    %82 = vector.load %arg11[%c48_92, %c129_93] : memref<80x384xbf16, #tpu.memory_space<vmem>>, vector<16x128xbf16>
    %c48_94 = arith.constant 48 : index
    %c133_95 = arith.constant 133 : index
    %83 = vector.load %arg11[%c48_94, %c133_95] : memref<80x384xbf16, #tpu.memory_space<vmem>>, vector<16x128xbf16>
    %c48_96 = arith.constant 48 : index
    %c134_97 = arith.constant 134 : index
    %84 = vector.load %arg11[%c48_96, %c134_97] : memref<80x384xbf16, #tpu.memory_space<vmem>>, vector<16x128xbf16>
    %c48_98 = arith.constant 48 : index
    %c135_99 = arith.constant 135 : index
    %85 = vector.load %arg11[%c48_98, %c135_99] : memref<80x384xbf16, #tpu.memory_space<vmem>>, vector<16x128xbf16>
    %86 = tpu.concatenate %77, %78, %79, %80, %81, %82, %83, %84, %85 in 0 : vector<16x128xbf16>, vector<16x128xbf16>, vector<16x128xbf16>, vector<16x128xbf16>, vector<16x128xbf16>, vector<16x128xbf16>, vector<16x128xbf16>, vector<16x128xbf16>, vector<16x128xbf16> -> vector<144x128xbf16>
    %c3 = arith.constant 3 : index
    %c0_100 = arith.constant 0 : index
    %c0_101 = arith.constant 0 : index
    %87 = vector.load %arg5[%c3, %c0_100, %c0_101] : memref<4x16x144xbf16, #tpu.memory_space<vmem>>, vector<1x16x144xbf16>
    %88 = vector.shape_cast %87 : vector<1x16x144xbf16> to vector<16x144xbf16>
    %cst_102 = arith.constant dense<0.000000e+00> : vector<16x128xf32>
    %89 = tpu.matmul %88, %86, %cst_102 {dimension_numbers = #tpu.dot_dimension_numbers<[1], [0], [0], [1], [0, 0, 1, 1], [], []>} : vector<16x144xbf16>, vector<144x128xbf16>, vector<16x128xf32> -> vector<16x128xf32>
    %c64 = arith.constant 64 : index
    %c121_103 = arith.constant 121 : index
    %90 = vector.load %arg11[%c64, %c121_103] : memref<80x384xbf16, #tpu.memory_space<vmem>>, vector<16x128xbf16>
    %c64_104 = arith.constant 64 : index
    %c122_105 = arith.constant 122 : index
    %91 = vector.load %arg11[%c64_104, %c122_105] : memref<80x384xbf16, #tpu.memory_space<vmem>>, vector<16x128xbf16>
    %c64_106 = arith.constant 64 : index
    %c123_107 = arith.constant 123 : index
    %92 = vector.load %arg11[%c64_106, %c123_107] : memref<80x384xbf16, #tpu.memory_space<vmem>>, vector<16x128xbf16>
    %c64_108 = arith.constant 64 : index
    %c127_109 = arith.constant 127 : index
    %93 = vector.load %arg11[%c64_108, %c127_109] : memref<80x384xbf16, #tpu.memory_space<vmem>>, vector<16x128xbf16>
    %c64_110 = arith.constant 64 : index
    %c128_111 = arith.constant 128 : index
    %94 = vector.load %arg11[%c64_110, %c128_111] : memref<80x384xbf16, #tpu.memory_space<vmem>>, vector<16x128xbf16>
    %c64_112 = arith.constant 64 : index
    %c129_113 = arith.constant 129 : index
    %95 = vector.load %arg11[%c64_112, %c129_113] : memref<80x384xbf16, #tpu.memory_space<vmem>>, vector<16x128xbf16>
    %c64_114 = arith.constant 64 : index
    %c133_115 = arith.constant 133 : index
    %96 = vector.load %arg11[%c64_114, %c133_115] : memref<80x384xbf16, #tpu.memory_space<vmem>>, vector<16x128xbf16>
    %c64_116 = arith.constant 64 : index
    %c134_117 = arith.constant 134 : index
    %97 = vector.load %arg11[%c64_116, %c134_117] : memref<80x384xbf16, #tpu.memory_space<vmem>>, vector<16x128xbf16>
    %c64_118 = arith.constant 64 : index
    %c135_119 = arith.constant 135 : index
    %98 = vector.load %arg11[%c64_118, %c135_119] : memref<80x384xbf16, #tpu.memory_space<vmem>>, vector<16x128xbf16>
    %99 = tpu.concatenate %90, %91, %92, %93, %94, %95, %96, %97, %98 in 0 : vector<16x128xbf16>, vector<16x128xbf16>, vector<16x128xbf16>, vector<16x128xbf16>, vector<16x128xbf16>, vector<16x128xbf16>, vector<16x128xbf16>, vector<16x128xbf16>, vector<16x128xbf16> -> vector<144x128xbf16>
    %c0_120 = arith.constant 0 : index
    %c0_121 = arith.constant 0 : index
    %100 = vector.load %arg6[%c0_120, %c0_121] : memref<16x144xbf16, #tpu.memory_space<vmem>>, vector<16x144xbf16>
    %cst_122 = arith.constant dense<0.000000e+00> : vector<16x128xf32>
    %101 = tpu.matmul %100, %99, %cst_122 {dimension_numbers = #tpu.dot_dimension_numbers<[1], [0], [0], [1], [0, 0, 1, 1], [], []>} : vector<16x144xbf16>, vector<144x128xbf16>, vector<16x128xf32> -> vector<16x128xf32>
    %102 = tpu.concatenate %50, %63, %76, %89, %101 in 0 : vector<16x128xf32>, vector<16x128xf32>, vector<16x128xf32>, vector<16x128xf32>, vector<16x128xf32> -> vector<80x128xf32>
    %c0_123 = arith.constant 0 : index
    %c0_124 = arith.constant 0 : index
    %103 = vector.load %arg7[%c0_123, %c0_124] : memref<80x1xf32, #tpu.memory_space<vmem>>, vector<80x1xf32>
    %104 = vector.broadcast %103 : vector<80x1xf32> to vector<80x128xf32>
    %105 = arith.addf %102, %104 : vector<80x128xf32>
    %106 = arith.negf %105 : vector<80x128xf32>
    %107 = math.exp %106 : vector<80x128xf32>
    %cst_125 = arith.constant 1.000000e+00 : f32
    %108 = vector.broadcast %cst_125 : f32 to vector<80x128xf32>
    %109 = arith.addf %108, %107 : vector<80x128xf32>
    %110 = arith.divf %108, %109 : vector<80x128xf32>
    %111 = arith.mulf %105, %110 : vector<80x128xf32>
    %c0_126 = arith.constant 0 : index
    %c0_127 = arith.constant 0 : index
    %112 = vector.load %arg8[%c0_126, %c0_127] : memref<72x80xbf16, #tpu.memory_space<vmem>>, vector<72x80xbf16>
    %113 = arith.truncf %111 : vector<80x128xf32> to vector<80x128xbf16>
    %cst_128 = arith.constant dense<0.000000e+00> : vector<72x128xf32>
    %114 = tpu.matmul %112, %113, %cst_128 {dimension_numbers = #tpu.dot_dimension_numbers<[1], [0], [0], [1], [0, 0, 1, 1], [], []>} : vector<72x80xbf16>, vector<80x128xbf16>, vector<72x128xf32> -> vector<72x128xf32>
    %c0_129 = arith.constant 0 : index
    %c0_130 = arith.constant 0 : index
    %115 = vector.load %arg9[%c0_129, %c0_130] : memref<72x1xf32, #tpu.memory_space<vmem>>, vector<72x1xf32>
    %116 = vector.broadcast %115 : vector<72x1xf32> to vector<72x128xf32>
    %117 = arith.addf %114, %116 : vector<72x128xf32>
    %c0_131 = arith.constant 0 : index
    %c0_132 = arith.constant 0 : index
    %c0_133 = arith.constant 0 : index
    %118 = vector.load %arg10[%c0_131, %c0_132, %c0_133] : memref<1x72x128xf32, #tpu.memory_space<vmem>>, vector<1x72x128xf32>
    %119 = vector.shape_cast %118 : vector<1x72x128xf32> to vector<72x128xf32>
    %120 = vector.shape_cast %117 : vector<72x128xf32> to vector<1x72x128xf32>
    tpu.vector_store %arg10[%c0_131, %c0_132, %c0_133], %120 {strides = array<i32>} : memref<1x72x128xf32, #tpu.memory_space<vmem>>, vector<1x72x128xf32>,
    return
  }
  func.func @transform_0(%arg0: i32) -> (i32, i32, i32) {
    %c0_i32 = arith.constant 0 : i32
    %c0_i32_0 = arith.constant 0 : i32
    %c0_i32_1 = arith.constant 0 : i32
    return %arg0, %c0_i32, %c0_i32_0 : i32, i32, i32
  }
  func.func @transform_1(%arg0: i32) -> (i32, i32) {
    %c0_i32 = arith.constant 0 : i32
    %c0_i32_0 = arith.constant 0 : i32
    %c0_i32_1 = arith.constant 0 : i32
    return %c0_i32, %c0_i32_0 : i32, i32
  }
  func.func @transform_2(%arg0: i32) -> (i32, i32) {
    %c0_i32 = arith.constant 0 : i32
    %c0_i32_0 = arith.constant 0 : i32
    %c0_i32_1 = arith.constant 0 : i32
    return %c0_i32, %c0_i32_0 : i32, i32
  }
  func.func @transform_3(%arg0: i32) -> (i32, i32) {
    %c0_i32 = arith.constant 0 : i32
    %c0_i32_0 = arith.constant 0 : i32
    %c0_i32_1 = arith.constant 0 : i32
    return %c0_i32, %c0_i32_0 : i32, i32
  }
  func.func @transform_4(%arg0: i32) -> (i32, i32, i32) {
    %c0_i32 = arith.constant 0 : i32
    %c0_i32_0 = arith.constant 0 : i32
    %c0_i32_1 = arith.constant 0 : i32
    %c0_i32_2 = arith.constant 0 : i32
    return %c0_i32, %c0_i32_0, %c0_i32_1 : i32, i32, i32
  }
  func.func @transform_5(%arg0: i32) -> (i32, i32) {
    %c0_i32 = arith.constant 0 : i32
    %c0_i32_0 = arith.constant 0 : i32
    %c0_i32_1 = arith.constant 0 : i32
    return %c0_i32, %c0_i32_0 : i32, i32
  }
  func.func @transform_6(%arg0: i32) -> (i32, i32) {
    %c0_i32 = arith.constant 0 : i32
    %c0_i32_0 = arith.constant 0 : i32
    %c0_i32_1 = arith.constant 0 : i32
    return %c0_i32, %c0_i32_0 : i32, i32
  }
  func.func @transform_7(%arg0: i32) -> (i32, i32) {
    %c0_i32 = arith.constant 0 : i32
    %c0_i32_0 = arith.constant 0 : i32
    %c0_i32_1 = arith.constant 0 : i32
    return %c0_i32, %c0_i32_0 : i32, i32
  }
  func.func @transform_8(%arg0: i32) -> (i32, i32) {
    %c0_i32 = arith.constant 0 : i32
    %c0_i32_0 = arith.constant 0 : i32
    %c0_i32_1 = arith.constant 0 : i32
    return %c0_i32, %c0_i32_0 : i32, i32
  }
  func.func @transform_9(%arg0: i32) -> (i32, i32, i32) {
    %c0_i32 = arith.constant 0 : i32
    %c0_i32_0 = arith.constant 0 : i32
    %c0_i32_1 = arith.constant 0 : i32
    return %arg0, %c0_i32, %c0_i32_0 : i32, i32, i32
  }
}

module attributes {stable_mosaic.version = 11 : i64} {
  func.func @kernel(%arg0: i32, %arg1: i32, %arg2: memref<1x72x128xf32, #tpu.memory_space<vmem>>, %arg3: memref<2x128xf32, #tpu.memory_space<vmem>>, %arg4: memref<1x128xf32, #tpu.memory_space<vmem>>, %arg5: memref<1x12x128xf32, #tpu.memory_space<vmem>>) attributes {dimension_semantics = [#tpu.dimension_semantics<parallel>, #tpu.dimension_semantics<parallel>], iteration_bounds = array<i64: 2, 1>, scalar_prefetch = 0 : i64, scratch_operands = 0 : i64, tpu.core_type = #tpu.core_type<tc>, window_params = [{transform_indices = @transform_0, window_bounds = array<i64: 1, 72, 128>}, {transform_indices = @transform_1, window_bounds = array<i64: 2, 128>}, {transform_indices = @transform_2, window_bounds = array<i64: 1, 128>}, {transform_indices = @transform_3, window_bounds = array<i64: 1, 12, 128>}]} {
    %c0 = arith.constant 0 : index
    %c0_0 = arith.constant 0 : index
    %c0_1 = arith.constant 0 : index
    %0 = vector.load %arg2[%c0, %c0_0, %c0_1] : memref<1x72x128xf32, #tpu.memory_space<vmem>>, vector<1x72x128xf32>
    %1 = tpu.iota {dimensions = array<i32: 1>} : vector<1x16x1xi32>
    %2 = arith.sitofp %1 : vector<1x16x1xi32> to vector<1x16x1xf32>
    %3 = vector.extract_strided_slice %0 {offsets = [0, 0, 0], sizes = [1, 16, 128], strides = [1, 1, 1]} : vector<1x72x128xf32> to vector<1x16x128xf32>
    %cst = arith.constant dense<0xFF800000> : vector<1x128xf32>
    %4 = vector.multi_reduction <maximumf>, %3, %cst [1] : vector<1x16x128xf32> to vector<1x128xf32>
    %5 = vector.shape_cast %4 : vector<1x128xf32> to vector<1x1x128xf32>
    %6 = vector.broadcast %5 : vector<1x1x128xf32> to vector<1x16x128xf32>
    %7 = arith.subf %3, %6 : vector<1x16x128xf32>
    %8 = math.exp %7 : vector<1x16x128xf32>
    %cst_2 = arith.constant dense<0.000000e+00> : vector<1x128xf32>
    %9 = vector.multi_reduction <add>, %8, %cst_2 [1] : vector<1x16x128xf32> to vector<1x128xf32>
    %10 = vector.shape_cast %9 : vector<1x128xf32> to vector<1x1x128xf32>
    %11 = vector.broadcast %2 : vector<1x16x1xf32> to vector<1x16x128xf32>
    %12 = arith.mulf %8, %11 : vector<1x16x128xf32>
    %cst_3 = arith.constant dense<0.000000e+00> : vector<1x128xf32>
    %13 = vector.multi_reduction <add>, %12, %cst_3 [1] : vector<1x16x128xf32> to vector<1x128xf32>
    %14 = vector.shape_cast %13 : vector<1x128xf32> to vector<1x1x128xf32>
    %15 = tpu.reciprocal %10 {approx = true} : vector<1x1x128xf32> -> vector<1x1x128xf32>
    %16 = arith.mulf %14, %15 : vector<1x1x128xf32>
    %17 = vector.extract_strided_slice %0 {offsets = [0, 16, 0], sizes = [1, 16, 128], strides = [1, 1, 1]} : vector<1x72x128xf32> to vector<1x16x128xf32>
    %cst_4 = arith.constant dense<0xFF800000> : vector<1x128xf32>
    %18 = vector.multi_reduction <maximumf>, %17, %cst_4 [1] : vector<1x16x128xf32> to vector<1x128xf32>
    %19 = vector.shape_cast %18 : vector<1x128xf32> to vector<1x1x128xf32>
    %20 = vector.broadcast %19 : vector<1x1x128xf32> to vector<1x16x128xf32>
    %21 = arith.subf %17, %20 : vector<1x16x128xf32>
    %22 = math.exp %21 : vector<1x16x128xf32>
    %cst_5 = arith.constant dense<0.000000e+00> : vector<1x128xf32>
    %23 = vector.multi_reduction <add>, %22, %cst_5 [1] : vector<1x16x128xf32> to vector<1x128xf32>
    %24 = vector.shape_cast %23 : vector<1x128xf32> to vector<1x1x128xf32>
    %25 = vector.broadcast %2 : vector<1x16x1xf32> to vector<1x16x128xf32>
    %26 = arith.mulf %22, %25 : vector<1x16x128xf32>
    %cst_6 = arith.constant dense<0.000000e+00> : vector<1x128xf32>
    %27 = vector.multi_reduction <add>, %26, %cst_6 [1] : vector<1x16x128xf32> to vector<1x128xf32>
    %28 = vector.shape_cast %27 : vector<1x128xf32> to vector<1x1x128xf32>
    %29 = tpu.reciprocal %24 {approx = true} : vector<1x1x128xf32> -> vector<1x1x128xf32>
    %30 = arith.mulf %28, %29 : vector<1x1x128xf32>
    %31 = vector.extract_strided_slice %0 {offsets = [0, 32, 0], sizes = [1, 16, 128], strides = [1, 1, 1]} : vector<1x72x128xf32> to vector<1x16x128xf32>
    %cst_7 = arith.constant dense<0xFF800000> : vector<1x128xf32>
    %32 = vector.multi_reduction <maximumf>, %31, %cst_7 [1] : vector<1x16x128xf32> to vector<1x128xf32>
    %33 = vector.shape_cast %32 : vector<1x128xf32> to vector<1x1x128xf32>
    %34 = vector.broadcast %33 : vector<1x1x128xf32> to vector<1x16x128xf32>
    %35 = arith.subf %31, %34 : vector<1x16x128xf32>
    %36 = math.exp %35 : vector<1x16x128xf32>
    %cst_8 = arith.constant dense<0.000000e+00> : vector<1x128xf32>
    %37 = vector.multi_reduction <add>, %36, %cst_8 [1] : vector<1x16x128xf32> to vector<1x128xf32>
    %38 = vector.shape_cast %37 : vector<1x128xf32> to vector<1x1x128xf32>
    %39 = vector.broadcast %2 : vector<1x16x1xf32> to vector<1x16x128xf32>
    %40 = arith.mulf %36, %39 : vector<1x16x128xf32>
    %cst_9 = arith.constant dense<0.000000e+00> : vector<1x128xf32>
    %41 = vector.multi_reduction <add>, %40, %cst_9 [1] : vector<1x16x128xf32> to vector<1x128xf32>
    %42 = vector.shape_cast %41 : vector<1x128xf32> to vector<1x1x128xf32>
    %43 = tpu.reciprocal %38 {approx = true} : vector<1x1x128xf32> -> vector<1x1x128xf32>
    %44 = arith.mulf %42, %43 : vector<1x1x128xf32>
    %45 = vector.extract_strided_slice %0 {offsets = [0, 48, 0], sizes = [1, 16, 128], strides = [1, 1, 1]} : vector<1x72x128xf32> to vector<1x16x128xf32>
    %cst_10 = arith.constant dense<0xFF800000> : vector<1x128xf32>
    %46 = vector.multi_reduction <maximumf>, %45, %cst_10 [1] : vector<1x16x128xf32> to vector<1x128xf32>
    %47 = vector.shape_cast %46 : vector<1x128xf32> to vector<1x1x128xf32>
    %48 = vector.broadcast %47 : vector<1x1x128xf32> to vector<1x16x128xf32>
    %49 = arith.subf %45, %48 : vector<1x16x128xf32>
    %50 = math.exp %49 : vector<1x16x128xf32>
    %cst_11 = arith.constant dense<0.000000e+00> : vector<1x128xf32>
    %51 = vector.multi_reduction <add>, %50, %cst_11 [1] : vector<1x16x128xf32> to vector<1x128xf32>
    %52 = vector.shape_cast %51 : vector<1x128xf32> to vector<1x1x128xf32>
    %53 = vector.broadcast %2 : vector<1x16x1xf32> to vector<1x16x128xf32>
    %54 = arith.mulf %50, %53 : vector<1x16x128xf32>
    %cst_12 = arith.constant dense<0.000000e+00> : vector<1x128xf32>
    %55 = vector.multi_reduction <add>, %54, %cst_12 [1] : vector<1x16x128xf32> to vector<1x128xf32>
    %56 = vector.shape_cast %55 : vector<1x128xf32> to vector<1x1x128xf32>
    %57 = tpu.reciprocal %52 {approx = true} : vector<1x1x128xf32> -> vector<1x1x128xf32>
    %58 = arith.mulf %56, %57 : vector<1x1x128xf32>
    %c0_13 = arith.constant 0 : index
    %c0_14 = arith.constant 0 : index
    %59 = vector.load %arg4[%c0_13, %c0_14] : memref<1x128xf32, #tpu.memory_space<vmem>>, vector<1x128xf32>
    %60 = vector.shape_cast %59 : vector<1x128xf32> to vector<1x1x128xf32>
    %c0_15 = arith.constant 0 : index
    %c0_16 = arith.constant 0 : index
    %61 = vector.load %arg3[%c0_15, %c0_16] : memref<2x128xf32, #tpu.memory_space<vmem>>, vector<1x128xf32>
    %62 = vector.shape_cast %61 : vector<1x128xf32> to vector<1x1x128xf32>
    %c1 = arith.constant 1 : index
    %c0_17 = arith.constant 0 : index
    %63 = vector.load %arg3[%c1, %c0_17] : memref<2x128xf32, #tpu.memory_space<vmem>>, vector<1x128xf32>
    %64 = vector.shape_cast %63 : vector<1x128xf32> to vector<1x1x128xf32>
    %65 = arith.subf %44, %16 : vector<1x1x128xf32>
    %cst_18 = arith.constant 5.000000e-01 : f32
    %66 = vector.broadcast %cst_18 : f32 to vector<1x1x128xf32>
    %67 = arith.mulf %66, %65 : vector<1x1x128xf32>
    %68 = arith.addf %62, %67 : vector<1x1x128xf32>
    %69 = arith.mulf %68, %60 : vector<1x1x128xf32>
    %70 = arith.subf %58, %30 : vector<1x1x128xf32>
    %cst_19 = arith.constant 5.000000e-01 : f32
    %71 = vector.broadcast %cst_19 : f32 to vector<1x1x128xf32>
    %72 = arith.mulf %71, %70 : vector<1x1x128xf32>
    %73 = arith.addf %64, %72 : vector<1x1x128xf32>
    %74 = arith.mulf %73, %60 : vector<1x1x128xf32>
    %75 = arith.addf %16, %44 : vector<1x1x128xf32>
    %76 = arith.mulf %75, %60 : vector<1x1x128xf32>
    %77 = arith.addf %30, %58 : vector<1x1x128xf32>
    %78 = arith.mulf %77, %60 : vector<1x1x128xf32>
    %79 = vector.extract_strided_slice %0 {offsets = [0, 64, 0], sizes = [1, 8, 128], strides = [1, 1, 1]} : vector<1x72x128xf32> to vector<1x8x128xf32>
    %80 = arith.negf %79 : vector<1x8x128xf32>
    %81 = math.exp %80 : vector<1x8x128xf32>
    %cst_20 = arith.constant 1.000000e+00 : f32
    %82 = vector.broadcast %cst_20 : f32 to vector<1x8x128xf32>
    %83 = arith.addf %82, %81 : vector<1x8x128xf32>
    %84 = arith.divf %82, %83 : vector<1x8x128xf32>
    %85 = tpu.concatenate %69, %74, %76, %78, %84 in 1 : vector<1x1x128xf32>, vector<1x1x128xf32>, vector<1x1x128xf32>, vector<1x1x128xf32>, vector<1x8x128xf32> -> vector<1x12x128xf32>
    %c0_21 = arith.constant 0 : index
    %c0_22 = arith.constant 0 : index
    %c0_23 = arith.constant 0 : index
    %86 = vector.load %arg5[%c0_21, %c0_22, %c0_23] : memref<1x12x128xf32, #tpu.memory_space<vmem>>, vector<1x12x128xf32>
    tpu.vector_store %arg5[%c0_21, %c0_22, %c0_23], %85 {strides = array<i32>} : memref<1x12x128xf32, #tpu.memory_space<vmem>>, vector<1x12x128xf32>,
    return
  }
  func.func @transform_0(%arg0: i32, %arg1: i32) -> (i32, i32, i32) {
    %c0_i32 = arith.constant 0 : i32
    %c0_i32_0 = arith.constant 0 : i32
    return %arg0, %c0_i32, %arg1 : i32, i32, i32
  }
  func.func @transform_1(%arg0: i32, %arg1: i32) -> (i32, i32) {
    %c0_i32 = arith.constant 0 : i32
    %c0_i32_0 = arith.constant 0 : i32
    return %c0_i32, %arg1 : i32, i32
  }
  func.func @transform_2(%arg0: i32, %arg1: i32) -> (i32, i32) {
    %c0_i32 = arith.constant 0 : i32
    %c0_i32_0 = arith.constant 0 : i32
    return %c0_i32, %arg1 : i32, i32
  }
  func.func @transform_3(%arg0: i32, %arg1: i32) -> (i32, i32, i32) {
    %c0_i32 = arith.constant 0 : i32
    %c0_i32_0 = arith.constant 0 : i32
    return %arg0, %c0_i32, %arg1 : i32, i32, i32
  }
}

</mosaic_0001>

<bundles_post_ra>
// kernel: _lambda_.5
= control target key start
LH: loop header
LB: loop body
LE: loop exit
PB: predicated region body
PF: predicated region fallthrough
CT: control target
= control target key end

     0   :  { %s636_s12 = smov 0   ;;  %s638_s13 = smov 0   ;;  %s689_s0 = inlined_call_operand.vmem [shape: f32[2,72,128], index: 0, kind: input, shape index: {}]   ;;  %s690_s1 = inlined_call_operand.vmem [shape: f32[2,128], index: 1, kind: input, shape index: {}]   ;;  %s691_s2 = inlined_call_operand.vmem [shape: f32[1,128], index: 2, kind: input, shape index: {}]   ;;  %s692_s3 = inlined_call_operand.vmem [shape: f32[2,12,128], index: 3, kind: output, shape index: {}]  }
   0x1   :  { %s640_s14 = smov 0  }
   0x2 LB: > { %s25_s15 = sadd.s32 1, %s610_s13  ;;  %p531_p0 = scmp.ge.s32.totalorder %s614_s14, 1  ;;  %s614_s14 = sphi %s640_s14, %s13_s14   ;;  %s610_s13 = sphi %s638_s13, %s694_s13   ;;  %s606_s12 = sphi %s636_s12, %s693_s12  }
   0x3   : > { %p27_p1 = scmp.ge.s32.totalorder %s25_s15, 2  ;;  %p173_p2 = scmp.lt.s32.totalorder %s614_s14, 3 }
   0x5   : > { %s696_s15 = smov (%p27_p1, %s25_s15), 0  ;;  %p174_p3 = pnand %p531_p0, %p173_p2 }
   0x6   : > { %p210_p4 = scmp.lt.s32.totalorder (!%p174_p3), %s606_s12, 1 }
   0x7   : > { %177 = sbr.rel (%p174_p3) target bundleno = 101 (0x65), region = 32 }
   0xc   : > { %s698_s12 = smov (!%p210_p4, %s606_s12), 1  ;;  %v242_v51 = vlaneseq  ;;  %vm404_vm0 = vcmask 1040384   ;;  %vm406_vm1 = vcmask 1041408   ;;  %vm408_vm2 = vcmask 1042432  }
   0xd   : > { %s539_s16 = smul.u32 72, %s698_s12  ;;  %s538_s20 = sshll.u32 %s698_s12, 4  ;;  %vm410_vm3 = vcmask 1043456  }
   0xe   : > { %v243_v55 = vshrl.u32 %v242_v51, 7  ;;  %s666_s23 = scalar_lea.vmem %s692_s3, %s538_s20 }
   0xf   : > { %s217_s19 = scalar_lea.vmem %s689_s0, %s539_s16 }
  0x10   : > { %v233_v0 = vld [vmem:[%s217_s19] sm:$0xff]  ;;  %v234_v1 = vld [vmem:[%s217_s19 + $0x8] sm:$0xff]  ;;  %v235_v2 = vld [vmem:[%s217_s19 + $0x10] sm:$0xff]  ;;  %v244_v57 = vadd.s32 8, %v243_v55  ;;  %v245_v59 = vcvt.s32.f32 %v243_v55 }
  0x11   : > { %v236_v3 = vld [vmem:[%s217_s19 + $0x18] sm:$0xff]  ;;  %v237_v4 = vld [vmem:[%s217_s19 + $0x20] sm:$0xff]  ;;  %v238_v5 = vld [vmem:[%s217_s19 + $0x28] sm:$0xff]  ;;  %v247_v6 = vmax.f32 %v233_v0, %v234_v1 }
  0x12   : > { %v239_v7 = vld [vmem:[%s217_s19 + $0x30] sm:$0xff]  ;;  %v240_v8 = vld [vmem:[%s217_s19 + $0x38] sm:$0xff]  ;;  %v278_v9 = vmax.f32 %v235_v2, %v236_v3  ;;  %v309_v10 = vmax.f32 %v237_v4, %v238_v5  ;;  %v241_v19 = vld [vmem:[%s217_s19 + $0x40] sm:$0xff]  ;;  %v246_v61 = vcvt.s32.f32 %v244_v57 }
  0x13   : > { %v248_v11 = vrot.slane %v247_v6, 4  ;;  %v340_v12 = vmax.f32 %v239_v7, %v240_v8  ;;  %v535_v28 = vmul.f32 -1.442695, %v241_v19 }
  0x14   : > { %v279_v13 = vrot.slane %v278_v9, 4  ;;  %v310_v14 = vrot.slane %v309_v10, 4 }
  0x15   : > { %v249_v15 = vmax.f32 %v247_v6, %v248_v11  ;;  %v341_v16 = vrot.slane %v340_v12, 4  ;;  %564 = vpow2.f32 %v535_v28 }
  0x16   : > { %v280_v17 = vmax.f32 %v278_v9, %v279_v13  ;;  %v311_v18 = vmax.f32 %v309_v10, %v310_v14 }
  0x17   : > { %v250_v20 = vrot.slane %v249_v15, 2  ;;  %v342_v21 = vmax.f32 %v340_v12, %v341_v16 }
  0x18   : > { %v281_v22 = vrot.slane %v280_v17, 2  ;;  %v312_v23 = vrot.slane %v311_v18, 2 }
  0x19   : > { %v251_v24 = vmax.f32 %v249_v15, %v250_v20  ;;  %v343_v25 = vrot.slane %v342_v21, 2 }
  0x1a   : > { %v282_v26 = vmax.f32 %v280_v17, %v281_v22  ;;  %v313_v27 = vmax.f32 %v311_v18, %v312_v23 }
  0x1b   : > { %v252_v29 = vrot.slane %v251_v24, 1  ;;  %v344_v30 = vmax.f32 %v342_v21, %v343_v25 }
  0x1c   : > { %v283_v31 = vrot.slane %v282_v26, 1  ;;  %v314_v32 = vrot.slane %v313_v27, 1 }
  0x1d   : > { %v253_v33 = vmax.f32 %v251_v24, %v252_v29  ;;  %v345_v34 = vrot.slane %v344_v30, 1 }
  0x1e   : > { %v284_v35 = vmax.f32 %v282_v26, %v283_v31  ;;  %v315_v36 = vmax.f32 %v313_v27, %v314_v32 }
  0x1f   : > { %v254_v37 = vsub.f32 %v233_v0, %v253_v33  ;;  %v255_v38 = vsub.f32 %v234_v1, %v253_v33  ;;  %v346_v39 = vmax.f32 %v344_v30, %v345_v34 }
  0x20   : > { %v285_v40 = vsub.f32 %v235_v2, %v284_v35  ;;  %v286_v41 = vsub.f32 %v236_v3, %v284_v35  ;;  %v316_v42 = vsub.f32 %v237_v4, %v315_v36  ;;  %v317_v43 = vsub.f32 %v238_v5, %v315_v36 }
  0x21   : > { %v256_v44 = vmul.f32 1.442695, %v254_v37  ;;  %v258_v45 = vmul.f32 1.442695, %v255_v38  ;;  %v347_v46 = vsub.f32 %v239_v7, %v346_v39  ;;  %v348_v49 = vsub.f32 %v240_v8, %v346_v39 }
  0x22   : > { %v287_v47 = vmul.f32 1.442695, %v285_v40  ;;  %v289_v48 = vmul.f32 1.442695, %v286_v41  ;;  %v318_v50 = vmul.f32 1.442695, %v316_v42  ;;  %v565_v56 = vpop.eup %564 }
  0x23   : > { %566 = vpow2.f32 %v256_v44  ;;  %v320_v52 = vmul.f32 1.442695, %v317_v43  ;;  %v349_v53 = vmul.f32 1.442695, %v347_v46  ;;  %v351_v54 = vmul.f32 1.442695, %v348_v49 }
  0x24   : > { %568 = vpow2.f32 %v258_v45  ;;  %v389_v58 = vadd.f32 1.0, %v565_v56 }
  0x25   : > { %570 = vpow2.f32 %v287_v47 }
  0x26   : > { %572 = vpow2.f32 %v289_v48 }
  0x27   : > { %574 = vpow2.f32 %v318_v50 }
  0x28   : > { %576 = vpow2.f32 %v320_v52 }
  0x29   : > { %578 = vpow2.f32 %v349_v53 }
  0x2a   : > { %580 = vpow2.f32 %v351_v54 }
  0x2b   : > { %582 = vrcp.f32 %v389_v58 }
  0x30   : > { %v567_v60 = vpop.eup %566 }
  0x31   : > { %v569_v62 = vpop.eup %568  ;;  %v267_v63 = vmul.f32 %v567_v60, %v245_v59 }
  0x32   : > { %v571_v0 = vpop.eup %570  ;;  %v260_v1 = vadd.f32 %v569_v62, %v567_v60  ;;  %v268_v2 = vmul.f32 %v569_v62, %v246_v61 }
  0x33   : > { %v573_v3 = vpop.eup %572  ;;  %v298_v4 = vmul.f32 %v571_v0, %v245_v59 }
  0x34   : > { %v575_v5 = vpop.eup %574  ;;  %v261_v6 = vrot.slane %v260_v1, 4  ;;  %v269_v7 = vadd.f32 %v268_v2, %v267_v63  ;;  %v291_v8 = vadd.f32 %v573_v3, %v571_v0  ;;  %v299_v9 = vmul.f32 %v573_v3, %v246_v61 }
  0x35   : > { %v577_v10 = vpop.eup %576  ;;  %v329_v11 = vmul.f32 %v575_v5, %v245_v59 }
  0x36   : > { %v579_v12 = vpop.eup %578  ;;  %v262_v13 = vadd.f32 %v261_v6, %v260_v1  ;;  %v292_v14 = vrot.slane %v291_v8, 4  ;;  %v300_v15 = vadd.f32 %v299_v9, %v298_v4  ;;  %v322_v17 = vadd.f32 %v577_v10, %v575_v5 }
  0x37   : > { %v581_v16 = vpop.eup %580  ;;  %v330_v18 = vmul.f32 %v577_v10, %v246_v61  ;;  %v360_v19 = vmul.f32 %v579_v12, %v245_v59  ;;  %v270_v21 = vrot.slane %v269_v7, 4 }
  0x38   : > { %v263_v20 = vrot.slane %v262_v13, 2  ;;  %v293_v22 = vadd.f32 %v292_v14, %v291_v8  ;;  %v323_v23 = vrot.slane %v322_v17, 4  ;;  %v353_v25 = vadd.f32 %v581_v16, %v579_v12  ;;  %v661_v43 = vpop.eup %582 }
  0x39   : > { %v331_v24 = vadd.f32 %v330_v18, %v329_v11  ;;  %v361_v26 = vmul.f32 %v581_v16, %v246_v61  ;;  %v301_v29 = vrot.slane %v300_v15, 4  ;;  %v271_v35 = vadd.f32 %v270_v21, %v269_v7  ;;  %v372_v16 = vld [vmem:[%s690_s1] sm:$0x1] }
  0x3a   : > { %v264_v27 = vadd.f32 %v263_v20, %v262_v13  ;;  %v294_v28 = vrot.slane %v293_v22, 2  ;;  %v324_v30 = vadd.f32 %v323_v23, %v322_v17  ;;  %v354_v32 = vrot.slane %v353_v25, 4  ;;  %v371_v18 = vld [vmem:[%s691_s2] sm:$0x1] }
  0x3b   : > { %v332_v31 = vrot.slane %v331_v24, 4  ;;  %v362_v33 = vadd.f32 %v361_v26, %v360_v19  ;;  %v302_v42 = vadd.f32 %v301_v29, %v300_v15  ;;  %v272_v47 = vrot.slane %v271_v35, 2 }
  0x3c   : > { %v265_v34 = vrot.slane %v264_v27, 1  ;;  %v295_v36 = vadd.f32 %v294_v28, %v293_v22  ;;  %v325_v37 = vrot.slane %v324_v30, 2  ;;  %v355_v38 = vadd.f32 %v354_v32, %v353_v25  ;;  %v373_v22 = vld [vmem:[%s690_s1 + $0x1] sm:$0x1] }
  0x3d   : > { %v363_v39 = vrot.slane %v362_v33, 4  ;;  %v333_v45 = vadd.f32 %v332_v31, %v331_v24  ;;  %v303_v52 = vrot.slane %v302_v42, 2  ;;  %v402_v53 = vrot.slane %v661_v43, 4 }
  0x3e   : > { %v266_v40 = vadd.f32 %v265_v34, %v264_v27  ;;  %v296_v41 = vrot.slane %v295_v36, 1  ;;  %v326_v44 = vadd.f32 %v325_v37, %v324_v30  ;;  %v356_v46 = vrot.slane %v355_v38, 2 }
  0x3f   : > { %v364_v51 = vadd.f32 %v363_v39, %v362_v33  ;;  %v334_v55 = vrot.slane %v333_v45, 2  ;;  %413 = vst [vmem:[%s666_s23 + $0x8] sm:$0xf] %v402_v53  ;;  %v273_v57 = vadd.f32 %v272_v47, %v271_v35  ;;  %v304_v60 = vadd.f32 %v303_v52, %v302_v42 }
  0x40   : > { %v297_v48 = vadd.f32 %v296_v41, %v295_v36  ;;  %584 = vrcp.f32 %v266_v40  ;;  %v327_v49 = vrot.slane %v326_v44, 1  ;;  %v357_v50 = vadd.f32 %v356_v46, %v355_v38 }
  0x41   : > { %v365_v59 = vrot.slane %v364_v51, 2  ;;  %v335_v61 = vadd.f32 %v334_v55, %v333_v45  ;;  %v274_v62 = vrot.slane %v273_v57, 1  ;;  %v305_v0 = vrot.slane %v304_v60, 1 }
  0x42   : > { %586 = vrcp.f32 %v297_v48  ;;  %v328_v54 = vadd.f32 %v327_v49, %v326_v44  ;;  %v358_v56 = vrot.slane %v357_v50, 1 }
  0x43   : > { %v366_v63 = vadd.f32 %v365_v59, %v364_v51  ;;  %v336_v1 = vrot.slane %v335_v61, 1  ;;  %v275_v2 = vadd.f32 %v274_v62, %v273_v57  ;;  %v306_v5 = vadd.f32 %v305_v0, %v304_v60 }
  0x44   : > { %588 = vrcp.f32 %v328_v54  ;;  %v359_v58 = vadd.f32 %v358_v56, %v357_v50 }
  0x45   : > { %v367_v3 = vrot.slane %v366_v63, 1  ;;  %v337_v6 = vadd.f32 %v336_v1, %v335_v61 }
  0x46   : > { %590 = vrcp.f32 %v359_v58 }
  0x47   : > { %v368_v9 = vadd.f32 %v367_v3, %v366_v63 }
  0x4d   : > { %v585_v4 = vpop.eup %584 }
  0x4e   : > { %v277_v8 = vmul.f32 %v585_v4, %v275_v2 }
  0x4f   : > { %v587_v7 = vpop.eup %586 }
  0x50   : > { %v308_v11 = vmul.f32 %v587_v7, %v306_v5 }
  0x51   : > { %v589_v10 = vpop.eup %588 }
  0x52   : > { %v339_v12 = vmul.f32 %v589_v10, %v337_v6 }
  0x53   : > { %v591_v13 = vpop.eup %590 }
  0x54   : > { %v370_v14 = vmul.f32 %v591_v13, %v368_v9  ;;  %v374_v15 = vsub.f32 %v339_v12, %v277_v8  ;;  %v382_v17 = vadd.f32 %v339_v12, %v277_v8 }
  0x56   : > { %v375_v19 = vmul.f32 0.5, %v374_v15  ;;  %v378_v20 = vsub.f32 %v370_v14, %v308_v11  ;;  %v384_v21 = vadd.f32 %v370_v14, %v308_v11  ;;  %v383_v25 = vmul.f32 %v382_v17, %v371_v18 }
  0x58   : > { %v376_v23 = vadd.f32 %v375_v19, %v372_v16  ;;  %v379_v24 = vmul.f32 0.5, %v378_v20  ;;  %v385_v27 = vmul.f32 %v384_v21, %v371_v18  ;;  %v396_v30 = vrot.slane %v383_v25, 6 }
  0x5a   : > { %v380_v26 = vadd.f32 %v379_v24, %v373_v22  ;;  %v377_v28 = vmul.f32 %v376_v23, %v371_v18  ;;  %v399_v32 = vrot.slane %v385_v27, 5 }
  0x5c   : > { %v381_v29 = vmul.f32 %v380_v26, %v371_v18 }
  0x5e   : > { %v393_v31 = vrot.slane %v381_v29, 7 }
  0x60   : > { %v405_v33 = vsel %vm404_vm0, %v377_v28, %v393_v31 }
  0x61   : > { %v407_v34 = vsel %vm406_vm1, %v405_v33, %v396_v30 }
  0x62   : > { %v409_v35 = vsel %vm408_vm2, %v407_v34, %v399_v32 }
  0x63   : > { %v411_v36 = vsel %vm410_vm3, %v409_v35, %v402_v53 }
  0x64   : > { %412 = vst [vmem:[%s666_s23] sm:$0xff] %v411_v36 }
  0x65 PF: > { %s13_s14 = sadd.s32 1, %s614_s14   ;;  %s693_s12 = smov %s610_s13 }
  0x66   : > { %p10_p5 = scmp.ge.s32.totalorder %s13_s14, 4   ;;  %s694_s13 = smov %s696_s15 }
  0x68   :  { %12 = sbr.rel (!%p10_p5) target bundleno = 2 (0x2), region = 68 }

// kernel: _lambda_.3
= control target key start
LH: loop header
LB: loop body
LE: loop exit
PB: predicated region body
PF: predicated region fallthrough
CT: control target
= control target key end

     0   :  { %s2438_s30 = smov 0   ;;  %s3180_s0 = inlined_call_operand.vmem [shape: bf16[2,16,256], index: 0, kind: input, shape index: {}]   ;;  %s3181_s1 = inlined_call_operand.vmem [shape: f32[1,128], index: 1, kind: input, shape index: {}]   ;;  %s3182_s2 = inlined_call_operand.vmem [shape: bf16[80,144], index: 2, kind: input, shape index: {}]   ;;  %s3183_s3 = inlined_call_operand.vmem [shape: f32[80,1], index: 3, kind: input, shape index: {}]   ;;  %s3184_s4 = inlined_call_operand.vmem [shape: bf16[4,16,144], index: 4, kind: input, shape index: {}]   ;;  %s3185_s5 = inlined_call_operand.vmem [shape: bf16[16,144], index: 5, kind: input, shape index: {}]   ;;  %s3186_s6 = inlined_call_operand.vmem [shape: f32[80,1], index: 6, kind: input, shape index: {}]   ;;  %s3187_s7 = inlined_call_operand.vmem [shape: bf16[72,80], index: 7, kind: input, shape index: {}]   ;;  %s3188_s8 = inlined_call_operand.vmem [shape: f32[72,1], index: 8, kind: input, shape index: {}]   ;;  %s3189_s9 = inlined_call_operand.vmem [shape: f32[2,72,128], index: 9, kind: output, shape index: {}]  }
   0x1 LB: > { %s2444_s10 = sadd.s32 4294967295, %s2373_s30   ;;  %p2014_p0 = scmp.ge.s32.totalorder %s2373_s30, 1  ;;  %s2373_s30 = sphi %s2438_s30, %s19_s30  }
   0x2   : > { %p287_p1 = scmp.lt.s32.totalorder %s2373_s30, 3 }
   0x4   : > { %p288_p2 = pnand %p2014_p0, %p287_p1 }
   0x5   : > { %p323_p3 = scmp.lt.s32.totalorder (!%p288_p2), %s2444_s10, 1  ;;  %s2376_s20 = smov (!%p288_p2), 108  }
   0x6   : > { %291 = sbr.rel (%p288_p2) target bundleno = 1374 (0x55e), region = 56  ;;  %s2377_s21 = smov (!%p288_p2), 107  }
   0x7   : > { %s2378_s22 = smov (!%p288_p2), 116   ;;  %s2379_s23 = smov (!%p288_p2), 117  }
   0x8   : > { %s2380_s24 = smov (!%p288_p2), 118   ;;  %s2381_s25 = smov (!%p288_p2), 126  }
   0x9   : > { %s2382_s26 = smov (!%p288_p2), 127   ;;  %s3190_s29 = smov (!%p288_p2), 106  }
   0xa   : > { %p2047_p4 = scmp.ne.s32.totalorder (!%p288_p2), %s2444_s10, 0 }
   0xb   : > { %v2375_v0 = vmov 0   ;;  %s324_s11 = scalar_select %p323_p3, %s2444_s10, 1  ;;  %v2217_v3 = vld [vmem:[%s3182_s2 + $0x4] ss:$8 sps:$4 sm:$0xff]   ;;  %vm523_vm0 = vcmask 130048   ;;  %v420_v6 = vld [vmem:[%s3183_s3 + $0x10] sm:$0xff] }
   0xc   : > { %539 = vmatprep.subr.bf16.mxu0 %v2375_v0  ;;  %2209 = vset.pattern.permute.xlu0 %v2375_v0  ;;  %v418_v4 = vld [vmem:[%s3183_s3] sm:$0xff]  ;;  %v419_v5 = vld [vmem:[%s3183_s3 + $0x8] sm:$0xff]  ;;  %v421_v7 = vld [vmem:[%s3183_s3 + $0x18] sm:$0xff]  ;;  %vm398_vm1 = vcmask 875520   ;;  %vm391_vm2 = vcmask 883712   ;;  %vm384_vm3 = vcmask 949248  }
   0xd   : > { %2210 = vset.pattern.permute.xlu1 %v2375_v0  ;;  %s2126_s12 = sshll.u32 %s324_s11, 4  ;;  %s2187_s13 = smul.u32 72, %s324_s11  ;;  %2031 = vmatprep.mubr.msk.bf16.mxu0 %vm523_vm0, %v2217_v3  ;;  %v422_v8 = vld [vmem:[%s3183_s3 + $0x20] sm:$0xff]  ;;  %v423_v9 = vld [vmem:[%s3183_s3 + $0x28] sm:$0xff]  ;;  %v424_v10 = vld [vmem:[%s3183_s3 + $0x30] sm:$0xff]  ;;  %vm377_vm4 = vcmask 957440  }
   0xe   : > { %s2456_s16 = scalar_lea.vmem %s3180_s0, %s2126_s12  ;;  %v425_v11 = vld [vmem:[%s3183_s3 + $0x38] sm:$0xff]  ;;  %v426_v12 = vld [vmem:[%s3183_s3 + $0x40] sm:$0xff]  ;;  %v427_v13 = vld [vmem:[%s3183_s3 + $0x48] sm:$0xff]  ;;  %vm370_vm5 = vcmask 965632   ;;  %vm363_vm6 = vcmask 1031168   ;;  %vm356_vm7 = vcmask 1039360  }
   0xf   : > { %s2461_s19 = scalar_lea.vmem %s3189_s9, %s2187_s13  ;;  %v2211_v1 = vld [vmem:[%s2456_s16] ss:$8 sps:$4 sm:$0xff]   ;;  %v2213_v2 = vld [vmem:[%s2456_s16 + $0x4] ss:$8 sps:$4 sm:$0xff]   ;;  %vm405_vm8 = vcmask 867328  }
  0x10   : > { %387 = vrot.lane.b32.xlu1 %v2211_v1, %s2376_s20  ;;  %394 = vrot.lane.b32.xlu0 %v2211_v1, %s2377_s21  ;;  %v2214_v35 = vld [vmem:[%s2456_s16] ss:$8 sps:$4 sm:$0xff]   ;;  %v2218_v40 = vld [vmem:[%s3182_s2 + $0x14] ss:$8 sps:$4 sm:$0xff]  }
  0x11   : > { %v2215_v39 = vld [vmem:[%s3182_s2] ss:$8 sps:$4 sm:$0xff]   ;;  %v2220_v41 = vld [vmem:[%s3182_s2 + $0x10] ss:$8 sps:$4 sm:$0xff]   ;;  %v2221_v42 = vld [vmem:[%s3182_s2 + $0x24] ss:$8 sps:$4 sm:$0xff]  }
  0x12   : > { %v2223_v43 = vld [vmem:[%s3182_s2 + $0x20] ss:$8 sps:$4 sm:$0xff]   ;;  %v2224_v44 = vld [vmem:[%s3182_s2 + $0x34] ss:$8 sps:$4 sm:$0xff]   ;;  %v2226_v45 = vld [vmem:[%s3182_s2 + $0x30] ss:$8 sps:$4 sm:$0xff]  }
  0x13   : > { %v2227_v46 = vld [vmem:[%s3182_s2 + $0x44] ss:$8 sps:$4 sm:$0xff]   ;;  %v2229_v47 = vld [vmem:[%s3182_s2 + $0x40] ss:$8 sps:$4 sm:$0xff]  }
  0x14   : > { %389 = vrot.lane.b32.xlu1 %v2213_v2, %s2376_s20  ;;  %396 = vrot.lane.b32.xlu0 %v2213_v2, %s2377_s21 }
  0x18   : > { %382 = vrot.lane.b32.xlu1 %v2213_v2, %s2378_s22  ;;  %380 = vrot.lane.b32.xlu0 %v2211_v1, %s2378_s22 }
  0x1c   : > { %375 = vrot.lane.b32.xlu1 %v2213_v2, %s2379_s23  ;;  %373 = vrot.lane.b32.xlu0 %v2211_v1, %s2379_s23 }
  0x20   : > { %368 = vrot.lane.b32.xlu1 %v2213_v2, %s2380_s24  ;;  %366 = vrot.lane.b32.xlu0 %v2211_v1, %s2380_s24 }
  0x24   : > { %361 = vrot.lane.b32.xlu1 %v2213_v2, %s2381_s25  ;;  %359 = vrot.lane.b32.xlu0 %v2211_v1, %s2381_s25 }
  0x28   : > { %354 = vrot.lane.b32.xlu1 %v2213_v2, %s2382_s26  ;;  %352 = vrot.lane.b32.xlu0 %v2211_v1, %s2382_s26 }
  0x2c   : > { %403 = vrot.lane.b32.xlu1 %v2213_v2, %s3190_s29  ;;  %401 = vrot.lane.b32.xlu0 %v2211_v1, %s3190_s29 }
  0x30   : > { %430 = vperm.xlu0 %2209, %v418_v4   ;;  %435 = vperm.xlu1 %2210, %v419_v5  }
  0x34   : > { %440 = vperm.xlu1 %2210, %v420_v6   ;;  %445 = vperm.xlu0 %2209, %v421_v7  }
  0x38   : > { %450 = vperm.xlu1 %2210, %v422_v8   ;;  %455 = vperm.xlu0 %2209, %v423_v9  }
  0x3c   : > { %460 = vperm.xlu1 %2210, %v424_v10   ;;  %465 = vperm.xlu0 %2209, %v425_v11  }
  0x40   : > { %470 = vperm.xlu1 %2210, %v426_v12   ;;  %475 = vperm.xlu0 %2209, %v427_v13  }
  0x82   : > { %v388_v14 = vpop.permute.xlu1 %387  ;;  %v395_v15 = vpop.permute.xlu0 %394 }
  0x86   : > { %v390_v16 = vpop.permute.xlu1 %389  ;;  %v397_v17 = vpop.permute.xlu0 %396 }
  0x87   : > { %v399_v18 = vsel %vm398_vm1, %v395_v15, %v397_v17  ;;  %v392_v21 = vsel %vm391_vm2, %v388_v14, %v390_v16 }
  0x88   : > { %540 = vmatpush1.bf16.msra.mxu0 %v399_v18 }
  0x89   : > { %541 = vmatprep.subr.bf16.mxu0 %v2375_v0 }
  0x8a   : > { %v383_v19 = vpop.permute.xlu1 %382  ;;  %v381_v20 = vpop.permute.xlu0 %380 }
  0x8b   : > { %v385_v22 = vsel %vm384_vm3, %v381_v20, %v383_v19 }
  0x8c   : > { %542 = vmatpush1.bf16.msra.mxu0 %v392_v21 }
  0x8d   : > { %543 = vmatprep.subr.bf16.mxu0 %v2375_v0 }
  0x8e   : > { %v376_v23 = vpop.permute.xlu1 %375  ;;  %v374_v24 = vpop.permute.xlu0 %373 }
  0x8f   : > { %v378_v25 = vsel %vm377_vm4, %v374_v24, %v376_v23 }
  0x90   : > { %544 = vmatpush1.bf16.msra.mxu0 %v385_v22 }
  0x91   : > { %545 = vmatprep.subr.bf16.mxu0 %v2375_v0 }
  0x92   : > { %v369_v26 = vpop.permute.xlu1 %368  ;;  %v367_v27 = vpop.permute.xlu0 %366 }
  0x93   : > { %v371_v28 = vsel %vm370_vm5, %v367_v27, %v369_v26 }
  0x94   : > { %546 = vmatpush1.bf16.msra.mxu0 %v378_v25 }
  0x95   : > { %547 = vmatprep.subr.bf16.mxu0 %v2375_v0 }
  0x96   : > { %v362_v29 = vpop.permute.xlu1 %361  ;;  %v360_v30 = vpop.permute.xlu0 %359 }
  0x97   : > { %v364_v31 = vsel %vm363_vm6, %v360_v30, %v362_v29 }
  0x98   : > { %548 = vmatpush1.bf16.msra.mxu0 %v371_v28 }
  0x99   : > { %549 = vmatprep.subr.bf16.mxu0 %v2375_v0 }
  0x9a   : > { %v355_v32 = vpop.permute.xlu1 %354  ;;  %v353_v33 = vpop.permute.xlu0 %352 }
  0x9b   : > { %v357_v34 = vsel %vm356_vm7, %v353_v33, %v355_v32 }
  0x9c   : > { %550 = vmatpush1.bf16.msra.mxu0 %v364_v31 }
  0x9d   : > { %551 = vmatprep.subr.bf16.mxu0 %v2375_v0 }
  0x9e   : > { %v404_v36 = vpop.permute.xlu1 %403  ;;  %v402_v37 = vpop.permute.xlu0 %401 }
  0x9f   : > { %v406_v38 = vsel %vm405_vm8, %v402_v37, %v404_v36  ;;  %v2046_v37 = vld [vmem:[%s3181_s1] ss:$0 sm:$0xff] }
  0xa0   : > { %552 = vmatpush1.bf16.msra.mxu0 %v357_v34 }
  0xa1   : > { %553 = vmatprep.subr.bf16.mxu0 %v2375_v0 }
  0xa4   : > { %554 = vmatpush1.bf16.msra.mxu0 %v2214_v35 }
  0xa5   : > { %569 = vmatprep.subr.bf16.mxu0 %v2375_v0 }
  0xa8   : > { %570 = vmatpush2.bf16.msra.mxu0 %v406_v38 }
  0xab   : > { %572 = vmatmul.mubr.bf16.vlgmr.msra.gmra.mxu0 %v2215_v39  ;;  %v431_v48 = vpop.permute.xlu0 %430  ;;  %v436_v50 = vpop.permute.xlu1 %435 }
  0xac   : > { %2032 = vmatprep.mubr.msk.bf16.mxu0 %vm523_vm0, %v2218_v40 }
  0xaf   : > { %v441_v57 = vpop.permute.xlu1 %440  ;;  %v446_v63 = vpop.permute.xlu0 %445 }
  0xb3   : > { %580 = vmatmul.mubr.bf16.gmra.mxu0 %v2220_v41  ;;  %v451_v5 = vpop.permute.xlu1 %450  ;;  %v456_v12 = vpop.permute.xlu0 %455 }
  0xb4   : > { %2033 = vmatprep.mubr.msk.bf16.mxu0 %vm523_vm0, %v2221_v42 }
  0xb7   : > { %v461_v19 = vpop.permute.xlu1 %460  ;;  %v466_v26 = vpop.permute.xlu0 %465 }
  0xbb   : > { %588 = vmatmul.mubr.bf16.gmra.mxu0 %v2223_v43  ;;  %v471_v33 = vpop.permute.xlu1 %470  ;;  %v476_v43 = vpop.permute.xlu0 %475 }
  0xbc   : > { %2034 = vmatprep.mubr.msk.bf16.mxu0 %vm523_vm0, %v2224_v44 }
  0xc3   : > { %596 = vmatmul.mubr.bf16.gmra.mxu0 %v2226_v45 }
  0xc4   : > { %2035 = vmatprep.mubr.msk.bf16.mxu0 %vm523_vm0, %v2227_v46 }
  0xcb   : > { %604 = vmatmul.mubr.bf16.gmra.mxu0 %v2229_v47 }
 0x16b   : > { %v573_v49 = vpop.f32.mrf.mxu0 }
 0x16c   : > { %v2562_v51 = vadd.f32 %v573_v49, %v431_v48 }
 0x16d   : > { %v575_v52 = vpop.f32.mrf.mxu0 }
 0x16e   : > { %v2036_v53 = vmul.f32 -1.442695, %v2562_v51 }
 0x16f   : > { %v576_v54 = vpop.f32.mrf.mxu0 }
 0x170   : > { %2230 = vpow2.f32 %v2036_v53  ;;  %v2565_v55 = vadd.f32 %v576_v54, %v436_v50 }
 0x171   : > { %v578_v56 = vpop.f32.mrf.mxu0 }
 0x172   : > { %v2037_v58 = vmul.f32 -1.442695, %v2565_v55 }
 0x173   : > { %v581_v59 = vpop.f32.mrf.mxu0 }
 0x174   : > { %2232 = vpow2.f32 %v2037_v58  ;;  %v2568_v60 = vadd.f32 %v581_v59, %v441_v57 }
 0x175   : > { %v583_v61 = vpop.f32.mrf.mxu0 }
 0x176   : > { %v2038_v62 = vmul.f32 -1.442695, %v2568_v60 }
 0x177   : > { %v584_v1 = vpop.f32.mrf.mxu0 }
 0x178   : > { %2234 = vpow2.f32 %v2038_v62  ;;  %v2571_v2 = vadd.f32 %v584_v1, %v446_v63 }
 0x179   : > { %v586_v3 = vpop.f32.mrf.mxu0 }
 0x17a   : > { %v2039_v4 = vmul.f32 -1.442695, %v2571_v2 }
 0x17b   : > { %v589_v6 = vpop.f32.mrf.mxu0 }
 0x17c   : > { %2236 = vpow2.f32 %v2039_v4  ;;  %v2574_v7 = vadd.f32 %v589_v6, %v451_v5 }
 0x17d   : > { %v2231_v8 = vpop.eup %2230  ;;  %v591_v9 = vpop.f32.mrf.mxu0 }
 0x17e   : > { %v642_v10 = vadd.f32 1.0, %v2231_v8  ;;  %v2040_v11 = vmul.f32 -1.442695, %v2574_v7 }
 0x17f   : > { %v592_v13 = vpop.f32.mrf.mxu0 }
 0x180   : > { %2238 = vrcp.f32 %v642_v10  ;;  %v2577_v14 = vadd.f32 %v592_v13, %v456_v12 }
 0x181   : > { %v2233_v15 = vpop.eup %2232  ;;  %2240 = vpow2.f32 %v2040_v11  ;;  %v594_v16 = vpop.f32.mrf.mxu0 }
 0x182   : > { %v643_v17 = vadd.f32 1.0, %v2233_v15  ;;  %v2041_v18 = vmul.f32 -1.442695, %v2577_v14 }
 0x183   : > { %v597_v20 = vpop.f32.mrf.mxu0 }
 0x184   : > { %2242 = vrcp.f32 %v643_v17  ;;  %v2580_v21 = vadd.f32 %v597_v20, %v461_v19 }
 0x185   : > { %v2235_v22 = vpop.eup %2234  ;;  %2244 = vpow2.f32 %v2041_v18  ;;  %v599_v23 = vpop.f32.mrf.mxu0 }
 0x186   : > { %v644_v24 = vadd.f32 1.0, %v2235_v22  ;;  %v2042_v25 = vmul.f32 -1.442695, %v2580_v21 }
 0x187   : > { %v600_v27 = vpop.f32.mrf.mxu0 }
 0x188   : > { %2246 = vrcp.f32 %v644_v24  ;;  %v601_v28 = vadd.f32 %v600_v27, %v466_v26 }
 0x189   : > { %v2237_v29 = vpop.eup %2236  ;;  %2248 = vpow2.f32 %v2042_v25  ;;  %v602_v30 = vpop.f32.mrf.mxu0 }
 0x18a   : > { %v645_v31 = vadd.f32 1.0, %v2237_v29  ;;  %v2043_v32 = vmul.f32 -1.442695, %v601_v28 }
 0x18b   : > { %v605_v34 = vpop.f32.mrf.mxu0 }
 0x18c   : > { %2250 = vrcp.f32 %v645_v31  ;;  %v606_v35 = vadd.f32 %v605_v34, %v471_v33 }
 0x18d   : > { %v2239_v36 = vpop.eup %2238  ;;  %2252 = vpow2.f32 %v2043_v32  ;;  %v607_v38 = vpop.f32.mrf.mxu0 }
 0x18e   : > { %v2241_v39 = vpop.eup %2240  ;;  %v672_v40 = vmul.f32 %v2239_v36, %v2562_v51  ;;  %v2044_v41 = vmul.f32 -1.442695, %v606_v35 }
 0x18f   : > { %v646_v42 = vadd.f32 1.0, %v2241_v39  ;;  %v608_v44 = vpop.f32.mrf.mxu0 }
 0x190   : > { %v2587_v45 = vmul.f32 %v2046_v37, %v672_v40  ;;  %2254 = vpow2.f32 %v2044_v41  ;;  %v609_v46 = vadd.f32 %v608_v44, %v476_v43 }
 0x191   : > { %v2243_v47 = vpop.eup %2242  ;;  %2256 = vrcp.f32 %v646_v42  ;;  %v610_v48 = vpop.f32.mrf.mxu0 }
 0x192   : > { %v2245_v49 = vpop.eup %2244  ;;  %v673_v50 = vmul.f32 %v2243_v47, %v2565_v55  ;;  %v2045_v52 = vmul.f32 -1.442695, %v609_v46 }
 0x193   : > { %v647_v53 = vadd.f32 1.0, %v2245_v49 }
 0x194   : > { %v2590_v54 = vmul.f32 %v2046_v37, %v673_v50  ;;  %2258 = vpow2.f32 %v2045_v52 }
 0x195   : > { %v2247_v51 = vpop.eup %2246  ;;  %2260 = vrcp.f32 %v647_v53 }
 0x196   : > { %v2249_v56 = vpop.eup %2248  ;;  %v674_v57 = vmul.f32 %v2247_v51, %v2568_v60 }
 0x197   : > { %v648_v58 = vadd.f32 1.0, %v2249_v56 }
 0x198   : > { %v2593_v59 = vmul.f32 %v2046_v37, %v674_v57 }
 0x199   : > { %v2251_v61 = vpop.eup %2250  ;;  %2262 = vrcp.f32 %v648_v58 }
 0x19a   : > { %v2253_v62 = vpop.eup %2252  ;;  %v675_v63 = vmul.f32 %v2251_v61, %v2571_v2 }
 0x19b   : > { %v649_v1 = vadd.f32 1.0, %v2253_v62 }
 0x19c   : > { %v2596_v55 = vmul.f32 %v2046_v37, %v675_v63 }
 0x19d   : > { %v2255_v3 = vpop.eup %2254  ;;  %2264 = vrcp.f32 %v649_v1 }
 0x19e   : > { %v2257_v4 = vpop.eup %2256  ;;  %v650_v5 = vadd.f32 1.0, %v2255_v3 }
 0x19f   : > { %v676_v6 = vmul.f32 %v2257_v4, %v2574_v7 }
 0x1a0   : > { %2266 = vrcp.f32 %v650_v5 }
 0x1a1   : > { %v2259_v8 = vpop.eup %2258  ;;  %v693_v60 = vmul.f32 %v2046_v37, %v676_v6 }
 0x1a2   : > { %v2261_v9 = vpop.eup %2260  ;;  %v651_v10 = vadd.f32 1.0, %v2259_v8 }
 0x1a3   : > { %v677_v11 = vmul.f32 %v2261_v9, %v2577_v14 }
 0x1a4   : > { %2268 = vrcp.f32 %v651_v10 }
 0x1a5   : > { %v694_v12 = vmul.f32 %v2046_v37, %v677_v11 }
 0x1a6   : > { %v2263_v13 = vpop.eup %2262 }
 0x1a7   : > { %v678_v2 = vmul.f32 %v2263_v13, %v2580_v21 }
 0x1a9   : > { %v695_v15 = vmul.f32 %v2046_v37, %v678_v2 }
 0x1aa   : > { %v2265_v16 = vpop.eup %2264 }
 0x1ab   : > { %v679_v17 = vmul.f32 %v2265_v16, %v601_v28 }
 0x1ad   : > { %v2267_v18 = vpop.eup %2266  ;;  %v696_v19 = vmul.f32 %v2046_v37, %v679_v17 }
 0x1ae   : > { %v680_v20 = vmul.f32 %v2267_v18, %v606_v35 }
 0x1b0   : > { %v697_v22 = vmul.f32 %v2046_v37, %v680_v20  ;;  %702 = sbr.rel (%p2047_p4) target bundleno = 448 (0x1c0), region = 60 }
 0x1b1   : > { %v2269_v7 = vpop.eup %2268 }
 0x1b2   : > { %v681_v23 = vmul.f32 %v2269_v7, %v609_v46 }
 0x1b4   : > { %v698_v24 = vmul.f32 %v2046_v37, %v681_v23 }
 0x1b5   : > { %v2384_v25 = vmov 0  }
 0x1b6   : > { %703 = vst [vmem:[#allocation2] sm:$0xff] %v2384_v25  ;;  %704 = vst [vmem:[#allocation2 + $0x8] sm:$0xf] %v2384_v25 }
 0x1b7   : > { %705 = vst [vmem:[#allocation2 + $0xc] sm:$0xff] %v2384_v25  ;;  %706 = vst [vmem:[#allocation2 + $0x14] sm:$0xf] %v2384_v25 }
 0x1b8   : > { %707 = vst [vmem:[#allocation2 + $0x18] sm:$0xff] %v2384_v25  ;;  %708 = vst [vmem:[#allocation2 + $0x20] sm:$0xf] %v2384_v25 }
 0x1b9   : > { %709 = vst [vmem:[#allocation2 + $0x24] sm:$0xff] %v2384_v25  ;;  %710 = vst [vmem:[#allocation2 + $0x2c] sm:$0xf] %v2384_v25 }
 0x1ba   : > { %711 = vst [vmem:[#allocation2 + $0x30] sm:$0xff] %v2384_v25  ;;  %712 = vst [vmem:[#allocation2 + $0x38] sm:$0xf] %v2384_v25 }
 0x1bb   : > { %713 = vst [vmem:[#allocation2 + $0x3c] sm:$0xff] %v2384_v25  ;;  %714 = vst [vmem:[#allocation2 + $0x44] sm:$0xf] %v2384_v25 }
 0x1bc   : > { %715 = vst [vmem:[#allocation2 + $0x48] sm:$0xff] %v2384_v25  ;;  %716 = vst [vmem:[#allocation2 + $0x50] sm:$0xf] %v2384_v25 }
 0x1bd   : > { %717 = vst [vmem:[#allocation2 + $0x54] sm:$0xff] %v2384_v25  ;;  %718 = vst [vmem:[#allocation2 + $0x5c] sm:$0xf] %v2384_v25 }
 0x1be   : > { %719 = vst [vmem:[#allocation2 + $0x60] sm:$0xff] %v2384_v25  ;;  %720 = vst [vmem:[#allocation2 + $0x68] sm:$0xf] %v2384_v25 }
 0x1bf   : > { %721 = vst [vmem:[#allocation2 + $0x6c] sm:$0xff] %v2384_v25  ;;  %722 = vst [vmem:[#allocation2 + $0x74] sm:$0xf] %v2384_v25 }
 0x1c0 PF: > { %v2127_v14 = vpack.c.bf16 %v2587_v45, %v2587_v45  ;;  %v2128_v21 = vpack.c.bf16 %v2590_v54, %v2590_v54  ;;  %v2131_v26 = vpack.c.bf16 %v693_v60, %v693_v60  ;;  %v2132_v27 = vpack.c.bf16 %v694_v12, %v694_v12  ;;  %903 = vmatprep.subr.bf16.mxu1 %v2375_v0  ;;  %v2274_v35 = vld [vmem:[#allocation2 + $0x8] ss:$12 sps:$4 sm:$0xff]   ;;  %v2620_v37 = vld [vmem:[#allocation2] ss:$12 sps:$4 sm:$0xff]   ;;  %s3192_s10 = smov 106   ;;  %s2385_s29 = smov 11  }
 0x1c1   : > { %v2129_v28 = vpack.c.bf16 %v2593_v59, %v2593_v59  ;;  %v2130_v29 = vpack.c.bf16 %v2596_v55, %v2596_v55  ;;  %v2135_v30 = vpack.c.bf16 %v697_v22, %v697_v22  ;;  %v2136_v31 = vpack.c.bf16 %v698_v24, %v698_v24  ;;  %1245 = vmatprep.subr.bf16.mxu0 %v2375_v0  ;;  %v2284_v42 = vld [vmem:[#allocation2 + $0x20] ss:$12 sps:$4 sm:$0xff]   ;;  %v2660_v46 = vld [vmem:[#allocation2 + $0x18] ss:$12 sps:$4 sm:$0xff]  }
 0x1c2   : > { %763 = vst [vmem:[#allocation2 + $0x4] sm:$0xf] %v2127_v14  ;;  %764 = vst [vmem:[#allocation2 + $0x10] sm:$0xf] %v2128_v21  ;;  %v2133_v32 = vpack.c.bf16 %v695_v15, %v695_v15  ;;  %v2134_v33 = vpack.c.bf16 %v696_v19, %v696_v19  ;;  %2271 = vset.pattern.permute.xlu1 %v2375_v0  ;;  %2270 = vset.pattern.permute.xlu0 %v2375_v0  ;;  %v2283_v41 = vld [vmem:[#allocation2 + $0x38] ss:$12 sps:$4 sm:$0xff]  }
 0x1c3   : > { %767 = vst [vmem:[#allocation2 + $0x34] sm:$0xf] %v2131_v26  ;;  %768 = vst [vmem:[#allocation2 + $0x40] sm:$0xf] %v2132_v27  ;;  %v2654_v45 = vld [vmem:[#allocation2 + $0x30] ss:$12 sps:$4 sm:$0xff]  }
 0x1c4   : > { %765 = vst [vmem:[#allocation2 + $0x1c] sm:$0xf] %v2129_v28  ;;  %766 = vst [vmem:[#allocation2 + $0x28] sm:$0xf] %v2130_v29  ;;  %v2693_v50 = vld [vmem:[#allocation2 + $0x50] ss:$12 sps:$4 sm:$0xff]  }
 0x1c5   : > { %771 = vst [vmem:[#allocation2 + $0x64] sm:$0xf] %v2135_v30  ;;  %772 = vst [vmem:[#allocation2 + $0x70] sm:$0xf] %v2136_v31  ;;  %v2756_v25 = vld [vmem:[#allocation2 + $0x48] ss:$12 sps:$4 sm:$0xff]  }
 0x1c6   : > { %769 = vst [vmem:[#allocation2 + $0x4c] sm:$0xf] %v2133_v32  ;;  %770 = vst [vmem:[#allocation2 + $0x58] sm:$0xf] %v2134_v33  ;;  %v2695_v52 = vld [vmem:[#allocation2 + $0x68] ss:$12 sps:$4 sm:$0xff]  }
 0x1c7   : > { %v2739_v15 = vld [vmem:[#allocation2 + $0x60] ss:$12 sps:$4 sm:$0xff]   ;;  %vm882_vm9 = vcmask 89088   ;;  %vm2387_vm10 = vmmov 0   ;;  %vm1858_vm11 = vcmask 654336  }
 0x1c8   : > { %v2309_v31 = vld [vmem:[%s3184_s4 + $0x4] ss:$8 sps:$4 sm:$0xff]  }
 0x1c9   : > { %v2272_v34 = vld [vmem:[#allocation2 + $0x4] ss:$12 sps:$4 sm:$0xff]   ;;  %2065 = vmatprep.mubr.msk.bf16.mxu1 %vm523_vm0, %v2309_v31 }
 0x1ca   : > { %822 = vrot.lane.b32.xlu1 %v2272_v34, %s2376_s20  ;;  %827 = vrot.lane.b32.xlu0 %v2272_v34, %s2377_s21  ;;  %v2275_v36 = vld [vmem:[#allocation2 + $0x4] ss:$12 sps:$4 sm:$0xff]   ;;  %v2279_v39 = vld [vmem:[#allocation2 + $0x34] ss:$12 sps:$4 sm:$0xff]  }
 0x1cb   : > { %v2622_v38 = vld [vmem:[#allocation2 + $0x4] ss:$12 sps:$4 sm:$0xff]   ;;  %v2281_v40 = vld [vmem:[#allocation2 + $0x1c] ss:$12 sps:$4 sm:$0xff]   ;;  %v2285_v43 = vld [vmem:[#allocation2 + $0x34] ss:$12 sps:$4 sm:$0xff]  }
 0x1cc   : > { %v2652_v44 = vld [vmem:[#allocation2 + $0x34] ss:$12 sps:$4 sm:$0xff]   ;;  %v2291_v47 = vld [vmem:[#allocation2 + $0x1c] ss:$12 sps:$4 sm:$0xff]   ;;  %v2688_v49 = vld [vmem:[#allocation2 + $0x64] ss:$12 sps:$4 sm:$0xff]  }
 0x1cd   : > { %v2665_v48 = vld [vmem:[#allocation2 + $0x1c] ss:$12 sps:$4 sm:$0xff]   ;;  %v2701_v53 = vld [vmem:[#allocation2 + $0x4c] ss:$12 sps:$4 sm:$0xff]   ;;  %v2299_v12 = vld [vmem:[#allocation2 + $0x64] ss:$12 sps:$4 sm:$0xff]  }
 0x1ce   : > { %824 = vrot.lane.b32.xlu1 %v2274_v35, %s2376_s20  ;;  %829 = vrot.lane.b32.xlu0 %v2274_v35, %s2377_s21  ;;  %v2302_v18 = vld [vmem:[#allocation2 + $0x4c] ss:$12 sps:$4 sm:$0xff]   ;;  %v2745_v19 = vld [vmem:[#allocation2 + $0x64] ss:$12 sps:$4 sm:$0xff]  }
 0x1cf   : > { %v2752_v24 = vld [vmem:[#allocation2 + $0x4c] ss:$12 sps:$4 sm:$0xff]  }
 0x1d2   : > { %819 = vrot.lane.b32.xlu1 %v2274_v35, %s2378_s22  ;;  %817 = vrot.lane.b32.xlu0 %v2272_v34, %s2378_s22 }
 0x1d6   : > { %807 = vrot.lane.b32.xlu0 %v2275_v36, %s2379_s23  ;;  %797 = vrot.lane.b32.xlu1 %v2620_v37, %s2380_s24 }
 0x1da   : > { %799 = vrot.lane.b32.xlu0 %v2622_v38, %s2380_s24  ;;  %792 = vrot.lane.b32.xlu1 %v2620_v37, %s2381_s25 }
 0x1de   : > { %794 = vrot.lane.b32.xlu0 %v2622_v38, %s2381_s25  ;;  %787 = vrot.lane.b32.xlu1 %v2620_v37, %s2382_s26 }
 0x1e2   : > { %789 = vrot.lane.b32.xlu0 %v2622_v38, %s2382_s26  ;;  %832 = vrot.lane.b32.xlu1 %v2272_v34, %s3192_s10 }
 0x1e6   : > { %1169 = vrot.lane.b32.xlu1 %v2279_v39, %s2377_s21  ;;  %834 = vrot.lane.b32.xlu0 %v2274_v35, %s3192_s10 }
 0x1ea   : > { %998 = vrot.lane.b32.xlu1 %v2281_v40, %s2377_s21  ;;  %1171 = vrot.lane.b32.xlu0 %v2283_v41, %s2377_s21 }
 0x1ee   : > { %1164 = vrot.lane.b32.xlu1 %v2279_v39, %s2376_s20  ;;  %1000 = vrot.lane.b32.xlu0 %v2284_v42, %s2377_s21 }
 0x1f2   : > { %993 = vrot.lane.b32.xlu1 %v2281_v40, %s2376_s20  ;;  %1166 = vrot.lane.b32.xlu0 %v2283_v41, %s2376_s20 }
 0x1f6   : > { %1159 = vrot.lane.b32.xlu1 %v2279_v39, %s2378_s22  ;;  %995 = vrot.lane.b32.xlu0 %v2284_v42, %s2376_s20 }
 0x1fa   : > { %988 = vrot.lane.b32.xlu1 %v2281_v40, %s2378_s22  ;;  %1161 = vrot.lane.b32.xlu0 %v2283_v41, %s2378_s22 }
 0x1fe   : > { %1149 = vrot.lane.b32.xlu1 %v2285_v43, %s2379_s23  ;;  %990 = vrot.lane.b32.xlu0 %v2284_v42, %s2378_s22 }
 0x202   : > { %1141 = vrot.lane.b32.xlu1 %v2652_v44, %s2380_s24  ;;  %1139 = vrot.lane.b32.xlu0 %v2654_v45, %s2380_s24 }
 0x206   : > { %968 = vrot.lane.b32.xlu1 %v2660_v46, %s2380_s24  ;;  %978 = vrot.lane.b32.xlu0 %v2291_v47, %s2379_s23 }
 0x20a   : > { %1134 = vrot.lane.b32.xlu1 %v2654_v45, %s2381_s25  ;;  %970 = vrot.lane.b32.xlu0 %v2665_v48, %s2380_s24 }
 0x20e   : > { %963 = vrot.lane.b32.xlu1 %v2660_v46, %s2381_s25  ;;  %1136 = vrot.lane.b32.xlu0 %v2652_v44, %s2381_s25 }
 0x212   : > { %1129 = vrot.lane.b32.xlu1 %v2654_v45, %s2382_s26  ;;  %965 = vrot.lane.b32.xlu0 %v2665_v48, %s2381_s25 }
 0x216   : > { %958 = vrot.lane.b32.xlu1 %v2660_v46, %s2382_s26  ;;  %1131 = vrot.lane.b32.xlu0 %v2652_v44, %s2382_s26 }
 0x21a   : > { %1174 = vrot.lane.b32.xlu1 %v2279_v39, %s3192_s10  ;;  %960 = vrot.lane.b32.xlu0 %v2665_v48, %s2382_s26 }
 0x21e   : > { %1003 = vrot.lane.b32.xlu1 %v2281_v40, %s3192_s10  ;;  %1176 = vrot.lane.b32.xlu0 %v2283_v41, %s3192_s10 }
 0x222   : > { %1511 = vrot.lane.b32.xlu1 %v2688_v49, %s2377_s21  ;;  %1005 = vrot.lane.b32.xlu0 %v2284_v42, %s3192_s10 }
 0x226   : > { %1342 = vrot.lane.b32.xlu1 %v2693_v50, %s2377_s21  ;;  %1513 = vrot.lane.b32.xlu0 %v2695_v52, %s2377_s21 }
 0x22a   : > { %1508 = vrot.lane.b32.xlu1 %v2695_v52, %s2376_s20  ;;  %1340 = vrot.lane.b32.xlu0 %v2701_v53, %s2377_s21 }
 0x22e   : > { %1337 = vrot.lane.b32.xlu1 %v2693_v50, %s2376_s20  ;;  %1506 = vrot.lane.b32.xlu0 %v2688_v49, %s2376_s20 }
 0x232   : > { %1503 = vrot.lane.b32.xlu1 %v2695_v52, %s2378_s22  ;;  %1335 = vrot.lane.b32.xlu0 %v2701_v53, %s2376_s20 }
 0x236   : > { %1501 = vrot.lane.b32.xlu0 %v2688_v49, %s2378_s22 }
 0x23c   : > { %v823_v54 = vpop.permute.xlu1 %822  ;;  %v828_v51 = vpop.permute.xlu0 %827 }
 0x23d   : > { %874 = vrot.lane.b32.xlu1 %v828_v51, %s2385_s29 }
 0x240   : > { %v825_v56 = vpop.permute.xlu1 %824  ;;  %v830_v57 = vpop.permute.xlu0 %829 }
 0x241   : > { %870 = vrot.lane.b32.xlu1 %v823_v54, %s2385_s29  ;;  %v831_v58 = vsel %vm398_vm1, %v828_v51, %v830_v57  ;;  %v826_v62 = vsel %vm391_vm2, %v823_v54, %v825_v56 }
 0x242   : > { %876 = vrot.lane.b32.xlu0 %v831_v58, %s2385_s29 }
 0x244   : > { %v820_v59 = vpop.permute.xlu1 %819  ;;  %v818_v61 = vpop.permute.xlu0 %817 }
 0x245   : > { %866 = vrot.lane.b32.xlu1 %v818_v61, %s2385_s29  ;;  %v821_v55 = vsel %vm384_vm3, %v818_v61, %v820_v59 }
 0x246   : > { %872 = vrot.lane.b32.xlu0 %v826_v62, %s2385_s29 }
 0x248   : > { %v808_v63 = vpop.permute.xlu0 %807  ;;  %v798_v1 = vpop.permute.xlu1 %797 }
 0x249   : > { %864 = vrot.lane.b32.xlu1 %v808_v63, %s2385_s29 }
 0x24a   : > { %868 = vrot.lane.b32.xlu0 %v821_v55, %s2385_s29 }
 0x24c   : > { %v800_v3 = vpop.permute.xlu0 %799  ;;  %v793_v4 = vpop.permute.xlu1 %792 }
 0x24d   : > { %862 = vrot.lane.b32.xlu1 %v800_v3, %s2385_s29  ;;  %v801_v5 = vsel %vm370_vm5, %v798_v1, %v800_v3 }
 0x24e   : > { %860 = vrot.lane.b32.xlu0 %v801_v5, %s2385_s29 }
 0x250   : > { %v795_v6 = vpop.permute.xlu0 %794  ;;  %v788_v8 = vpop.permute.xlu1 %787 }
 0x251   : > { %858 = vrot.lane.b32.xlu1 %v795_v6, %s2385_s29  ;;  %v796_v60 = vsel %vm363_vm6, %v793_v4, %v795_v6 }
 0x252   : > { %856 = vrot.lane.b32.xlu0 %v796_v60, %s2385_s29 }
 0x254   : > { %v790_v9 = vpop.permute.xlu0 %789  ;;  %v833_v10 = vpop.permute.xlu1 %832 }
 0x255   : > { %1332 = vrot.lane.b32.xlu1 %v2693_v50, %s2378_s22  ;;  %v791_v11 = vsel %vm356_vm7, %v788_v8, %v790_v9 }
 0x256   : > { %1330 = vrot.lane.b32.xlu0 %v2701_v53, %s2378_s22 }
 0x258   : > { %v1170_v13 = vpop.permute.xlu1 %1169  ;;  %v835_v2 = vpop.permute.xlu0 %834 }
 0x259   : > { %852 = vrot.lane.b32.xlu1 %v791_v11, %s2385_s29  ;;  %v836_v28 = vsel %vm405_vm8, %v833_v10, %v835_v2 }
 0x25a   : > { %1491 = vrot.lane.b32.xlu0 %v2299_v12, %s2379_s23 }
 0x25c   : > { %v999_v16 = vpop.permute.xlu1 %998  ;;  %v1172_v17 = vpop.permute.xlu0 %1171 }
 0x25d   : > { %1481 = vrot.lane.b32.xlu1 %v2739_v15, %s2380_s24  ;;  %v1173_v32 = vsel %vm398_vm1, %v1170_v13, %v1172_v17 }
 0x25e   : > { %854 = vrot.lane.b32.xlu0 %v790_v9, %s2385_s29 }
 0x260   : > { %v1165_v20 = vpop.permute.xlu1 %1164  ;;  %v1001_v22 = vpop.permute.xlu0 %1000 }
 0x261   : > { %1320 = vrot.lane.b32.xlu1 %v2302_v18, %s2379_s23  ;;  %v1002_v39 = vsel %vm398_vm1, %v999_v16, %v1001_v22 }
 0x262   : > { %1483 = vrot.lane.b32.xlu0 %v2745_v19, %s2380_s24 }
 0x264   : > { %v994_v7 = vpop.permute.xlu1 %993  ;;  %v1167_v23 = vpop.permute.xlu0 %1166 }
 0x265   : > { %850 = vrot.lane.b32.xlu1 %v2622_v38, %s2385_s29  ;;  %v1168_v42 = vsel %vm391_vm2, %v1165_v20, %v1167_v23 }
 0x266   : > { %848 = vrot.lane.b32.xlu0 %v2620_v37, %s2385_s29 }
 0x268   : > { %v1160_v14 = vpop.permute.xlu1 %1159  ;;  %v996_v21 = vpop.permute.xlu0 %995 }
 0x269   : > { %1312 = vrot.lane.b32.xlu1 %v2752_v24, %s2380_s24  ;;  %v997_v56 = vsel %vm391_vm2, %v994_v7, %v996_v21 }
 0x26a   : > { %1310 = vrot.lane.b32.xlu0 %v2756_v25, %s2380_s24 }
 0x26c   : > { %v989_v26 = vpop.permute.xlu1 %988  ;;  %v1162_v27 = vpop.permute.xlu0 %1161 }
 0x26d   : > { %1478 = vrot.lane.b32.xlu1 %v2745_v19, %s2381_s25  ;;  %v1163_v59 = vsel %vm384_vm3, %v1160_v14, %v1162_v27  ;;  %v2312_v27 = vld [vmem:[%s3184_s4 + $0x24] ss:$8 sps:$4 sm:$0xff]  }
 0x26e   : > { %1476 = vrot.lane.b32.xlu0 %v2739_v15, %s2381_s25  ;;  %2085 = vmatprep.mubr.msk.bf16.mxu0 %vm523_vm0, %v2312_v27 }
 0x270   : > { %v1150_v29 = vpop.permute.xlu1 %1149  ;;  %v991_v30 = vpop.permute.xlu0 %990 }
 0x271   : > { %880 = vrot.lane.b32.xlu1 %v836_v28, %s2385_s29  ;;  %v992_v55 = vsel %vm384_vm3, %v989_v26, %v991_v30 }
 0x272   : > { %878 = vrot.lane.b32.xlu0 %v833_v10, %s2385_s29 }
 0x274   : > { %v1142_v33 = vpop.permute.xlu1 %1141  ;;  %v1140_v34 = vpop.permute.xlu0 %1139 }
 0x275   : > { %1219 = vrot.lane.b32.xlu1 %v1173_v32, %s2385_s29 }
 0x276   : > { %1217 = vrot.lane.b32.xlu0 %v1170_v13, %s2385_s29 }
 0x278   : > { %v969_v35 = vpop.permute.xlu1 %968  ;;  %v979_v36 = vpop.permute.xlu0 %978 }
 0x279   : > { %1307 = vrot.lane.b32.xlu1 %v2752_v24, %s2381_s25 }
 0x27a   : > { %1305 = vrot.lane.b32.xlu0 %v2756_v25, %s2381_s25 }
 0x27c   : > { %v1135_v37 = vpop.permute.xlu1 %1134  ;;  %v971_v38 = vpop.permute.xlu0 %970 }
 0x27d   : > { %1473 = vrot.lane.b32.xlu1 %v2745_v19, %s2382_s26  ;;  %v972_v60 = vsel %vm370_vm5, %v969_v35, %v971_v38 }
 0x27e   : > { %1471 = vrot.lane.b32.xlu0 %v2739_v15, %s2382_s26 }
 0x280   : > { %v964_v40 = vpop.permute.xlu1 %963  ;;  %v1137_v41 = vpop.permute.xlu0 %1136 }
 0x281   : > { %1048 = vrot.lane.b32.xlu1 %v1002_v39, %s2385_s29 }
 0x282   : > { %1046 = vrot.lane.b32.xlu0 %v999_v16, %s2385_s29 }
 0x284   : > { %v1130_v43 = vpop.permute.xlu1 %1129  ;;  %v966_v47 = vpop.permute.xlu0 %965 }
 0x285   : > { %1215 = vrot.lane.b32.xlu1 %v1168_v42, %s2385_s29  ;;  %v967_v12 = vsel %vm363_vm6, %v964_v40, %v966_v47 }
 0x286   : > { %1213 = vrot.lane.b32.xlu0 %v1165_v20, %s2385_s29 }
 0x288   : > { %v959_v54 = vpop.permute.xlu1 %958  ;;  %v1132_v51 = vpop.permute.xlu0 %1131 }
 0x289   : > { %1302 = vrot.lane.b32.xlu1 %v2752_v24, %s2382_s26  ;;  %v1133_v16 = vsel %vm356_vm7, %v1130_v43, %v1132_v51 }
 0x28a   : > { %1300 = vrot.lane.b32.xlu0 %v2756_v25, %s2382_s26 }
 0x28c   : > { %v2795_v57 = vpop.permute.xlu1 %1174  ;;  %v961_v58 = vpop.permute.xlu0 %960 }
 0x28d   : > { %1044 = vrot.lane.b32.xlu1 %v997_v56, %s2385_s29  ;;  %v962_v22 = vsel %vm356_vm7, %v959_v54, %v961_v58 }
 0x28e   : > { %1042 = vrot.lane.b32.xlu0 %v994_v7, %s2385_s29 }
 0x290   : > { %v2800_v61 = vpop.permute.xlu1 %1003  ;;  %v2802_v62 = vpop.permute.xlu0 %1176 }
 0x291   : > { %1211 = vrot.lane.b32.xlu1 %v1163_v59, %s2385_s29 }
 0x292   : > { %1209 = vrot.lane.b32.xlu0 %v1160_v14, %s2385_s29 }
 0x294   : > { %v2806_v63 = vpop.permute.xlu1 %1511  ;;  %v2808_v1 = vpop.permute.xlu0 %1005 }
 0x295   : > { %1518 = vrot.lane.b32.xlu1 %v2695_v52, %s3192_s10 }
 0x296   : > { %1516 = vrot.lane.b32.xlu0 %v2688_v49, %s3192_s10  ;;  %v1143_v49 = vsel %vm370_vm5, %v1140_v34, %v1142_v33 }
 0x298   : > { %v2815_v3 = vpop.permute.xlu1 %1342  ;;  %v2817_v4 = vpop.permute.xlu0 %1513 }
 0x299   : > { %1040 = vrot.lane.b32.xlu1 %v992_v55, %s2385_s29  ;;  %v1515_v34 = vsel %vm398_vm1, %v2806_v63, %v2817_v4  ;;  %v2307_v4 = vld [vmem:[%s3184_s4] ss:$8 sps:$4 sm:$0xff]  }
 0x29a   : > { %1038 = vrot.lane.b32.xlu0 %v989_v26, %s2385_s29 }
 0x29c   : > { %v2821_v5 = vpop.permute.xlu0 %1340  ;;  %v2825_v6 = vpop.permute.xlu1 %1508 }
 0x29d   : > { %1345 = vrot.lane.b32.xlu1 %v2701_v53, %s3192_s10 }
 0x29e   : > { %1207 = vrot.lane.b32.xlu0 %v1150_v29, %s2385_s29 }
 0x2a0   : > { %v2832_v52 = vpop.permute.xlu0 %1506  ;;  %v2834_v8 = vpop.permute.xlu1 %1337 }
 0x2a1   : > { %1203 = vrot.lane.b32.xlu1 %v1143_v49, %s2385_s29  ;;  %v1510_v42 = vsel %vm391_vm2, %v2832_v52, %v2825_v6  ;;  %v2315_v6 = vld [vmem:[%s3184_s4 + $0x14] ss:$8 sps:$4 sm:$0xff]  }
 0x2a2   : > { %1347 = vrot.lane.b32.xlu0 %v2693_v50, %s3192_s10  ;;  %v1138_v50 = vsel %vm363_vm6, %v1135_v37, %v1137_v41 }
 0x2a4   : > { %v2838_v53 = vpop.permute.xlu0 %1335  ;;  %v2842_v9 = vpop.permute.xlu1 %1503 }
 0x2a5   : > { %1036 = vrot.lane.b32.xlu1 %v979_v36, %s2385_s29  ;;  %v1339_v54 = vsel %vm391_vm2, %v2838_v53, %v2834_v8 }
 0x2a6   : > { %1205 = vrot.lane.b32.xlu0 %v1142_v33, %s2385_s29 }
 0x2a8   : > { %v2848_v10 = vpop.permute.xlu0 %1501 }
 0x2a9   : > { %1034 = vrot.lane.b32.xlu1 %v971_v38, %s2385_s29  ;;  %v1344_v38 = vsel %vm398_vm1, %v2821_v5, %v2815_v3 }
 0x2aa   : > { %1032 = vrot.lane.b32.xlu0 %v972_v60, %s2385_s29 }
 0x2ad   : > { %1201 = vrot.lane.b32.xlu1 %v1137_v41, %s2385_s29 }
 0x2ae   : > { %1199 = vrot.lane.b32.xlu0 %v1138_v50, %s2385_s29 }
 0x2af   : > { %v875_v11 = vpop.permute.xlu1 %874 }
 0x2b1   : > { %1030 = vrot.lane.b32.xlu1 %v966_v47, %s2385_s29 }
 0x2b2   : > { %1028 = vrot.lane.b32.xlu0 %v967_v12, %s2385_s29 }
 0x2b3   : > { %v871_v13 = vpop.permute.xlu1 %870 }
 0x2b4   : > { %v877_v2 = vpop.permute.xlu0 %876 }
 0x2b5   : > { %1197 = vrot.lane.b32.xlu1 %v1132_v51, %s2385_s29  ;;  %v889_v17 = vsel %vm882_vm9, %v875_v11, %v877_v2 }
 0x2b6   : > { %1195 = vrot.lane.b32.xlu0 %v1133_v16, %s2385_s29  ;;  %904 = vmatpush1.bf16.msra.mxu1 %v889_v17 }
 0x2b7   : > { %v867_v18 = vpop.permute.xlu1 %866  ;;  %905 = vmatprep.subr.bf16.mxu1 %v2375_v0 }
 0x2b8   : > { %v873_v20 = vpop.permute.xlu0 %872 }
 0x2b9   : > { %1026 = vrot.lane.b32.xlu1 %v961_v58, %s2385_s29  ;;  %v888_v7 = vsel %vm882_vm9, %v871_v13, %v873_v20  ;;  %v1505_v58 = vsel %vm384_vm3, %v2848_v10, %v2842_v9 }
 0x2ba   : > { %1024 = vrot.lane.b32.xlu0 %v962_v22, %s2385_s29  ;;  %906 = vmatpush1.bf16.msra.mxu1 %v888_v7 }
 0x2bb   : > { %v865_v23 = vpop.permute.xlu1 %864  ;;  %907 = vmatprep.subr.bf16.mxu1 %v2375_v0 }
 0x2bc   : > { %v869_v14 = vpop.permute.xlu0 %868 }
 0x2bd   : > { %1193 = vrot.lane.b32.xlu1 %v2652_v44, %s2385_s29  ;;  %v887_v21 = vsel %vm882_vm9, %v867_v18, %v869_v14 }
 0x2be   : > { %1191 = vrot.lane.b32.xlu0 %v2654_v45, %s2385_s29  ;;  %908 = vmatpush1.bf16.msra.mxu1 %v887_v21  ;;  %v1178_v45 = vsel %vm405_vm8, %v2795_v57, %v2802_v62 }
 0x2bf   : > { %v863_v26 = vpop.permute.xlu1 %862  ;;  %909 = vmatprep.subr.bf16.mxu1 %v2375_v0 }
 0x2c0   : > { %v861_v28 = vpop.permute.xlu0 %860 }
 0x2c1   : > { %1022 = vrot.lane.b32.xlu1 %v2665_v48, %s2385_s29  ;;  %v886_v30 = vsel %vm882_vm9, %v861_v28, %v863_v26 }
 0x2c2   : > { %1020 = vrot.lane.b32.xlu0 %v2660_v46, %s2385_s29  ;;  %910 = vmatpush1.bf16.msra.mxu1 %v865_v23  ;;  %v1007_v46 = vsel %vm405_vm8, %v2800_v61, %v2808_v1 }
 0x2c3   : > { %v859_v44 = vpop.permute.xlu1 %858  ;;  %911 = vmatprep.subr.bf16.mxu1 %v2375_v0 }
 0x2c4   : > { %v857_v29 = vpop.permute.xlu0 %856 }
 0x2c5   : > { %1223 = vrot.lane.b32.xlu1 %v1178_v45, %s2385_s29  ;;  %v885_v32 = vsel %vm882_vm9, %v857_v29, %v859_v44 }
 0x2c6   : > { %1221 = vrot.lane.b32.xlu0 %v2795_v57, %s2385_s29  ;;  %912 = vmatpush1.bf16.msra.mxu1 %v886_v30 }
 0x2c7   : > { %v1333_v48 = vpop.permute.xlu1 %1332  ;;  %913 = vmatprep.subr.bf16.mxu1 %v2375_v0 }
 0x2c8   : > { %v1331_v31 = vpop.permute.xlu0 %1330 }
 0x2c9   : > { %1052 = vrot.lane.b32.xlu1 %v1007_v46, %s2385_s29  ;;  %v1334_v62 = vsel %vm384_vm3, %v1331_v31, %v1333_v48  ;;  %v1635_v46 = vld [vmem:[%s3186_s6 + $0x40] sm:$0xff] }
 0x2ca   : > { %1050 = vrot.lane.b32.xlu0 %v2800_v61, %s2385_s29  ;;  %914 = vmatpush1.bf16.msra.mxu1 %v885_v32 }
 0x2cb   : > { %v853_v33 = vpop.permute.xlu1 %852  ;;  %915 = vmatprep.subr.bf16.mxu1 %v2375_v0 }
 0x2cc   : > { %v1492_v35 = vpop.permute.xlu0 %1491 }
 0x2cd   : > { %1560 = vrot.lane.b32.xlu1 %v1515_v34, %s2385_s29  ;;  %v1634_v34 = vld [vmem:[%s3186_s6 + $0x38] sm:$0xff] }
 0x2ce   : > { %1558 = vrot.lane.b32.xlu0 %v2806_v63, %s2385_s29 }
 0x2cf   : > { %v1482_v36 = vpop.permute.xlu1 %1481 }
 0x2d0   : > { %v855_v37 = vpop.permute.xlu0 %854 }
 0x2d1   : > { %1390 = vrot.lane.b32.xlu1 %v1344_v38, %s2385_s29  ;;  %v884_v39 = vsel %vm882_vm9, %v853_v33, %v855_v37 }
 0x2d2   : > { %1388 = vrot.lane.b32.xlu0 %v2821_v5, %s2385_s29  ;;  %916 = vmatpush1.bf16.msra.mxu1 %v884_v39  ;;  %v1632_v39 = vld [vmem:[%s3186_s6 + $0x28] sm:$0xff] }
 0x2d3   : > { %v1321_v40 = vpop.permute.xlu1 %1320  ;;  %917 = vmatprep.subr.bf16.mxu1 %v2375_v0 }
 0x2d4   : > { %v1484_v41 = vpop.permute.xlu0 %1483 }
 0x2d5   : > { %1556 = vrot.lane.b32.xlu1 %v1510_v42, %s2385_s29  ;;  %v1485_v55 = vsel %vm370_vm5, %v1482_v36, %v1484_v41  ;;  %v1636_v36 = vld [vmem:[%s3186_s6 + $0x48] sm:$0xff] }
 0x2d6   : > { %1554 = vrot.lane.b32.xlu0 %v2832_v52, %s2385_s29 }
 0x2d7   : > { %v851_v43 = vpop.permute.xlu1 %850 }
 0x2d8   : > { %v849_v47 = vpop.permute.xlu0 %848 }
 0x2d9   : > { %1386 = vrot.lane.b32.xlu1 %v1339_v54, %s2385_s29  ;;  %v883_v51 = vsel %vm882_vm9, %v849_v47, %v851_v43  ;;  %v1630_v47 = vld [vmem:[%s3186_s6 + $0x18] sm:$0xff] }
 0x2da   : > { %1384 = vrot.lane.b32.xlu0 %v2838_v53, %s2385_s29  ;;  %918 = vmatpush1.bf16.msra.mxu1 %v883_v51  ;;  %v1631_v51 = vld [vmem:[%s3186_s6 + $0x20] sm:$0xff] }
 0x2db   : > { %v1313_v56 = vpop.permute.xlu1 %1312  ;;  %933 = vmatprep.subr.bf16.mxu1 %v2375_v0 }
 0x2dc   : > { %v1311_v57 = vpop.permute.xlu0 %1310 }
 0x2dd   : > { %1552 = vrot.lane.b32.xlu1 %v1505_v58, %s2385_s29  ;;  %v1314_v60 = vsel %vm370_vm5, %v1311_v57, %v1313_v56  ;;  %v1628_v58 = vld [vmem:[%s3186_s6 + $0x8] sm:$0xff] }
 0x2de   : > { %1550 = vrot.lane.b32.xlu0 %v2848_v10, %s2385_s29 }
 0x2df   : > { %v1479_v59 = vpop.permute.xlu1 %1478 }
 0x2e0   : > { %v1477_v61 = vpop.permute.xlu0 %1476 }
 0x2e1   : > { %1382 = vrot.lane.b32.xlu1 %v1334_v62, %s2385_s29  ;;  %v1480_v10 = vsel %vm363_vm6, %v1477_v61, %v1479_v59  ;;  %v1629_v61 = vld [vmem:[%s3186_s6 + $0x10] sm:$0xff] }
 0x2e2   : > { %1380 = vrot.lane.b32.xlu0 %v1331_v31, %s2385_s29 }
 0x2e3   : > { %v881_v63 = vpop.permute.xlu1 %880 }
 0x2e4   : > { %v879_v1 = vpop.permute.xlu0 %878 }
 0x2e5   : > { %1544 = vrot.lane.b32.xlu1 %v1485_v55, %s2385_s29  ;;  %v890_v3 = vsel %vm882_vm9, %v879_v1, %v881_v63  ;;  %v1782_v1 = vld [vmem:[%s3188_s8 + $0x8] sm:$0xff] }
 0x2e6   : > { %1548 = vrot.lane.b32.xlu0 %v1492_v35, %s2385_s29  ;;  %934 = vmatpush2.bf16.msra.mxu1 %v890_v3  ;;  %v1627_v3 = vld [vmem:[%s3186_s6] sm:$0xff] }
 0x2e7   : > { %v1220_v5 = vpop.permute.xlu1 %1219  ;;  %1074 = vmatprep.subr.bf16.mxu1 %v2375_v0 }
 0x2e8   : > { %v1218_v49 = vpop.permute.xlu0 %1217 }
 0x2e9   : > { %1378 = vrot.lane.b32.xlu1 %v1321_v40, %s2385_s29  ;;  %v1231_v52 = vsel %vm882_vm9, %v1218_v49, %v1220_v5  ;;  %936 = vmatmul.mubr.bf16.vlgmr.msra.gmra.mxu1 %v2307_v4 }
 0x2ea   : > { %1546 = vrot.lane.b32.xlu0 %v1484_v41, %s2385_s29  ;;  %1246 = vmatpush1.bf16.msra.mxu0 %v1231_v52  ;;  %v1633_v41 = vld [vmem:[%s3186_s6 + $0x30] sm:$0xff]  ;;  %v1781_v52 = vld [vmem:[%s3188_s8] sm:$0xff] }
 0x2eb   : > { %v1308_v8 = vpop.permute.xlu1 %1307  ;;  %1247 = vmatprep.subr.bf16.mxu0 %v2375_v0  ;;  %2075 = vmatprep.mubr.msk.bf16.mxu1 %vm523_vm0, %v2315_v6  ;;  %v1784_v6 = vld [vmem:[%s3188_s8 + $0x18] sm:$0xff] }
 0x2ec   : > { %v1306_v53 = vpop.permute.xlu0 %1305 }
 0x2ed   : > { %1376 = vrot.lane.b32.xlu1 %v1313_v56, %s2385_s29  ;;  %v1309_v13 = vsel %vm363_vm6, %v1306_v53, %v1308_v8 }
 0x2ee   : > { %1374 = vrot.lane.b32.xlu0 %v1314_v60, %s2385_s29  ;;  %v1786_v60 = vld [vmem:[%s3188_s8 + $0x28] sm:$0xff] }
 0x2ef   : > { %v1474_v9 = vpop.permute.xlu1 %1473 }
 0x2f0   : > { %v1472_v50 = vpop.permute.xlu0 %1471 }
 0x2f1   : > { %1542 = vrot.lane.b32.xlu1 %v1479_v59, %s2385_s29  ;;  %v1475_v18 = vsel %vm356_vm7, %v1472_v50, %v1474_v9  ;;  %v1783_v50 = vld [vmem:[%s3188_s8 + $0x10] sm:$0xff] }
 0x2f2   : > { %1540 = vrot.lane.b32.xlu0 %v1480_v10, %s2385_s29 }
 0x2f3   : > { %v1049_v11 = vpop.permute.xlu1 %1048 }
 0x2f4   : > { %v1047_v12 = vpop.permute.xlu0 %1046 }
 0x2f5   : > { %v1060_v2 = vsel %vm882_vm9, %v1047_v12, %v1049_v11  ;;  %1372 = vrot.lane.b32.xlu1 %v1308_v8, %s2385_s29  ;;  %v1788_v12 = vld [vmem:[%s3188_s8 + $0x38] sm:$0xff] }
 0x2f6   : > { %1370 = vrot.lane.b32.xlu0 %v1309_v13, %s2385_s29  ;;  %1075 = vmatpush1.bf16.msra.mxu1 %v1060_v2  ;;  %v1785_v2 = vld [vmem:[%s3188_s8 + $0x20] sm:$0xff] }
 0x2f7   : > { %v1216_v16 = vpop.permute.xlu1 %1215  ;;  %1076 = vmatprep.subr.bf16.mxu1 %v2375_v0 }
 0x2f8   : > { %v1214_v17 = vpop.permute.xlu0 %1213 }
 0x2f9   : > { %1538 = vrot.lane.b32.xlu1 %v1474_v9, %s2385_s29  ;;  %v1230_v20 = vsel %vm882_vm9, %v1214_v17, %v1216_v16 }
 0x2fa   : > { %1536 = vrot.lane.b32.xlu0 %v1475_v18, %s2385_s29  ;;  %1248 = vmatpush1.bf16.msra.mxu0 %v1230_v20  ;;  %v1787_v20 = vld [vmem:[%s3188_s8 + $0x30] sm:$0xff] }
 0x2fb   : > { %v1303_v22 = vpop.permute.xlu1 %1302  ;;  %1249 = vmatprep.subr.bf16.mxu0 %v2375_v0 }
 0x2fc   : > { %v1301_v7 = vpop.permute.xlu0 %1300 }
 0x2fd   : > { %v1304_v23 = vsel %vm356_vm7, %v1301_v7, %v1303_v22  ;;  %1368 = vrot.lane.b32.xlu1 %v1303_v22, %s2385_s29 }
 0x2fe   : > { %1366 = vrot.lane.b32.xlu0 %v1304_v23, %s2385_s29  ;;  %v2310_v23 = vld [vmem:[%s3184_s4 + $0x20] ss:$8 sps:$4 sm:$0xff]  }
 0x2ff   : > { %v1045_v14 = vpop.permute.xlu1 %1044 }
 0x300   : > { %v1043_v21 = vpop.permute.xlu0 %1042 }
 0x301   : > { %v1059_v26 = vsel %vm882_vm9, %v1043_v21, %v1045_v14  ;;  %1534 = vrot.lane.b32.xlu1 %v2745_v19, %s2385_s29  ;;  %v2318_v14 = vld [vmem:[%s3185_s5 + $0x4] ss:$8 sps:$4 sm:$0xff]  }
 0x302   : > { %1532 = vrot.lane.b32.xlu0 %v2739_v15, %s2385_s29  ;;  %1077 = vmatpush1.bf16.msra.mxu1 %v1059_v26 }
 0x303   : > { %v1212_v27 = vpop.permute.xlu1 %1211  ;;  %1078 = vmatprep.subr.bf16.mxu1 %v2375_v0 }
 0x304   : > { %v1210_v28 = vpop.permute.xlu0 %1209 }
 0x305   : > { %1364 = vrot.lane.b32.xlu1 %v2752_v24, %s2385_s29  ;;  %v1229_v44 = vsel %vm882_vm9, %v1210_v28, %v1212_v27  ;;  %v1789_v27 = vld [vmem:[%s3188_s8 + $0x40] sm:$0xff] }
 0x306   : > { %1362 = vrot.lane.b32.xlu0 %v2756_v25, %s2385_s29  ;;  %1250 = vmatpush1.bf16.msra.mxu0 %v1229_v44  ;;  %v2313_v44 = vld [vmem:[%s3184_s4 + $0x10] ss:$8 sps:$4 sm:$0xff]  }
 0x307   : > { %v1519_v45 = vpop.permute.xlu1 %1518  ;;  %1251 = vmatprep.subr.bf16.mxu0 %v2375_v0 }
 0x308   : > { %v1517_v19 = vpop.permute.xlu0 %1516 }
 0x309   : > { %v1520_v15 = vsel %vm405_vm8, %v1517_v19, %v1519_v45  ;;  %v2321_v45 = vld [vmem:[%s3184_s4 + $0x34] ss:$8 sps:$4 sm:$0xff]  }
 0x30a   : > { %1562 = vrot.lane.b32.xlu0 %v1517_v19, %s2385_s29  ;;  %1564 = vrot.lane.b32.xlu1 %v1520_v15, %s2385_s29 }
 0x30b   : > { %v1041_v29 = vpop.permute.xlu1 %1040 }
 0x30c   : > { %v1039_v30 = vpop.permute.xlu0 %1038 }
 0x30d   : > { %v1058_v24 = vsel %vm882_vm9, %v1039_v30, %v1041_v29 }
 0x30e   : > { %1079 = vmatpush1.bf16.msra.mxu1 %v1058_v24 }
 0x30f   : > { %v1346_v48 = vpop.permute.xlu1 %1345  ;;  %1080 = vmatprep.subr.bf16.mxu1 %v2375_v0 }
 0x310   : > { %v1208_v25 = vpop.permute.xlu0 %1207  ;;  %1392 = vrot.lane.b32.xlu0 %v1346_v48, %s2385_s29 }
 0x311   : > { %1252 = vmatpush1.bf16.msra.mxu0 %v1208_v25 }
 0x312   : > { %1253 = vmatprep.subr.bf16.mxu0 %v2375_v0 }
 0x313   : > { %v1204_v31 = vpop.permute.xlu1 %1203 }
 0x314   : > { %v1348_v32 = vpop.permute.xlu0 %1347  ;;  %1679 = vperm.xlu0 %2270, %v1635_v46  }
 0x315   : > { %v1349_v33 = vsel %vm405_vm8, %v1346_v48, %v1348_v32 }
 0x316   : > { %1394 = vrot.lane.b32.xlu1 %v1349_v33, %s2385_s29 }
 0x317   : > { %v1037_v35 = vpop.permute.xlu1 %1036 }
 0x318   : > { %v1206_v37 = vpop.permute.xlu0 %1205  ;;  %1081 = vmatpush1.bf16.msra.mxu1 %v1037_v35  ;;  %1674 = vperm.xlu0 %2270, %v1634_v34  }
 0x319   : > { %v1228_v38 = vsel %vm882_vm9, %v1204_v31, %v1206_v37  ;;  %1082 = vmatprep.subr.bf16.mxu1 %v2375_v0 }
 0x31a   : > { %1254 = vmatpush1.bf16.msra.mxu0 %v1228_v38  ;;  %1684 = vperm.xlu1 %2271, %v1636_v36  }
 0x31b   : > { %v1035_v40 = vpop.permute.xlu1 %1034  ;;  %1255 = vmatprep.subr.bf16.mxu0 %v2375_v0 }
 0x31c   : > { %v1033_v42 = vpop.permute.xlu0 %1032  ;;  %1664 = vperm.xlu0 %2270, %v1632_v39  }
 0x31d   : > { %v1057_v43 = vsel %vm882_vm9, %v1033_v42, %v1035_v40 }
 0x31e   : > { %1083 = vmatpush1.bf16.msra.mxu1 %v1057_v43  ;;  %1669 = vperm.xlu1 %2271, %v1633_v41  }
 0x31f   : > { %v1202_v54 = vpop.permute.xlu1 %1201  ;;  %1084 = vmatprep.subr.bf16.mxu1 %v2375_v0 }
 0x320   : > { %v1200_v56 = vpop.permute.xlu0 %1199  ;;  %1654 = vperm.xlu0 %2270, %v1630_v47  }
 0x321   : > { %v1227_v57 = vsel %vm882_vm9, %v1200_v56, %v1202_v54 }
 0x322   : > { %1256 = vmatpush1.bf16.msra.mxu0 %v1227_v57  ;;  %1659 = vperm.xlu1 %2271, %v1631_v51  }
 0x323   : > { %v1031_v59 = vpop.permute.xlu1 %1030  ;;  %1257 = vmatprep.subr.bf16.mxu0 %v2375_v0 }
 0x324   : > { %v1029_v62 = vpop.permute.xlu0 %1028  ;;  %1644 = vperm.xlu0 %2270, %v1628_v58  }
 0x325   : > { %v1056_v63 = vsel %vm882_vm9, %v1029_v62, %v1031_v59 }
 0x326   : > { %1085 = vmatpush1.bf16.msra.mxu1 %v1056_v63  ;;  %1649 = vperm.xlu1 %2271, %v1629_v61  }
 0x327   : > { %v1198_v55 = vpop.permute.xlu1 %1197  ;;  %1086 = vmatprep.subr.bf16.mxu1 %v2375_v0 }
 0x328   : > { %v1196_v4 = vpop.permute.xlu0 %1195  ;;  %1797 = vperm.xlu0 %2270, %v1782_v1  }
 0x329   : > { %v1226_v5 = vsel %vm882_vm9, %v1196_v4, %v1198_v55 }
 0x32a   : > { %1258 = vmatpush1.bf16.msra.mxu0 %v1226_v5  ;;  %1639 = vperm.xlu1 %2271, %v1627_v3  }
 0x32b   : > { %v1027_v49 = vpop.permute.xlu1 %1026  ;;  %1259 = vmatprep.subr.bf16.mxu0 %v2375_v0 }
 0x32c   : > { %v1025_v8 = vpop.permute.xlu0 %1024  ;;  %1807 = vperm.xlu0 %2270, %v1784_v6  }
 0x32d   : > { %v1055_v53 = vsel %vm882_vm9, %v1025_v8, %v1027_v49 }
 0x32e   : > { %1087 = vmatpush1.bf16.msra.mxu1 %v1055_v53  ;;  %1792 = vperm.xlu1 %2271, %v1781_v52  }
 0x32f   : > { %v1194_v9 = vpop.permute.xlu1 %1193  ;;  %1088 = vmatprep.subr.bf16.mxu1 %v2375_v0 }
 0x330   : > { %v1192_v10 = vpop.permute.xlu0 %1191  ;;  %1817 = vperm.xlu0 %2270, %v1786_v60  }
 0x331   : > { %v1225_v11 = vsel %vm882_vm9, %v1192_v10, %v1194_v9 }
 0x332   : > { %1260 = vmatpush1.bf16.msra.mxu0 %v1225_v11  ;;  %1802 = vperm.xlu1 %2271, %v1783_v50  }
 0x333   : > { %v1023_v13 = vpop.permute.xlu1 %1022  ;;  %1275 = vmatprep.subr.bf16.mxu0 %v2375_v0 }
 0x334   : > { %v1021_v16 = vpop.permute.xlu0 %1020  ;;  %1827 = vperm.xlu0 %2270, %v1788_v12  }
 0x335   : > { %v1054_v17 = vsel %vm882_vm9, %v1021_v16, %v1023_v13  ;;  %v2316_v13 = vld [vmem:[%s3185_s5] ss:$8 sps:$4 sm:$0xff]  }
 0x336   : > { %1089 = vmatpush1.bf16.msra.mxu1 %v1054_v17  ;;  %1812 = vperm.xlu1 %2271, %v1785_v2  }
 0x337   : > { %v1224_v18 = vpop.permute.xlu1 %1223  ;;  %1104 = vmatprep.subr.bf16.mxu1 %v2375_v0 }
 0x338   : > { %v1222_v22 = vpop.permute.xlu0 %1221 }
 0x339   : > { %v1232_v7 = vsel %vm882_vm9, %v1222_v22, %v1224_v18  ;;  %v2319_v18 = vld [vmem:[%s3184_s4 + $0x30] ss:$8 sps:$4 sm:$0xff]  }
 0x33a   : > { %1276 = vmatpush2.bf16.msra.mxu0 %v1232_v7  ;;  %1822 = vperm.xlu1 %2271, %v1787_v20  }
 0x33b   : > { %v1053_v21 = vpop.permute.xlu1 %1052  ;;  %1586 = vmatprep.subr.bf16.mxu0 %v2375_v0 }
 0x33c   : > { %v1051_v26 = vpop.permute.xlu0 %1050 }
 0x33d   : > { %v1061_v28 = vsel %vm882_vm9, %v1051_v26, %v1053_v21  ;;  %1278 = vmatmul.mubr.bf16.vlgmr.msra.gmra.mxu0 %v2310_v23 }
 0x33e   : > { %1105 = vmatpush2.bf16.msra.mxu1 %v1061_v28  ;;  %2103 = vmatprep.mubr.msk.bf16.mxu0 %vm523_vm0, %v2318_v14 }
 0x33f   : > { %v1561_v19 = vpop.permute.xlu1 %1560  ;;  %1416 = vmatprep.subr.bf16.mxu1 %v2375_v0  ;;  %1832 = vperm.xlu1 %2271, %v1789_v27  }
 0x340   : > { %v1559_v15 = vpop.permute.xlu0 %1558 }
 0x341   : > { %v1572_v29 = vsel %vm882_vm9, %v1559_v15, %v1561_v19  ;;  %1107 = vmatmul.mubr.bf16.vlgmr.msra.gmra.mxu1 %v2313_v44 }
 0x342   : > { %1587 = vmatpush1.bf16.msra.mxu0 %v1572_v29  ;;  %2095 = vmatprep.mubr.msk.bf16.mxu1 %vm523_vm0, %v2321_v45 }
 0x343   : > { %v1391_v30 = vpop.permute.xlu1 %1390  ;;  %1588 = vmatprep.subr.bf16.mxu0 %v2375_v0 }
 0x344   : > { %v1389_v24 = vpop.permute.xlu0 %1388 }
 0x345   : > { %v1402_v48 = vsel %vm882_vm9, %v1389_v24, %v1391_v30 }
 0x346   : > { %1417 = vmatpush1.bf16.msra.mxu1 %v1402_v48 }
 0x347   : > { %v1557_v25 = vpop.permute.xlu1 %1556  ;;  %1418 = vmatprep.subr.bf16.mxu1 %v2375_v0 }
 0x348   : > { %v1555_v46 = vpop.permute.xlu0 %1554 }
 0x349   : > { %v1571_v31 = vsel %vm882_vm9, %v1555_v46, %v1557_v25 }
 0x34a   : > { %1589 = vmatpush1.bf16.msra.mxu0 %v1571_v31 }
 0x34b   : > { %v1387_v32 = vpop.permute.xlu1 %1386  ;;  %1590 = vmatprep.subr.bf16.mxu0 %v2375_v0 }
 0x34c   : > { %v1385_v33 = vpop.permute.xlu0 %1384 }
 0x34d   : > { %v1401_v34 = vsel %vm882_vm9, %v1385_v33, %v1387_v32 }
 0x34e   : > { %1419 = vmatpush1.bf16.msra.mxu1 %v1401_v34 }
 0x34f   : > { %v1553_v35 = vpop.permute.xlu1 %1552  ;;  %1420 = vmatprep.subr.bf16.mxu1 %v2375_v0 }
 0x350   : > { %v1551_v36 = vpop.permute.xlu0 %1550 }
 0x351   : > { %v1570_v37 = vsel %vm882_vm9, %v1551_v36, %v1553_v35 }
 0x352   : > { %1591 = vmatpush1.bf16.msra.mxu0 %v1570_v37 }
 0x353   : > { %v1383_v38 = vpop.permute.xlu1 %1382  ;;  %1592 = vmatprep.subr.bf16.mxu0 %v2375_v0 }
 0x354   : > { %v1381_v39 = vpop.permute.xlu0 %1380 }
 0x355   : > { %v1400_v40 = vsel %vm882_vm9, %v1381_v39, %v1383_v38  ;;  %v2386_v38 = vmov 0.0  }
 0x356   : > { %1421 = vmatpush1.bf16.msra.mxu1 %v1400_v40 }
 0x357   : > { %v1545_v41 = vpop.permute.xlu1 %1544  ;;  %1422 = vmatprep.subr.bf16.mxu1 %v2375_v0 }
 0x358   : > { %v1549_v42 = vpop.permute.xlu0 %1548 }
 0x359   : > { %1593 = vmatpush1.bf16.msra.mxu0 %v1549_v42 }
 0x35a   : > { %1594 = vmatprep.subr.bf16.mxu0 %v2375_v0 }
 0x35b   : > { %v1379_v43 = vpop.permute.xlu1 %1378 }
 0x35c   : > { %v1547_v47 = vpop.permute.xlu0 %1546  ;;  %1423 = vmatpush1.bf16.msra.mxu1 %v1379_v43 }
 0x35d   : > { %v1569_v54 = vsel %vm882_vm9, %v1545_v41, %v1547_v47  ;;  %1424 = vmatprep.subr.bf16.mxu1 %v2375_v0 }
 0x35e   : > { %1595 = vmatpush1.bf16.msra.mxu0 %v1569_v54 }
 0x35f   : > { %v1377_v51 = vpop.permute.xlu1 %1376  ;;  %1596 = vmatprep.subr.bf16.mxu0 %v2375_v0 }
 0x360   : > { %v1375_v56 = vpop.permute.xlu0 %1374 }
 0x361   : > { %v1399_v57 = vsel %vm882_vm9, %v1375_v56, %v1377_v51 }
 0x362   : > { %1425 = vmatpush1.bf16.msra.mxu1 %v1399_v57 }
 0x363   : > { %v1543_v58 = vpop.permute.xlu1 %1542  ;;  %1426 = vmatprep.subr.bf16.mxu1 %v2375_v0 }
 0x364   : > { %v1541_v59 = vpop.permute.xlu0 %1540 }
 0x365   : > { %v1568_v61 = vsel %vm882_vm9, %v1541_v59, %v1543_v58 }
 0x366   : > { %1597 = vmatpush1.bf16.msra.mxu0 %v1568_v61 }
 0x367   : > { %v1373_v62 = vpop.permute.xlu1 %1372  ;;  %1598 = vmatprep.subr.bf16.mxu0 %v2375_v0 }
 0x368   : > { %v1371_v63 = vpop.permute.xlu0 %1370 }
 0x369   : > { %v1398_v1 = vsel %vm882_vm9, %v1371_v63, %v1373_v62 }
 0x36a   : > { %1427 = vmatpush1.bf16.msra.mxu1 %v1398_v1 }
 0x36b   : > { %v1539_v55 = vpop.permute.xlu1 %1538  ;;  %1428 = vmatprep.subr.bf16.mxu1 %v2375_v0 }
 0x36c   : > { %v1537_v3 = vpop.permute.xlu0 %1536 }
 0x36d   : > { %v1567_v4 = vsel %vm882_vm9, %v1537_v3, %v1539_v55 }
 0x36e   : > { %1599 = vmatpush1.bf16.msra.mxu0 %v1567_v4 }
 0x36f   : > { %v1369_v5 = vpop.permute.xlu1 %1368  ;;  %1600 = vmatprep.subr.bf16.mxu0 %v2375_v0 }
 0x370   : > { %v1367_v6 = vpop.permute.xlu0 %1366 }
 0x371   : > { %v1397_v49 = vsel %vm882_vm9, %v1367_v6, %v1369_v5 }
 0x372   : > { %1429 = vmatpush1.bf16.msra.mxu1 %v1397_v49 }
 0x373   : > { %v1535_v52 = vpop.permute.xlu1 %1534  ;;  %1430 = vmatprep.subr.bf16.mxu1 %v2375_v0 }
 0x374   : > { %v1533_v8 = vpop.permute.xlu0 %1532 }
 0x375   : > { %v1566_v53 = vsel %vm882_vm9, %v1533_v8, %v1535_v52 }
 0x376   : > { %1601 = vmatpush1.bf16.msra.mxu0 %v1566_v53 }
 0x377   : > { %v1365_v60 = vpop.permute.xlu1 %1364  ;;  %1616 = vmatprep.subr.bf16.mxu0 %v2375_v0 }
 0x378   : > { %v1363_v9 = vpop.permute.xlu0 %1362 }
 0x379   : > { %v1396_v50 = vsel %vm882_vm9, %v1363_v9, %v1365_v60 }
 0x37a   : > { %1431 = vmatpush1.bf16.msra.mxu1 %v1396_v50 }
 0x37b   : > { %1446 = vmatprep.subr.bf16.mxu1 %v2375_v0 }
 0x37c   : > { %v1563_v10 = vpop.permute.xlu0 %1562  ;;  %v1565_v11 = vpop.permute.xlu1 %1564 }
 0x37d   : > { %v1573_v12 = vsel %vm882_vm9, %v1563_v10, %v1565_v11 }
 0x37e   : > { %1617 = vmatpush2.bf16.msra.mxu0 %v1573_v12 }
 0x37f   : > { %2147 = vmatprep.subr.bf16.mxu0 %v2386_v38 }
 0x381   : > { %1619 = vmatmul.mubr.bf16.vlgmr.msra.gmra.mxu0 %v2316_v13 }
 0x382   : > { %v1393_v2 = vpop.permute.xlu0 %1392  ;;  %2157 = vmatprep.mubr.msk.bf16.mxu0 %vm2387_vm10, %v2386_v38 }
 0x388   : > { %v1395_v16 = vpop.permute.xlu1 %1394 }
 0x389   : > { %v1403_v17 = vsel %vm882_vm9, %v1393_v2, %v1395_v16 }
 0x38a   : > { %1447 = vmatpush2.bf16.msra.mxu1 %v1403_v17 }
 0x38b   : > { %2177 = vmatprep.subr.bf16.mxu1 %v2386_v38 }
 0x38d   : > { %1449 = vmatmul.mubr.bf16.vlgmr.msra.gmra.mxu1 %v2319_v18 }
 0x38e   : > { %2165 = vmatprep.mubr.msk.bf16.mxu1 %vm2387_vm10, %v2386_v38 }
 0x38f   : > { %v3117_v0 = vpop.permute.xlu0 %1679 }
 0x393   : > { %v3121_v22 = vpop.permute.xlu0 %1674 }
 0x395   : > { %v3119_v20 = vpop.permute.xlu1 %1684 }
 0x397   : > { %v1665_v14 = vpop.permute.xlu0 %1664 }
 0x399   : > { %v3123_v7 = vpop.permute.xlu1 %1669 }
 0x39b   : > { %v1655_v26 = vpop.permute.xlu0 %1654 }
 0x39d   : > { %v1660_v23 = vpop.permute.xlu1 %1659 }
 0x39f   : > { %v1645_v19 = vpop.permute.xlu0 %1644 }
 0x3a1   : > { %v1650_v21 = vpop.permute.xlu1 %1649 }
 0x3a5   : > { %v1640_v27 = vpop.permute.xlu1 %1639 }
 0x3a9   : > { %v937_v28 = vpop.f32.mrf.mxu1 }
 0x3aa   : > { %v1687_v44 = vadd.f32 %v1640_v27, %v937_v28 }
 0x3ab   : > { %v939_v45 = vpop.f32.mrf.mxu1 }
 0x3ac   : > { %v2104_v15 = vmul.f32 -1.442695, %v1687_v44 }
 0x3ad   : > { %v940_v29 = vpop.f32.mrf.mxu1 }
 0x3ae   : > { %v1688_v30 = vadd.f32 %v1645_v19, %v940_v29  ;;  %2327 = vpow2.f32 %v2104_v15 }
 0x3af   : > { %v942_v24 = vpop.f32.mrf.mxu1 }
 0x3b0   : > { %v2105_v48 = vmul.f32 -1.442695, %v1688_v30 }
 0x3b2   : > { %2329 = vpow2.f32 %v2105_v48 }
 0x3bb   : > { %v2328_v25 = vpop.eup %2327 }
 0x3bc   : > { %v1727_v46 = vadd.f32 1.0, %v2328_v25 }
 0x3be   : > { %2331 = vrcp.f32 %v1727_v46 }
 0x3bf   : > { %v2330_v31 = vpop.eup %2329 }
 0x3c0   : > { %v1728_v32 = vadd.f32 1.0, %v2330_v31 }
 0x3c2   : > { %2333 = vrcp.f32 %v1728_v32 }
 0x3cb   : > { %v2332_v33 = vpop.eup %2331 }
 0x3cc   : > { %v1757_v34 = vmul.f32 %v2332_v33, %v1687_v44 }
 0x3cf   : > { %v2334_v35 = vpop.eup %2333 }
 0x3d0   : > { %v1758_v36 = vmul.f32 %v2334_v35, %v1688_v30 }
 0x3d2   : > { %v3125_v37 = vpack.c.bf16 %v1758_v36, %v1757_v34 }
 0x3fd   : > { %v1279_v39 = vpop.f32.mrf.mxu0 }
 0x3fe   : > { %v1691_v40 = vadd.f32 %v1660_v23, %v1279_v39 }
 0x3ff   : > { %v1281_v41 = vpop.f32.mrf.mxu0 }
 0x400   : > { %v2108_v42 = vmul.f32 -1.442695, %v1691_v40 }
 0x401   : > { %v1108_v43 = vpop.f32.mrf.mxu1  ;;  %v1282_v47 = vpop.f32.mrf.mxu0 }
 0x402   : > { %2335 = vpow2.f32 %v2108_v42  ;;  %v1689_v54 = vadd.f32 %v1650_v21, %v1108_v43  ;;  %v1692_v51 = vadd.f32 %v1665_v14, %v1282_v47 }
 0x403   : > { %v1110_v56 = vpop.f32.mrf.mxu1  ;;  %v1284_v57 = vpop.f32.mrf.mxu0 }
 0x404   : > { %v2106_v58 = vmul.f32 -1.442695, %v1689_v54  ;;  %v2109_v59 = vmul.f32 -1.442695, %v1692_v51  ;;  %v2324_v56 = vld [vmem:[%s3187_s7 + $0x8] sm:$0xff]   ;;  %v2325_v57 = vld [vmem:[%s3187_s7 + $0x18] sm:$0xff]  }
 0x405   : > { %v1111_v61 = vpop.f32.mrf.mxu1 }
 0x406   : > { %2337 = vpow2.f32 %v2106_v58  ;;  %v1690_v62 = vadd.f32 %v1655_v26, %v1111_v61  ;;  %v1793_v58 = vpop.permute.xlu1 %1792 }
 0x407   : > { %2339 = vpow2.f32 %v2109_v59  ;;  %v1113_v63 = vpop.f32.mrf.mxu1  ;;  %v1798_v59 = vpop.permute.xlu0 %1797 }
 0x408   : > { %v2107_v1 = vmul.f32 -1.442695, %v1690_v62 }
 0x40a   : > { %2341 = vpow2.f32 %v2107_v1  ;;  %v1803_v61 = vpop.permute.xlu1 %1802 }
 0x40e   : > { %v1813_v63 = vpop.permute.xlu1 %1812 }
 0x40f   : > { %v2336_v55 = vpop.eup %2335 }
 0x410   : > { %v1731_v3 = vadd.f32 1.0, %v2336_v55 }
 0x412   : > { %2343 = vrcp.f32 %v1731_v3 }
 0x413   : > { %v2338_v4 = vpop.eup %2337 }
 0x414   : > { %v2340_v5 = vpop.eup %2339  ;;  %v1729_v6 = vadd.f32 1.0, %v2338_v4 }
 0x415   : > { %v1732_v49 = vadd.f32 1.0, %v2340_v5 }
 0x416   : > { %2345 = vrcp.f32 %v1729_v6 }
 0x417   : > { %v2342_v52 = vpop.eup %2341  ;;  %2347 = vrcp.f32 %v1732_v49 }
 0x418   : > { %v1730_v8 = vadd.f32 1.0, %v2342_v52 }
 0x41a   : > { %2349 = vrcp.f32 %v1730_v8 }
 0x41f   : > { %v2344_v53 = vpop.eup %2343 }
 0x420   : > { %v1761_v9 = vmul.f32 %v2344_v53, %v1691_v40 }
 0x423   : > { %v2346_v60 = vpop.eup %2345 }
 0x424   : > { %v2348_v50 = vpop.eup %2347  ;;  %v1759_v11 = vmul.f32 %v2346_v60, %v1689_v54  ;;  %v2322_v54 = vld [vmem:[%s3187_s7] sm:$0xff]  }
 0x425   : > { %v1762_v10 = vmul.f32 %v2348_v50, %v1692_v51  ;;  %v2323_v51 = vld [vmem:[%s3187_s7 + $0x10] sm:$0xff]   ;;  %v1823_v50 = vpop.permute.xlu1 %1822 }
 0x427   : > { %v2350_v12 = vpop.eup %2349  ;;  %v1778_v13 = vpack.c.bf16 %v1762_v10, %v1761_v9 }
 0x428   : > { %v1760_v2 = vmul.f32 %v2350_v12, %v1690_v62  ;;  %v1808_v62 = vpop.permute.xlu0 %1807 }
 0x42a   : > { %v1777_v16 = vpack.c.bf16 %v1760_v2, %v1759_v11 }
 0x441   : > { %v1620_v17 = vpop.f32.mrf.mxu0 }
 0x442   : > { %v1695_v18 = vadd.f32 %v3117_v0, %v1620_v17 }
 0x443   : > { %v1622_v23 = vpop.f32.mrf.mxu0 }
 0x444   : > { %v2112_v14 = vmul.f32 -1.442695, %v1695_v18 }
 0x445   : > { %v1623_v21 = vpop.f32.mrf.mxu0 }
 0x446   : > { %2351 = vpow2.f32 %v2112_v14  ;;  %v1696_v26 = vadd.f32 %v3119_v20, %v1623_v21 }
 0x447   : > { %v1625_v27 = vpop.f32.mrf.mxu0 }
 0x448   : > { %v2113_v28 = vmul.f32 -1.442695, %v1696_v26 }
 0x44a   : > { %2353 = vpow2.f32 %v2113_v28  ;;  %v1833_v28 = vpop.permute.xlu1 %1832 }
 0x44d   : > { %v1450_v44 = vpop.f32.mrf.mxu1 }
 0x44e   : > { %v1693_v45 = vadd.f32 %v3123_v7, %v1450_v44 }
 0x44f   : > { %v1452_v19 = vpop.f32.mrf.mxu1 }
 0x450   : > { %v2110_v15 = vmul.f32 -1.442695, %v1693_v45 }
 0x451   : > { %v1453_v29 = vpop.f32.mrf.mxu1 }
 0x452   : > { %2355 = vpow2.f32 %v2110_v15  ;;  %v1694_v30 = vadd.f32 %v3121_v22, %v1453_v29 }
 0x453   : > { %v2352_v24 = vpop.eup %2351  ;;  %v1455_v0 = vpop.f32.mrf.mxu1 }
 0x454   : > { %v1735_v48 = vadd.f32 1.0, %v2352_v24  ;;  %v2111_v25 = vmul.f32 -1.442695, %v1694_v30 }
 0x456   : > { %2357 = vpow2.f32 %v2111_v25 }
 0x457   : > { %v2354_v46 = vpop.eup %2353  ;;  %2359 = vrcp.f32 %v1735_v48 }
 0x458   : > { %v1736_v20 = vadd.f32 1.0, %v2354_v46 }
 0x45a   : > { %2361 = vrcp.f32 %v1736_v20 }
 0x45f   : > { %v2356_v31 = vpop.eup %2355 }
 0x460   : > { %v1733_v32 = vadd.f32 1.0, %v2356_v31 }
 0x462   : > { %2363 = vrcp.f32 %v1733_v32 }
 0x463   : > { %v2358_v33 = vpop.eup %2357 }
 0x464   : > { %v2360_v34 = vpop.eup %2359  ;;  %v1734_v7 = vadd.f32 1.0, %v2358_v33 }
 0x465   : > { %v1765_v36 = vmul.f32 %v2360_v34, %v1695_v18 }
 0x466   : > { %2365 = vrcp.f32 %v1734_v7 }
 0x467   : > { %v2362_v35 = vpop.eup %2361 }
 0x468   : > { %v1766_v39 = vmul.f32 %v2362_v35, %v1696_v26 }
 0x46a   : > { %v1780_v22 = vpack.c.bf16 %v1766_v39, %v1765_v36 }
 0x46c   : > { %2148 = vmatpush3.bf16.msra.mxu0 %v1780_v22  ;;  %2182 = vmatpush3.bf16.msra.mxu1 %v1780_v22 }
 0x46d   : > { %2149 = vmatprep.subr.bf16.mxu0 %v2386_v38  ;;  %2178 = vmatprep.subr.bf16.mxu1 %v2386_v38 }
 0x46f   : > { %v2364_v40 = vpop.eup %2363 }
 0x470   : > { %v1763_v42 = vmul.f32 %v2364_v40, %v1693_v45 }
 0x473   : > { %v2366_v41 = vpop.eup %2365 }
 0x474   : > { %v1764_v43 = vmul.f32 %v2366_v41, %v1694_v30 }
 0x476   : > { %v1779_v47 = vpack.c.bf16 %v1764_v43, %v1763_v42 }
 0x478   : > { %2150 = vmatpush3.bf16.msra.mxu0 %v1779_v47  ;;  %2183 = vmatpush3.bf16.msra.mxu1 %v1779_v47 }
 0x479   : > { %2151 = vmatprep.subr.bf16.mxu0 %v2386_v38  ;;  %2179 = vmatprep.subr.bf16.mxu1 %v2386_v38 }
 0x47c   : > { %2152 = vmatpush3.bf16.msra.mxu0 %v1778_v13  ;;  %2184 = vmatpush3.bf16.msra.mxu1 %v1778_v13 }
 0x47d   : > { %2153 = vmatprep.subr.bf16.mxu0 %v2386_v38  ;;  %2180 = vmatprep.subr.bf16.mxu1 %v2386_v38 }
 0x480   : > { %2154 = vmatpush3.bf16.msra.mxu0 %v1777_v16  ;;  %2185 = vmatpush3.bf16.msra.mxu1 %v1777_v16 }
 0x481   : > { %2155 = vmatprep.subr.bf16.mxu0 %v2386_v38  ;;  %2181 = vmatprep.subr.bf16.mxu1 %v2386_v38 }
 0x484   : > { %2156 = vmatpush3.bf16.msra.mxu0 %v3125_v37  ;;  %2186 = vmatpush3.bf16.msra.mxu1 %v3125_v37  ;;  %v2326_v37 = vld [vmem:[%s3187_s7 + $0x20] ss:$0 sps:$4 sm:$0xff]  }
 0x487   : > { %2158 = vmatmul.mubr.msk.bf16.vlgmr.msra.gmra.mxu0 %vm1858_vm11, %v2322_v54  ;;  %2166 = vmatmul.mubr.msk.bf16.vlgmr.msra.gmra.mxu1 %vm1858_vm11, %v2323_v51 }
 0x488   : > { %2161 = vmatprep.mubr.msk.bf16.mxu0 %vm2387_vm10, %v2386_v38  ;;  %2169 = vmatprep.mubr.msk.bf16.mxu1 %vm2387_vm10, %v2386_v38 }
 0x48f   : > { %2162 = vmatmul.mubr.msk.bf16.gmra.mxu0 %vm1858_vm11, %v2324_v56  ;;  %2170 = vmatmul.mubr.msk.bf16.gmra.mxu1 %vm1858_vm11, %v2325_v57 }
 0x490   : > { %2173 = vmatprep.mubr.msk.bf16.mxu1 %vm2387_vm10, %v2386_v38  ;;  %v1818_v38 = vpop.permute.xlu0 %1817 }
 0x494   : > { %v1828_v17 = vpop.permute.xlu0 %1827 }
 0x497   : > { %2174 = vmatmul.mubr.msk.bf16.gmra.mxu1 %vm1858_vm11, %v2326_v37 }
 0x547   : > { %v1908_v1 = vpop.f32.mrf.mxu0  ;;  %v1924_v55 = vpop.f32.mrf.mxu1 }
 0x548   : > { %v1909_v3 = vadd.f32 %v1908_v1, %v1793_v58  ;;  %v1925_v4 = vadd.f32 %v1924_v55, %v1813_v63 }
 0x549   : > { %v2159_v5 = vpop.f32.mrf.mxu0  ;;  %v2167_v6 = vpop.f32.mrf.mxu1 }
 0x54a   : > { %1946 = vst [vmem:[%s2461_s19] sm:$0xff] %v1909_v3  ;;  %1950 = vst [vmem:[%s2461_s19 + $0x20] sm:$0xff] %v1925_v4 }
 0x54b   : > { %v1911_v49 = vpop.f32.mrf.mxu0  ;;  %v1927_v52 = vpop.f32.mrf.mxu1 }
 0x54c   : > { %v1912_v8 = vadd.f32 %v1911_v49, %v1798_v59  ;;  %v1928_v53 = vadd.f32 %v1927_v52, %v1818_v38 }
 0x54d   : > { %v2160_v60 = vpop.f32.mrf.mxu0  ;;  %v2168_v9 = vpop.f32.mrf.mxu1 }
 0x54e   : > { %1947 = vst [vmem:[%s2461_s19 + $0x8] sm:$0xff] %v1912_v8  ;;  %1951 = vst [vmem:[%s2461_s19 + $0x28] sm:$0xff] %v1928_v53 }
 0x54f   : > { %v1916_v10 = vpop.f32.mrf.mxu0  ;;  %v1932_v11 = vpop.f32.mrf.mxu1 }
 0x550   : > { %v1917_v12 = vadd.f32 %v1916_v10, %v1803_v61  ;;  %v1933_v13 = vadd.f32 %v1932_v11, %v1823_v50 }
 0x551   : > { %v2163_v2 = vpop.f32.mrf.mxu0  ;;  %v2171_v16 = vpop.f32.mrf.mxu1 }
 0x552   : > { %1948 = vst [vmem:[%s2461_s19 + $0x10] sm:$0xff] %v1917_v12  ;;  %1952 = vst [vmem:[%s2461_s19 + $0x30] sm:$0xff] %v1933_v13 }
 0x553   : > { %v1919_v18 = vpop.f32.mrf.mxu0  ;;  %v1935_v23 = vpop.f32.mrf.mxu1 }
 0x554   : > { %v1920_v14 = vadd.f32 %v1919_v18, %v1808_v62  ;;  %v1936_v21 = vadd.f32 %v1935_v23, %v1828_v17 }
 0x555   : > { %v2172_v26 = vpop.f32.mrf.mxu1  ;;  %v2164_v27 = vpop.f32.mrf.mxu0 }
 0x556   : > { %1949 = vst [vmem:[%s2461_s19 + $0x18] sm:$0xff] %v1920_v14  ;;  %1953 = vst [vmem:[%s2461_s19 + $0x38] sm:$0xff] %v1936_v21 }
 0x557   : > { %v1940_v44 = vpop.f32.mrf.mxu1 }
 0x558   : > { %v1941_v45 = vadd.f32 %v1940_v44, %v1833_v28 }
 0x559   : > { %v2175_v19 = vpop.f32.mrf.mxu1 }
 0x55a   : > { %1954 = vst [vmem:[%s2461_s19 + $0x40] sm:$0xff] %v1941_v45 }
 0x55b   : > { %v1943_v15 = vpop.f32.mrf.mxu1 }
 0x55d   : > { %v2176_v29 = vpop.f32.mrf.mxu1 }
 0x55e PF: > { %s19_s30 = sadd.s32 1, %s2373_s30  }
 0x55f   : > { %p16_p5 = scmp.ge.s32.totalorder %s19_s30, 4  }
 0x561   :  { %18 = sbr.rel (!%p16_p5) target bundleno = 1 (0x1), region = 93 }

// kernel: _lambda_.4
= control target key start
LH: loop header
LB: loop body
LE: loop exit
PB: predicated region body
PF: predicated region fallthrough
CT: control target
= control target key end

     0   :  { %14 = vsyncpa [#allocation4], 0  ;;  %s3699_s0 = inlined_call_operand.vmem [shape: bf16[2,32,256], index: 0, kind: input, shape index: {}]   ;;  %s3700_s1 = inlined_call_operand.vmem [shape: f32[1,128], index: 1, kind: input, shape index: {}]   ;;  %s3701_s2 = inlined_call_operand.vmem [shape: bf16[80,288], index: 2, kind: input, shape index: {}]   ;;  %s3702_s3 = inlined_call_operand.vmem [shape: f32[80,1], index: 3, kind: input, shape index: {}]   ;;  %s3703_s4 = inlined_call_operand.hbm [shape: bf16[4,16,144], index: 4, kind: input, shape index: {}]   ;;  %s3704_s5 = inlined_call_operand.hbm [shape: bf16[16,144], index: 5, kind: input, shape index: {}]   ;;  %s3705_s6 = inlined_call_operand.vmem [shape: f32[80,1], index: 6, kind: input, shape index: {}]   ;;  %s3706_s7 = inlined_call_operand.vmem [shape: bf16[72,80], index: 7, kind: input, shape index: {}]   ;;  %s3707_s8 = inlined_call_operand.hbm [shape: f32[72,1], index: 8, kind: input, shape index: {}]   ;;  %s3708_s9 = inlined_call_operand.vmem [shape: f32[2,72,128], index: 9, kind: output, shape index: {}]  }
   0x1   :  { %15 = vsyncpa [#allocation6], 0  ;;  %s2911_s30 = smov 0  }
   0x2 LB: > { %s2917_s10 = sadd.s32 4294967295, %s2841_s30   ;;  %p2267_p0 = scmp.ge.s32.totalorder %s2841_s30, 1  ;;  %s2841_s30 = sphi %s2911_s30, %s21_s30  }
   0x3   : > { %p246_p1 = scmp.lt.s32.totalorder %s2841_s30, 3  ;;  %p2550_p3 = scmp.eq.s32.totalorder %s2917_s10, 0 }
   0x4   : > { %s2843_s12 = smov [#allocation5]   ;;  %s2844_s14 = smov [#allocation3]  }
   0x5   : > { %p2923_p4 = pnand %p2267_p0, %p246_p1  ;;  %s280_s13 = sshll.u32 %s2843_s12, 4  ;;  %s281_s13 = int_to_ptr.vmem [resolvable:$true] %s280_s13 }
   0x6   : > { %s267_s15 = sshll.u32 %s2844_s14, 4  ;;  %s2845_s17 = smov [#allocation7]   ;;  %s268_s15 = int_to_ptr.vmem [resolvable:$true] %s267_s15 }
   0x7   : > { %p2540_p5 = pneg %p2923_p4  ;;  %s299_s18 = sshll.u32 %s2845_s17, 4  ;;  %s2935_s18 = int_to_ptr.vmem [resolvable:$true] %s299_s18 }
   0x8   : > { %s2760_s19 = scalar_lea.vmem %s281_s13, 256  ;;  %p2768_p11 = scmp.lt.s32.totalorder %s281_s13, %s281_s13 }
   0x9   : > { %p2931_p6 = pnand %p2550_p3, %p2540_p5  ;;  %p2761_p8 = scmp.ne.s32.totalorder %s281_s13, %s2760_s19 }
   0xa   : > { %p2769_p12 = scmp.lt.s32.totalorder %s2760_s19, %s2760_s19 }
   0xb   : > { %p2751_p7 = pneg %p2931_p6 }
   0xc   : > { %p2770_p13 = por %p2769_p12, %p2768_p11 }
   0xd   : > { %p2763_p9 = pnand %p2761_p8, %p2751_p7 }
   0xf   : > { %p2764_p10 = pneg %p2763_p9 }
  0x11   : > { %p2771_p0 = pnand %p2770_p13, %p2764_p10 }
  0x13   : > { %2774 = shalt.err (!%p2771_p0)
}
  0x14   : > { %s2846_s20 = smov 128   ;;  %s2847_s21 = smov 8  }
  0x15   : > { %2546 = dma.hbm_to_vmem [thread:$0]  (!%p2931_p6), %s3704_s5, 256, %s281_s13, [#allocation6], %s2846_s20, %s2846_s20, %s2847_s21  }
  0x16   : > { %s2786_s24 = scalar_lea.vmem %s268_s15, 1024  ;;  %p2794_p9 = scmp.lt.s32.totalorder %s268_s15, %s268_s15 }
  0x17   : > { %p2787_p1 = scmp.ne.s32.totalorder %s268_s15, %s2786_s24  ;;  %p2795_p2 = scmp.lt.s32.totalorder %s2786_s24, %s2786_s24 }
  0x19   : > { %p2789_p5 = pnand %p2787_p1, %p2751_p7  ;;  %p2796_p11 = por %p2795_p2, %p2794_p9 }
  0x1b   : > { %p2790_p8 = pneg %p2789_p5 }
  0x1d   : > { %p2797_p10 = pnand %p2796_p11, %p2790_p8 }
  0x1f   : > { %2800 = shalt.err (!%p2797_p10)
}
  0x20   : > { %2543 = dma.hbm_to_vmem [thread:$0]  (!%p2931_p6), %s3703_s4, 1024, %s268_s15, [#allocation4], %s2846_s20, %s2846_s20, %s2847_s21  }
  0x21   : > { %s2812_s27 = scalar_lea.vmem %s2935_s18, 1152  ;;  %p2820_p2 = scmp.lt.s32.totalorder %s2935_s18, %s2935_s18 }
  0x22   : > { %p2813_p12 = scmp.ne.s32.totalorder %s2935_s18, %s2812_s27  ;;  %p2821_p1 = scmp.lt.s32.totalorder %s2812_s27, %s2812_s27 }
  0x24   : > { %p2815_p13 = pnand %p2813_p12, %p2751_p7  ;;  %p2822_p5 = por %p2821_p1, %p2820_p2 }
  0x26   : > { %p2816_p0 = pneg %p2815_p13 }
  0x28   : > { %p2823_p8 = pnand %p2822_p5, %p2816_p0 }
  0x2a   : > { %2826 = shalt.err (!%p2823_p8)
}
  0x2b   : > { %2549 = dma.hbm_to_vmem [thread:$0]  (!%p2931_p6), %s3707_s8, 1152, %s2935_s18, [#allocation6], %s2846_s20, %s2846_s20, %s2847_s21  }
  0x2c   : > { %323 = sbr.rel (%p2923_p4) target bundleno = 1450 (0x5aa), region = 56 }
  0x31   : > { %2832 = dma.done.wait (%p2550_p3), [#allocation4], 1024  }
  0x32   : > { %2834 = vsyncadd (%p2550_p3), [#allocation4], 4294966272 }
  0x33   : > { %2836 = dma.done.wait (%p2550_p3), [#allocation6], 1408  }
  0x34   : > { %2838 = vsyncadd (%p2550_p3), [#allocation6], 4294965888  ;;  %p367_p7 = scmp.lt.s32.totalorder %s2917_s10, 1  ;;  %s2848_s20 = smov 122   ;;  %v2594_v4 = vld [vmem:[%s3701_s2 + $0x4] ss:$12 sps:$4 sm:$0xff]  }
  0x35   : > { %s2849_s21 = smov 115   ;;  %s2850_s22 = smov 116   ;;  %721 = vmatprep.mubr.bf16.mxu0 %v2594_v4  ;;  %v2854_v5 = vmov 0.0   ;;  %vm2856_vm0 = vmmov 0   ;;  %v538_v6 = vld [vmem:[%s3702_s3] sm:$0xff]  ;;  %v539_v7 = vld [vmem:[%s3702_s3 + $0x8] sm:$0xff] }
  0x36   : > { %s368_s12 = scalar_select %p367_p7, %s2917_s10, 1  ;;  %2463 = vmatprep.subr.bf16.mxu1 %v2854_v5  ;;  %2467 = vmatprep.mubr.msk.bf16.mxu1 %vm2856_vm0, %v2854_v5  ;;  %v2858_v8 = vmov 0   ;;  %v540_v9 = vld [vmem:[%s3702_s3 + $0x10] sm:$0xff]  ;;  %v541_v10 = vld [vmem:[%s3702_s3 + $0x18] sm:$0xff]  ;;  %v542_v11 = vld [vmem:[%s3702_s3 + $0x20] sm:$0xff]  ;;  %vm500_vm1 = vcmask 941056  }
  0x37   : > { %s2851_s23 = smov 126   ;;  %s2852_s24 = smov 120   ;;  %2582 = vset.pattern.permute.xlu0 %v2858_v8  ;;  %2583 = vset.pattern.permute.xlu1 %v2858_v8  ;;  %v543_v12 = vld [vmem:[%s3702_s3 + $0x28] sm:$0xff]  ;;  %v544_v13 = vld [vmem:[%s3702_s3 + $0x30] sm:$0xff]  ;;  %v545_v14 = vld [vmem:[%s3702_s3 + $0x38] sm:$0xff]  ;;  %vm448_vm2 = vcmask 998400  }
  0x38   : > { %s2389_s13 = sshll.u32 %s368_s12, 5  ;;  %s2527_s14 = smul.u32 72, %s368_s12  ;;  %v546_v15 = vld [vmem:[%s3702_s3 + $0x40] sm:$0xff]  ;;  %v547_v16 = vld [vmem:[%s3702_s3 + $0x48] sm:$0xff]  ;;  %vm487_vm3 = vcmask 949248   ;;  %vm435_vm4 = vcmask 1031168  }
  0x39   : > { %s2983_s16 = scalar_lea.vmem %s3699_s0, %s2389_s13  ;;  %s2853_s25 = smov 127   ;;  %vm474_vm5 = vcmask 982016   ;;  %vm422_vm6 = vcmask 1039360   ;;  %vm461_vm7 = vcmask 990208   ;;  %v2592_v61 = vld [vmem:[%s3701_s2] ss:$12 sps:$4 sm:$0xff]  }
  0x3a   : > { %s2988_s19 = scalar_lea.vmem %s3708_s9, %s2527_s14  ;;  %v2584_v0 = vld [vmem:[%s2983_s16 + $0x10] ss:$8 sps:$4 sm:$0xff]   ;;  %v2586_v1 = vld [vmem:[%s2983_s16 + $0x14] ss:$8 sps:$4 sm:$0xff]   ;;  %v2587_v2 = vld [vmem:[%s2983_s16 + $0x4] ss:$8 sps:$4 sm:$0xff]  }
  0x3b   : > { %444 = vrot.lane.b32.xlu1 %v2584_v0, %s2848_s20  ;;  %496 = vrot.lane.b32.xlu0 %v2584_v0, %s2849_s21  ;;  %v2589_v3 = vld [vmem:[%s2983_s16] ss:$8 sps:$4 sm:$0xff]   ;;  %s2855_s28 = smov 121   ;;  %s3709_s29 = smov 114   ;;  %v2590_v53 = vld [vmem:[%s2983_s16 + $0x10] ss:$8 sps:$4 sm:$0xff]  }
  0x3c   : > { %v2591_v57 = vld [vmem:[%s2983_s16] ss:$8 sps:$4 sm:$0xff]   ;;  %vm513_vm8 = vcmask 932864   ;;  %vm673_vm9 = vcmask 261120   ;;  %p3713_p3 = scmp.ne.s32.totalorder %s2917_s10, 0 }
  0x3d   : > { %v2595_v62 = vld [vmem:[%s3701_s2 + $0x1c] ss:$12 sps:$4 sm:$0xff]  }
  0x3f   : > { %446 = vrot.lane.b32.xlu1 %v2586_v1, %s2848_s20  ;;  %498 = vrot.lane.b32.xlu0 %v2586_v1, %s2849_s21 }
  0x43   : > { %494 = vrot.lane.b32.xlu1 %v2587_v2, %s2849_s21  ;;  %492 = vrot.lane.b32.xlu0 %v2589_v3, %s2849_s21 }
  0x47   : > { %442 = vrot.lane.b32.xlu1 %v2587_v2, %s2848_s20  ;;  %440 = vrot.lane.b32.xlu0 %v2589_v3, %s2848_s20 }
  0x4b   : > { %485 = vrot.lane.b32.xlu1 %v2586_v1, %s2850_s22  ;;  %483 = vrot.lane.b32.xlu0 %v2584_v0, %s2850_s22 }
  0x4f   : > { %433 = vrot.lane.b32.xlu1 %v2586_v1, %s2851_s23  ;;  %431 = vrot.lane.b32.xlu0 %v2584_v0, %s2851_s23 }
  0x53   : > { %481 = vrot.lane.b32.xlu1 %v2587_v2, %s2850_s22  ;;  %479 = vrot.lane.b32.xlu0 %v2589_v3, %s2850_s22 }
  0x57   : > { %429 = vrot.lane.b32.xlu1 %v2587_v2, %s2851_s23  ;;  %427 = vrot.lane.b32.xlu0 %v2589_v3, %s2851_s23 }
  0x5b   : > { %472 = vrot.lane.b32.xlu1 %v2586_v1, %s2852_s24  ;;  %470 = vrot.lane.b32.xlu0 %v2584_v0, %s2852_s24 }
  0x5f   : > { %420 = vrot.lane.b32.xlu1 %v2586_v1, %s2853_s25  ;;  %418 = vrot.lane.b32.xlu0 %v2584_v0, %s2853_s25 }
  0x63   : > { %468 = vrot.lane.b32.xlu1 %v2587_v2, %s2852_s24  ;;  %466 = vrot.lane.b32.xlu0 %v2589_v3, %s2852_s24 }
  0x67   : > { %416 = vrot.lane.b32.xlu1 %v2587_v2, %s2853_s25  ;;  %414 = vrot.lane.b32.xlu0 %v2589_v3, %s2853_s25 }
  0x6b   : > { %459 = vrot.lane.b32.xlu1 %v2586_v1, %s2855_s28  ;;  %457 = vrot.lane.b32.xlu0 %v2584_v0, %s2855_s28 }
  0x6f   : > { %455 = vrot.lane.b32.xlu1 %v2587_v2, %s2855_s28  ;;  %453 = vrot.lane.b32.xlu0 %v2589_v3, %s2855_s28 }
  0x73   : > { %511 = vrot.lane.b32.xlu1 %v2586_v1, %s3709_s29  ;;  %509 = vrot.lane.b32.xlu0 %v2584_v0, %s3709_s29 }
  0x77   : > { %507 = vrot.lane.b32.xlu1 %v2587_v2, %s3709_s29  ;;  %505 = vrot.lane.b32.xlu0 %v2589_v3, %s3709_s29 }
  0x7b   : > { %550 = vperm.xlu0 %2582, %v538_v6   ;;  %555 = vperm.xlu1 %2583, %v539_v7   ;;  %v2597_v6 = vld [vmem:[%s3701_s2 + $0x8] ss:$12 sps:$4 sm:$0xff]   ;;  %v2598_v7 = vld [vmem:[%s3701_s2 + $0x18] ss:$12 sps:$4 sm:$0xff]  }
  0x7f   : > { %560 = vperm.xlu1 %2583, %v540_v9   ;;  %565 = vperm.xlu0 %2582, %v541_v10   ;;  %v2599_v9 = vld [vmem:[%s3701_s2 + $0x34] ss:$12 sps:$4 sm:$0xff]  }
  0x80   : > { %v2601_v10 = vld [vmem:[%s3701_s2 + $0x20] ss:$12 sps:$4 sm:$0xff]  }
  0x83   : > { %570 = vperm.xlu1 %2583, %v542_v11   ;;  %575 = vperm.xlu0 %2582, %v543_v12   ;;  %v2602_v11 = vld [vmem:[%s3701_s2 + $0x30] ss:$12 sps:$4 sm:$0xff]   ;;  %v2603_v12 = vld [vmem:[%s3701_s2 + $0x4c] ss:$12 sps:$4 sm:$0xff]  }
  0x87   : > { %580 = vperm.xlu1 %2583, %v544_v13   ;;  %585 = vperm.xlu0 %2582, %v545_v14   ;;  %v2605_v13 = vld [vmem:[%s3701_s2 + $0x38] ss:$12 sps:$4 sm:$0xff]   ;;  %v2606_v14 = vld [vmem:[%s3701_s2 + $0x48] ss:$12 sps:$4 sm:$0xff]  }
  0x8b   : > { %590 = vperm.xlu1 %2583, %v546_v15   ;;  %595 = vperm.xlu0 %2582, %v547_v16   ;;  %v2607_v15 = vld [vmem:[%s3701_s2 + $0x64] ss:$12 sps:$4 sm:$0xff]  }
  0x8c   : > { %v2609_v16 = vld [vmem:[%s3701_s2 + $0x50] ss:$12 sps:$4 sm:$0xff]  }
  0xad   : > { %v445_v17 = vpop.permute.xlu1 %444  ;;  %v497_v18 = vpop.permute.xlu0 %496 }
  0xb1   : > { %v447_v19 = vpop.permute.xlu1 %446  ;;  %v499_v20 = vpop.permute.xlu0 %498 }
  0xb2   : > { %v502_v21 = vsel %vm500_vm1, %v497_v18, %v499_v20  ;;  %v450_v22 = vsel %vm448_vm2, %v445_v17, %v447_v19  ;;  %v2610_v17 = vld [vmem:[%s3701_s2 + $0x60] ss:$12 sps:$4 sm:$0xff]   ;;  %v2611_v18 = vld [vmem:[%s3701_s2 + $0x68] ss:$12 sps:$4 sm:$0xff]  }
  0xb3   : > { %2400 = vmatprep.subr.bf16.mxu0 %v502_v21 }
  0xb4   : > { %2401 = vmatpush3.bf16.msra.mxu0 %v450_v22 }
  0xb5   : > { %v495_v23 = vpop.permute.xlu1 %494  ;;  %v493_v24 = vpop.permute.xlu0 %492 }
  0xb6   : > { %v501_v25 = vsel %vm500_vm1, %v493_v24, %v495_v23 }
  0xb7   : > { %2402 = vmatprep.subr.bf16.mxu0 %v501_v25 }
  0xb9   : > { %v443_v26 = vpop.permute.xlu1 %442  ;;  %v441_v27 = vpop.permute.xlu0 %440 }
  0xba   : > { %v449_v28 = vsel %vm448_vm2, %v441_v27, %v443_v26 }
  0xbb   : > { %2403 = vmatpush3.bf16.msra.mxu0 %v449_v28 }
  0xbd   : > { %v486_v29 = vpop.permute.xlu1 %485  ;;  %v484_v30 = vpop.permute.xlu0 %483 }
  0xbe   : > { %v489_v31 = vsel %vm487_vm3, %v484_v30, %v486_v29 }
  0xbf   : > { %2404 = vmatprep.subr.bf16.mxu0 %v489_v31 }
  0xc1   : > { %v434_v32 = vpop.permute.xlu1 %433  ;;  %v432_v33 = vpop.permute.xlu0 %431 }
  0xc2   : > { %v437_v34 = vsel %vm435_vm4, %v432_v33, %v434_v32 }
  0xc3   : > { %2405 = vmatpush3.bf16.msra.mxu0 %v437_v34 }
  0xc5   : > { %v482_v35 = vpop.permute.xlu1 %481  ;;  %v480_v36 = vpop.permute.xlu0 %479 }
  0xc6   : > { %v488_v37 = vsel %vm487_vm3, %v480_v36, %v482_v35 }
  0xc7   : > { %2406 = vmatprep.subr.bf16.mxu0 %v488_v37 }
  0xc9   : > { %v430_v38 = vpop.permute.xlu1 %429  ;;  %v428_v39 = vpop.permute.xlu0 %427 }
  0xca   : > { %v436_v40 = vsel %vm435_vm4, %v428_v39, %v430_v38 }
  0xcb   : > { %2407 = vmatpush3.bf16.msra.mxu0 %v436_v40 }
  0xcd   : > { %v473_v41 = vpop.permute.xlu1 %472  ;;  %v471_v42 = vpop.permute.xlu0 %470 }
  0xce   : > { %v476_v43 = vsel %vm474_vm5, %v471_v42, %v473_v41 }
  0xcf   : > { %2408 = vmatprep.subr.bf16.mxu0 %v476_v43 }
  0xd1   : > { %v421_v44 = vpop.permute.xlu1 %420  ;;  %v419_v45 = vpop.permute.xlu0 %418 }
  0xd2   : > { %v424_v46 = vsel %vm422_vm6, %v419_v45, %v421_v44 }
  0xd3   : > { %2409 = vmatpush3.bf16.msra.mxu0 %v424_v46 }
  0xd5   : > { %v469_v47 = vpop.permute.xlu1 %468  ;;  %v467_v48 = vpop.permute.xlu0 %466 }
  0xd6   : > { %v475_v49 = vsel %vm474_vm5, %v467_v48, %v469_v47 }
  0xd7   : > { %2410 = vmatprep.subr.bf16.mxu0 %v475_v49 }
  0xd9   : > { %v417_v50 = vpop.permute.xlu1 %416  ;;  %v415_v51 = vpop.permute.xlu0 %414 }
  0xda   : > { %v423_v52 = vsel %vm422_vm6, %v415_v51, %v417_v50 }
  0xdb   : > { %2411 = vmatpush3.bf16.msra.mxu0 %v423_v52 }
  0xdd   : > { %v460_v54 = vpop.permute.xlu1 %459  ;;  %v458_v55 = vpop.permute.xlu0 %457 }
  0xde   : > { %v463_v56 = vsel %vm461_vm7, %v458_v55, %v460_v54 }
  0xdf   : > { %2412 = vmatprep.subr.bf16.mxu0 %v463_v56 }
  0xe0   : > { %2413 = vmatpush3.bf16.msra.mxu0 %v2590_v53 }
  0xe1   : > { %v456_v58 = vpop.permute.xlu1 %455  ;;  %v454_v59 = vpop.permute.xlu0 %453 }
  0xe2   : > { %v462_v60 = vsel %vm461_vm7, %v454_v59, %v456_v58 }
  0xe3   : > { %2414 = vmatprep.subr.bf16.mxu0 %v462_v60 }
  0xe4   : > { %2415 = vmatpush3.bf16.msra.mxu0 %v2591_v57 }
  0xe5   : > { %v512_v63 = vpop.permute.xlu1 %511  ;;  %v510_v0 = vpop.permute.xlu0 %509 }
  0xe6   : > { %v515_v1 = vsel %vm513_vm8, %v510_v0, %v512_v63 }
  0xe7   : > { %722 = vmatmul.mubr.bf16.vlgmr.msra.gmra.mxu0 %v2592_v61  ;;  %2464 = vmatpush3.bf16.msra.mxu1 %v515_v1 }
  0xe8   : > { %2465 = vmatprep.subr.bf16.mxu1 %v2854_v5  ;;  %729 = vmatprep.mubr.bf16.mxu0 %v2595_v62 }
  0xe9   : > { %v508_v2 = vpop.permute.xlu1 %507  ;;  %v506_v3 = vpop.permute.xlu0 %505 }
  0xea   : > { %v514_v4 = vsel %vm513_vm8, %v506_v3, %v508_v2 }
  0xeb   : > { %2466 = vmatpush3.bf16.msra.mxu1 %v514_v4 }
  0xee   : > { %2468 = vmatmul.mubr.msk.bf16.vlgmr.msra.gmra.mxu1 %vm673_vm9, %v2597_v6 }
  0xef   : > { %730 = vmatmul.mubr.bf16.gmra.mxu0 %v2598_v7  ;;  %2471 = vmatprep.mubr.msk.bf16.mxu1 %vm2856_vm0, %v2854_v5 }
  0xf0   : > { %737 = vmatprep.mubr.bf16.mxu0 %v2599_v9 }
  0xf6   : > { %2472 = vmatmul.mubr.msk.bf16.gmra.mxu1 %vm673_vm9, %v2601_v10  ;;  %v551_v21 = vpop.permute.xlu0 %550  ;;  %v556_v24 = vpop.permute.xlu1 %555 }
  0xf7   : > { %738 = vmatmul.mubr.bf16.gmra.mxu0 %v2602_v11  ;;  %2475 = vmatprep.mubr.msk.bf16.mxu1 %vm2856_vm0, %v2854_v5 }
  0xf8   : > { %745 = vmatprep.mubr.bf16.mxu0 %v2603_v12 }
  0xfa   : > { %v561_v35 = vpop.permute.xlu1 %560  ;;  %v566_v46 = vpop.permute.xlu0 %565 }
  0xfe   : > { %2476 = vmatmul.mubr.msk.bf16.gmra.mxu1 %vm673_vm9, %v2605_v13  ;;  %v571_v55 = vpop.permute.xlu1 %570  ;;  %v576_v0 = vpop.permute.xlu0 %575 }
  0xff   : > { %746 = vmatmul.mubr.bf16.gmra.mxu0 %v2606_v14  ;;  %2479 = vmatprep.mubr.msk.bf16.mxu1 %vm2856_vm0, %v2854_v5 }
 0x100   : > { %753 = vmatprep.mubr.bf16.mxu0 %v2607_v15 }
 0x102   : > { %v581_v13 = vpop.permute.xlu1 %580 }
 0x106   : > { %2480 = vmatmul.mubr.msk.bf16.gmra.mxu1 %vm673_vm9, %v2609_v16 }
 0x107   : > { %754 = vmatmul.mubr.bf16.gmra.mxu0 %v2610_v17  ;;  %2483 = vmatprep.mubr.msk.bf16.mxu1 %vm2856_vm0, %v2854_v5 }
 0x10e   : > { %2484 = vmatmul.mubr.msk.bf16.gmra.mxu1 %vm673_vm9, %v2611_v18 }
 0x1a7   : > { %v2416_v19 = vpop.f32.mrf.mxu0 }
 0x1a9   : > { %v2417_v20 = vpop.f32.mrf.mxu0 }
 0x1aa   : > { %v2418_v22 = vadd.f32 %v2417_v20, %v2416_v19 }
 0x1ab   : > { %v2419_v23 = vpop.f32.mrf.mxu0 }
 0x1ac   : > { %v724_v25 = vadd.f32 %v2418_v22, %v551_v21 }
 0x1ad   : > { %v2420_v26 = vpop.f32.mrf.mxu0 }
 0x1ae   : > { %v2421_v27 = vadd.f32 %v2420_v26, %v2419_v23  ;;  %v796_v28 = vpop.f32.mrf.mxu1 }
 0x1af   : > { %v3136_v29 = vadd.f32 %v796_v28, %v724_v25  ;;  %v2422_v30 = vpop.f32.mrf.mxu0 }
 0x1b0   : > { %v727_v31 = vadd.f32 %v2421_v27, %v556_v24  ;;  %v2469_v32 = vpop.f32.mrf.mxu1  ;;  %v586_v24 = vpop.permute.xlu0 %585 }
 0x1b1   : > { %v2305_v33 = vmul.f32 -1.442695, %v3136_v29  ;;  %v2423_v34 = vpop.f32.mrf.mxu0 }
 0x1b2   : > { %v2424_v36 = vadd.f32 %v2423_v34, %v2422_v30  ;;  %v799_v37 = vpop.f32.mrf.mxu1 }
 0x1b3   : > { %2612 = vpow2.f32 %v2305_v33  ;;  %v3139_v38 = vadd.f32 %v799_v37, %v727_v31  ;;  %v2425_v39 = vpop.f32.mrf.mxu0 }
 0x1b4   : > { %v732_v40 = vadd.f32 %v2424_v36, %v561_v35  ;;  %v2470_v41 = vpop.f32.mrf.mxu1  ;;  %v591_v36 = vpop.permute.xlu1 %590 }
 0x1b5   : > { %v2306_v42 = vmul.f32 -1.442695, %v3139_v38  ;;  %v2426_v43 = vpop.f32.mrf.mxu0 }
 0x1b6   : > { %v2427_v44 = vadd.f32 %v2426_v43, %v2425_v39  ;;  %v804_v45 = vpop.f32.mrf.mxu1 }
 0x1b7   : > { %2614 = vpow2.f32 %v2306_v42  ;;  %v3142_v47 = vadd.f32 %v804_v45, %v732_v40  ;;  %v2428_v48 = vpop.f32.mrf.mxu0 }
 0x1b8   : > { %v2473_v49 = vpop.f32.mrf.mxu1  ;;  %v735_v50 = vadd.f32 %v2427_v44, %v566_v46 }
 0x1b9   : > { %v2307_v51 = vmul.f32 -1.442695, %v3142_v47  ;;  %v2429_v52 = vpop.f32.mrf.mxu0  ;;  %v596_v49 = vpop.permute.xlu0 %595 }
 0x1ba   : > { %v2430_v53 = vadd.f32 %v2429_v52, %v2428_v48  ;;  %v807_v54 = vpop.f32.mrf.mxu1  ;;  %v2315_v52 = vld [vmem:[%s3700_s1] ss:$0 sm:$0xff] }
 0x1bb   : > { %2616 = vpow2.f32 %v2307_v51  ;;  %v3145_v56 = vadd.f32 %v807_v54, %v735_v50  ;;  %v2431_v57 = vpop.f32.mrf.mxu0 }
 0x1bc   : > { %v2474_v58 = vpop.f32.mrf.mxu1  ;;  %v740_v59 = vadd.f32 %v2430_v53, %v571_v55 }
 0x1bd   : > { %v2308_v60 = vmul.f32 -1.442695, %v3145_v56  ;;  %v2432_v61 = vpop.f32.mrf.mxu0 }
 0x1be   : > { %v2433_v62 = vadd.f32 %v2432_v61, %v2431_v57  ;;  %v812_v63 = vpop.f32.mrf.mxu1 }
 0x1bf   : > { %2618 = vpow2.f32 %v2308_v60  ;;  %v3148_v1 = vadd.f32 %v812_v63, %v740_v59  ;;  %v2434_v2 = vpop.f32.mrf.mxu0 }
 0x1c0   : > { %v2613_v3 = vpop.eup %2612  ;;  %v2477_v4 = vpop.f32.mrf.mxu1  ;;  %v743_v6 = vadd.f32 %v2433_v62, %v576_v0 }
 0x1c1   : > { %v865_v7 = vadd.f32 1.0, %v2613_v3  ;;  %v2309_v9 = vmul.f32 -1.442695, %v3148_v1  ;;  %v2435_v10 = vpop.f32.mrf.mxu0 }
 0x1c2   : > { %v2436_v11 = vadd.f32 %v2435_v10, %v2434_v2  ;;  %v815_v12 = vpop.f32.mrf.mxu1 }
 0x1c3   : > { %2620 = vrcp.f32 %v865_v7  ;;  %v3151_v14 = vadd.f32 %v815_v12, %v743_v6  ;;  %v2437_v15 = vpop.f32.mrf.mxu0 }
 0x1c4   : > { %v2615_v16 = vpop.eup %2614  ;;  %2622 = vpow2.f32 %v2309_v9  ;;  %v2478_v17 = vpop.f32.mrf.mxu1  ;;  %v748_v18 = vadd.f32 %v2436_v11, %v581_v13 }
 0x1c5   : > { %v866_v19 = vadd.f32 1.0, %v2615_v16  ;;  %v2310_v20 = vmul.f32 -1.442695, %v3151_v14  ;;  %v2438_v21 = vpop.f32.mrf.mxu0 }
 0x1c6   : > { %v2439_v22 = vadd.f32 %v2438_v21, %v2437_v15  ;;  %v820_v23 = vpop.f32.mrf.mxu1 }
 0x1c7   : > { %2624 = vrcp.f32 %v866_v19  ;;  %v3154_v25 = vadd.f32 %v820_v23, %v748_v18  ;;  %v2440_v26 = vpop.f32.mrf.mxu0 }
 0x1c8   : > { %v2617_v27 = vpop.eup %2616  ;;  %2626 = vpow2.f32 %v2310_v20  ;;  %v2481_v28 = vpop.f32.mrf.mxu1  ;;  %v751_v30 = vadd.f32 %v2439_v22, %v586_v24 }
 0x1c9   : > { %v867_v31 = vadd.f32 1.0, %v2617_v27  ;;  %v2311_v32 = vmul.f32 -1.442695, %v3154_v25  ;;  %v2441_v33 = vpop.f32.mrf.mxu0 }
 0x1ca   : > { %v2442_v34 = vadd.f32 %v2441_v33, %v2440_v26  ;;  %v823_v35 = vpop.f32.mrf.mxu1 }
 0x1cb   : > { %2628 = vrcp.f32 %v867_v31  ;;  %v3157_v37 = vadd.f32 %v823_v35, %v751_v30  ;;  %v2443_v39 = vpop.f32.mrf.mxu0 }
 0x1cc   : > { %v2619_v40 = vpop.eup %2618  ;;  %2630 = vpow2.f32 %v2311_v32  ;;  %v2482_v41 = vpop.f32.mrf.mxu1  ;;  %v756_v42 = vadd.f32 %v2442_v34, %v591_v36 }
 0x1cd   : > { %v868_v43 = vadd.f32 1.0, %v2619_v40  ;;  %v2312_v44 = vmul.f32 -1.442695, %v3157_v37  ;;  %v2444_v45 = vpop.f32.mrf.mxu0 }
 0x1ce   : > { %v2445_v46 = vadd.f32 %v2444_v45, %v2443_v39  ;;  %v828_v48 = vpop.f32.mrf.mxu1 }
 0x1cf   : > { %2632 = vrcp.f32 %v868_v43  ;;  %v829_v50 = vadd.f32 %v828_v48, %v756_v42 }
 0x1d0   : > { %v2621_v51 = vpop.eup %2620  ;;  %2634 = vpow2.f32 %v2312_v44  ;;  %v2485_v53 = vpop.f32.mrf.mxu1  ;;  %v759_v54 = vadd.f32 %v2445_v46, %v596_v49 }
 0x1d1   : > { %v2623_v55 = vpop.eup %2622  ;;  %v895_v57 = vmul.f32 %v2621_v51, %v3136_v29  ;;  %v2313_v58 = vmul.f32 -1.442695, %v829_v50 }
 0x1d2   : > { %v869_v59 = vadd.f32 1.0, %v2623_v55  ;;  %v831_v60 = vpop.f32.mrf.mxu1 }
 0x1d3   : > { %v3164_v61 = vmul.f32 %v2315_v52, %v895_v57  ;;  %2636 = vpow2.f32 %v2313_v58  ;;  %v832_v62 = vadd.f32 %v831_v60, %v759_v54 }
 0x1d4   : > { %v2625_v63 = vpop.eup %2624  ;;  %2638 = vrcp.f32 %v869_v59  ;;  %v2486_v0 = vpop.f32.mrf.mxu1 }
 0x1d5   : > { %v2627_v2 = vpop.eup %2626  ;;  %v896_v3 = vmul.f32 %v2625_v63, %v3139_v38  ;;  %v2314_v4 = vmul.f32 -1.442695, %v832_v62 }
 0x1d6   : > { %v870_v6 = vadd.f32 1.0, %v2627_v2 }
 0x1d7   : > { %v3167_v7 = vmul.f32 %v2315_v52, %v896_v3  ;;  %2640 = vpow2.f32 %v2314_v4 }
 0x1d8   : > { %v2629_v9 = vpop.eup %2628  ;;  %2642 = vrcp.f32 %v870_v6 }
 0x1d9   : > { %v2631_v29 = vpop.eup %2630  ;;  %v897_v10 = vmul.f32 %v2629_v9, %v3142_v47 }
 0x1da   : > { %v871_v11 = vadd.f32 1.0, %v2631_v29 }
 0x1db   : > { %v3170_v12 = vmul.f32 %v2315_v52, %v897_v10 }
 0x1dc   : > { %v2633_v13 = vpop.eup %2632  ;;  %2644 = vrcp.f32 %v871_v11 }
 0x1dd   : > { %v2635_v15 = vpop.eup %2634  ;;  %v898_v16 = vmul.f32 %v2633_v13, %v3145_v56 }
 0x1de   : > { %v872_v17 = vadd.f32 1.0, %v2635_v15 }
 0x1df   : > { %v3173_v38 = vmul.f32 %v2315_v52, %v898_v16 }
 0x1e0   : > { %v2637_v18 = vpop.eup %2636  ;;  %2646 = vrcp.f32 %v872_v17 }
 0x1e1   : > { %v2639_v19 = vpop.eup %2638  ;;  %v873_v20 = vadd.f32 1.0, %v2637_v18 }
 0x1e2   : > { %v899_v21 = vmul.f32 %v2639_v19, %v3148_v1 }
 0x1e3   : > { %2648 = vrcp.f32 %v873_v20 }
 0x1e4   : > { %v2641_v22 = vpop.eup %2640  ;;  %v916_v47 = vmul.f32 %v2315_v52, %v899_v21 }
 0x1e5   : > { %v2643_v23 = vpop.eup %2642  ;;  %v874_v24 = vadd.f32 1.0, %v2641_v22 }
 0x1e6   : > { %v900_v26 = vmul.f32 %v2643_v23, %v3151_v14 }
 0x1e7   : > { %2650 = vrcp.f32 %v874_v24 }
 0x1e8   : > { %v917_v27 = vmul.f32 %v2315_v52, %v900_v26 }
 0x1e9   : > { %v2645_v28 = vpop.eup %2644 }
 0x1ea   : > { %v901_v56 = vmul.f32 %v2645_v28, %v3154_v25 }
 0x1ec   : > { %v918_v30 = vmul.f32 %v2315_v52, %v901_v56 }
 0x1ed   : > { %v2647_v31 = vpop.eup %2646 }
 0x1ee   : > { %v902_v32 = vmul.f32 %v2647_v31, %v3157_v37 }
 0x1f0   : > { %v2649_v33 = vpop.eup %2648  ;;  %v919_v34 = vmul.f32 %v2315_v52, %v902_v32 }
 0x1f1   : > { %v903_v35 = vmul.f32 %v2649_v33, %v829_v50 }
 0x1f3   : > { %v920_v1 = vmul.f32 %v2315_v52, %v903_v35  ;;  %925 = sbr.rel (%p3713_p3) target bundleno = 515 (0x203), region = 72 }
 0x1f4   : > { %v2651_v36 = vpop.eup %2650 }
 0x1f5   : > { %v904_v39 = vmul.f32 %v2651_v36, %v832_v62 }
 0x1f7   : > { %v921_v40 = vmul.f32 %v2315_v52, %v904_v39 }
 0x1f8   : > { %v2859_v14 = vmov 0  }
 0x1f9   : > { %926 = vst [vmem:[#allocation2] sm:$0xff] %v2859_v14  ;;  %927 = vst [vmem:[#allocation2 + $0x8] sm:$0xf] %v2859_v14 }
 0x1fa   : > { %928 = vst [vmem:[#allocation2 + $0xc] sm:$0xff] %v2859_v14  ;;  %929 = vst [vmem:[#allocation2 + $0x14] sm:$0xf] %v2859_v14 }
 0x1fb   : > { %930 = vst [vmem:[#allocation2 + $0x18] sm:$0xff] %v2859_v14  ;;  %931 = vst [vmem:[#allocation2 + $0x20] sm:$0xf] %v2859_v14 }
 0x1fc   : > { %932 = vst [vmem:[#allocation2 + $0x24] sm:$0xff] %v2859_v14  ;;  %933 = vst [vmem:[#allocation2 + $0x2c] sm:$0xf] %v2859_v14 }
 0x1fd   : > { %934 = vst [vmem:[#allocation2 + $0x30] sm:$0xff] %v2859_v14  ;;  %935 = vst [vmem:[#allocation2 + $0x38] sm:$0xf] %v2859_v14 }
 0x1fe   : > { %936 = vst [vmem:[#allocation2 + $0x3c] sm:$0xff] %v2859_v14  ;;  %937 = vst [vmem:[#allocation2 + $0x44] sm:$0xf] %v2859_v14 }
 0x1ff   : > { %938 = vst [vmem:[#allocation2 + $0x48] sm:$0xff] %v2859_v14  ;;  %939 = vst [vmem:[#allocation2 + $0x50] sm:$0xf] %v2859_v14 }
 0x200   : > { %940 = vst [vmem:[#allocation2 + $0x54] sm:$0xff] %v2859_v14  ;;  %941 = vst [vmem:[#allocation2 + $0x5c] sm:$0xf] %v2859_v14 }
 0x201   : > { %942 = vst [vmem:[#allocation2 + $0x60] sm:$0xff] %v2859_v14  ;;  %943 = vst [vmem:[#allocation2 + $0x68] sm:$0xf] %v2859_v14 }
 0x202   : > { %944 = vst [vmem:[#allocation2 + $0x6c] sm:$0xff] %v2859_v14  ;;  %945 = vst [vmem:[#allocation2 + $0x74] sm:$0xf] %v2859_v14 }
 0x203 PF: > { %v2390_v25 = vpack.c.bf16 %v3164_v61, %v3164_v61  ;;  %v2391_v37 = vpack.c.bf16 %v3167_v7, %v3167_v7  ;;  %v2394_v41 = vpack.c.bf16 %v916_v47, %v916_v47  ;;  %v2395_v42 = vpack.c.bf16 %v917_v27, %v917_v27  ;;  %1127 = vmatprep.subr.bf16.mxu1 %v2858_v8  ;;  %v2656_v51 = vld [vmem:[#allocation2 + $0x8] ss:$12 sps:$4 sm:$0xff]   ;;  %v3199_v53 = vld [vmem:[#allocation2] ss:$12 sps:$4 sm:$0xff]   ;;  %s3714_s10 = smov 114   ;;  %s2860_s26 = smov 7  }
 0x204   : > { %v2392_v43 = vpack.c.bf16 %v3170_v12, %v3170_v12  ;;  %v2393_v44 = vpack.c.bf16 %v3173_v38, %v3173_v38  ;;  %v2398_v45 = vpack.c.bf16 %v920_v1, %v920_v1  ;;  %v2399_v46 = vpack.c.bf16 %v921_v40, %v921_v40  ;;  %1298 = vmatprep.subr.bf16.mxu0 %v2858_v8  ;;  %v2666_v59 = vld [vmem:[#allocation2 + $0x20] ss:$12 sps:$4 sm:$0xff]   ;;  %v3239_v0 = vld [vmem:[#allocation2 + $0x18] ss:$12 sps:$4 sm:$0xff]  }
 0x205   : > { %986 = vst [vmem:[#allocation2 + $0x4] sm:$0xf] %v2390_v25  ;;  %987 = vst [vmem:[#allocation2 + $0x10] sm:$0xf] %v2391_v37  ;;  %v2396_v48 = vpack.c.bf16 %v918_v30, %v918_v30  ;;  %v2397_v49 = vpack.c.bf16 %v919_v34, %v919_v34  ;;  %2653 = vset.pattern.permute.xlu1 %v2858_v8  ;;  %2652 = vset.pattern.permute.xlu0 %v2858_v8  ;;  %v2663_v57 = vld [vmem:[#allocation2 + $0x38] ss:$12 sps:$4 sm:$0xff]  }
 0x206   : > { %990 = vst [vmem:[#allocation2 + $0x34] sm:$0xf] %v2394_v41  ;;  %991 = vst [vmem:[#allocation2 + $0x40] sm:$0xf] %v2395_v42  ;;  %v3231_v61 = vld [vmem:[#allocation2 + $0x30] ss:$12 sps:$4 sm:$0xff]  }
 0x207   : > { %988 = vst [vmem:[#allocation2 + $0x1c] sm:$0xf] %v2392_v43  ;;  %989 = vst [vmem:[#allocation2 + $0x28] sm:$0xf] %v2393_v44  ;;  %v3274_v6 = vld [vmem:[#allocation2 + $0x50] ss:$12 sps:$4 sm:$0xff]  }
 0x208   : > { %994 = vst [vmem:[#allocation2 + $0x64] sm:$0xf] %v2398_v45  ;;  %995 = vst [vmem:[#allocation2 + $0x70] sm:$0xf] %v2399_v46  ;;  %v3334_v37 = vld [vmem:[#allocation2 + $0x48] ss:$12 sps:$4 sm:$0xff]  }
 0x209   : > { %992 = vst [vmem:[#allocation2 + $0x4c] sm:$0xf] %v2396_v48  ;;  %993 = vst [vmem:[#allocation2 + $0x58] sm:$0xf] %v2397_v49  ;;  %v3267_v3 = vld [vmem:[#allocation2 + $0x68] ss:$12 sps:$4 sm:$0xff]  }
 0x20a   : > { %v3322_v35 = vld [vmem:[#allocation2 + $0x60] ss:$12 sps:$4 sm:$0xff]   ;;  %v2691_v41 = vld [vmem:[#allocation3 + $0x4] ss:$8 sps:$4 sm:$0xff]   ;;  %vm1123_vm10 = vcmask 130048   ;;  %vm1105_vm11 = vcmask 56320  }
 0x20b   : > { %2334 = vmatprep.mubr.msk.bf16.mxu1 %vm1123_vm10, %v2691_v41  ;;  %vm2082_vm12 = vcmask 654336  }
 0x20c   : > { %v2654_v50 = vld [vmem:[#allocation2 + $0x4] ss:$12 sps:$4 sm:$0xff]  }
 0x20d   : > { %1045 = vrot.lane.b32.xlu1 %v2654_v50, %s2850_s22  ;;  %1050 = vrot.lane.b32.xlu0 %v2654_v50, %s2849_s21  ;;  %v2657_v52 = vld [vmem:[#allocation2 + $0x4] ss:$12 sps:$4 sm:$0xff]   ;;  %v2661_v55 = vld [vmem:[#allocation2 + $0x34] ss:$12 sps:$4 sm:$0xff]  }
 0x20e   : > { %v3201_v54 = vld [vmem:[#allocation2 + $0x4] ss:$12 sps:$4 sm:$0xff]   ;;  %v2664_v58 = vld [vmem:[#allocation2 + $0x1c] ss:$12 sps:$4 sm:$0xff]   ;;  %v2667_v60 = vld [vmem:[#allocation2 + $0x34] ss:$12 sps:$4 sm:$0xff]  }
 0x20f   : > { %v3233_v62 = vld [vmem:[#allocation2 + $0x34] ss:$12 sps:$4 sm:$0xff]   ;;  %v2671_v63 = vld [vmem:[#allocation2 + $0x1c] ss:$12 sps:$4 sm:$0xff]   ;;  %v3272_v4 = vld [vmem:[#allocation2 + $0x64] ss:$12 sps:$4 sm:$0xff]  }
 0x210   : > { %v3244_v2 = vld [vmem:[#allocation2 + $0x1c] ss:$12 sps:$4 sm:$0xff]   ;;  %v3280_v7 = vld [vmem:[#allocation2 + $0x4c] ss:$12 sps:$4 sm:$0xff]   ;;  %v2681_v30 = vld [vmem:[#allocation2 + $0x64] ss:$12 sps:$4 sm:$0xff]  }
 0x211   : > { %1047 = vrot.lane.b32.xlu1 %v2656_v51, %s2850_s22  ;;  %1052 = vrot.lane.b32.xlu0 %v2656_v51, %s2849_s21  ;;  %v3326_v1 = vld [vmem:[#allocation2 + $0x64] ss:$12 sps:$4 sm:$0xff]   ;;  %v2685_v40 = vld [vmem:[#allocation2 + $0x4c] ss:$12 sps:$4 sm:$0xff]  }
 0x212   : > { %v3339_v45 = vld [vmem:[#allocation2 + $0x4c] ss:$12 sps:$4 sm:$0xff]  }
 0x215   : > { %1042 = vrot.lane.b32.xlu1 %v2656_v51, %s2852_s24  ;;  %1040 = vrot.lane.b32.xlu0 %v2654_v50, %s2852_s24 }
 0x219   : > { %1030 = vrot.lane.b32.xlu0 %v2657_v52, %s2855_s28  ;;  %1020 = vrot.lane.b32.xlu1 %v3199_v53, %s2848_s20 }
 0x21d   : > { %1022 = vrot.lane.b32.xlu0 %v3201_v54, %s2848_s20  ;;  %1015 = vrot.lane.b32.xlu1 %v3199_v53, %s2851_s23 }
 0x221   : > { %1017 = vrot.lane.b32.xlu0 %v3201_v54, %s2851_s23  ;;  %1010 = vrot.lane.b32.xlu1 %v3199_v53, %s2853_s25 }
 0x225   : > { %1012 = vrot.lane.b32.xlu0 %v3201_v54, %s2853_s25  ;;  %1055 = vrot.lane.b32.xlu1 %v2654_v50, %s3714_s10 }
 0x229   : > { %1057 = vrot.lane.b32.xlu0 %v2656_v51, %s3714_s10  ;;  %1393 = vrot.lane.b32.xlu1 %v2661_v55, %s2849_s21 }
 0x22d   : > { %1395 = vrot.lane.b32.xlu0 %v2663_v57, %s2849_s21  ;;  %1222 = vrot.lane.b32.xlu1 %v2664_v58, %s2849_s21 }
 0x231   : > { %1224 = vrot.lane.b32.xlu0 %v2666_v59, %s2849_s21  ;;  %1388 = vrot.lane.b32.xlu1 %v2661_v55, %s2850_s22 }
 0x235   : > { %1390 = vrot.lane.b32.xlu0 %v2663_v57, %s2850_s22  ;;  %1217 = vrot.lane.b32.xlu1 %v2664_v58, %s2850_s22 }
 0x239   : > { %1219 = vrot.lane.b32.xlu0 %v2666_v59, %s2850_s22  ;;  %1383 = vrot.lane.b32.xlu1 %v2661_v55, %s2852_s24 }
 0x23d   : > { %1385 = vrot.lane.b32.xlu0 %v2663_v57, %s2852_s24  ;;  %1212 = vrot.lane.b32.xlu1 %v2664_v58, %s2852_s24 }
 0x241   : > { %1214 = vrot.lane.b32.xlu0 %v2666_v59, %s2852_s24  ;;  %1373 = vrot.lane.b32.xlu1 %v2667_v60, %s2855_s28 }
 0x245   : > { %1363 = vrot.lane.b32.xlu0 %v3231_v61, %s2848_s20  ;;  %1365 = vrot.lane.b32.xlu1 %v3233_v62, %s2848_s20 }
 0x249   : > { %1202 = vrot.lane.b32.xlu0 %v2671_v63, %s2855_s28  ;;  %1192 = vrot.lane.b32.xlu1 %v3239_v0, %s2848_s20 }
 0x24d   : > { %1194 = vrot.lane.b32.xlu0 %v3244_v2, %s2848_s20  ;;  %1358 = vrot.lane.b32.xlu1 %v3231_v61, %s2851_s23 }
 0x251   : > { %1360 = vrot.lane.b32.xlu0 %v3233_v62, %s2851_s23  ;;  %1187 = vrot.lane.b32.xlu1 %v3239_v0, %s2851_s23 }
 0x255   : > { %1189 = vrot.lane.b32.xlu0 %v3244_v2, %s2851_s23  ;;  %1353 = vrot.lane.b32.xlu1 %v3231_v61, %s2853_s25 }
 0x259   : > { %1355 = vrot.lane.b32.xlu0 %v3233_v62, %s2853_s25  ;;  %1182 = vrot.lane.b32.xlu1 %v3239_v0, %s2853_s25 }
 0x25d   : > { %1184 = vrot.lane.b32.xlu0 %v3244_v2, %s2853_s25  ;;  %1398 = vrot.lane.b32.xlu1 %v2661_v55, %s3714_s10 }
 0x261   : > { %1400 = vrot.lane.b32.xlu0 %v2663_v57, %s3714_s10  ;;  %1229 = vrot.lane.b32.xlu1 %v2666_v59, %s3714_s10 }
 0x265   : > { %1227 = vrot.lane.b32.xlu0 %v2664_v58, %s3714_s10  ;;  %1737 = vrot.lane.b32.xlu1 %v3267_v3, %s2849_s21 }
 0x269   : > { %1735 = vrot.lane.b32.xlu0 %v3272_v4, %s2849_s21  ;;  %1566 = vrot.lane.b32.xlu1 %v3274_v6, %s2849_s21 }
 0x26d   : > { %1564 = vrot.lane.b32.xlu0 %v3280_v7, %s2849_s21  ;;  %1732 = vrot.lane.b32.xlu1 %v3267_v3, %s2850_s22 }
 0x271   : > { %1730 = vrot.lane.b32.xlu0 %v3272_v4, %s2850_s22  ;;  %1561 = vrot.lane.b32.xlu1 %v3274_v6, %s2850_s22 }
 0x275   : > { %1559 = vrot.lane.b32.xlu0 %v3280_v7, %s2850_s22 }
 0x279   : > { %1725 = vrot.lane.b32.xlu0 %v3272_v4, %s2852_s24 }
 0x27f   : > { %v1046_v9 = vpop.permute.xlu1 %1045  ;;  %v1051_v29 = vpop.permute.xlu0 %1050 }
 0x280   : > { %1097 = vrot.lane.b32.xlu1 %v1051_v29, %s2860_s26 }
 0x283   : > { %v1048_v10 = vpop.permute.xlu1 %1047  ;;  %v1053_v11 = vpop.permute.xlu0 %1052 }
 0x284   : > { %1093 = vrot.lane.b32.xlu1 %v1046_v9, %s2860_s26  ;;  %v1054_v12 = vsel %vm500_vm1, %v1051_v29, %v1053_v11  ;;  %v1049_v16 = vsel %vm487_vm3, %v1046_v9, %v1048_v10 }
 0x285   : > { %1099 = vrot.lane.b32.xlu0 %v1054_v12, %s2860_s26 }
 0x287   : > { %v1043_v13 = vpop.permute.xlu1 %1042  ;;  %v1041_v15 = vpop.permute.xlu0 %1040 }
 0x288   : > { %1089 = vrot.lane.b32.xlu1 %v1041_v15, %s2860_s26  ;;  %v1044_v18 = vsel %vm474_vm5, %v1041_v15, %v1043_v13 }
 0x289   : > { %1095 = vrot.lane.b32.xlu0 %v1049_v16, %s2860_s26 }
 0x28b   : > { %v1031_v17 = vpop.permute.xlu0 %1030  ;;  %v1021_v38 = vpop.permute.xlu1 %1020 }
 0x28c   : > { %1087 = vrot.lane.b32.xlu1 %v1031_v17, %s2860_s26 }
 0x28d   : > { %1091 = vrot.lane.b32.xlu0 %v1044_v18, %s2860_s26 }
 0x28f   : > { %v1023_v19 = vpop.permute.xlu0 %1022  ;;  %v1016_v20 = vpop.permute.xlu1 %1015 }
 0x290   : > { %1085 = vrot.lane.b32.xlu1 %v1023_v19, %s2860_s26  ;;  %v1024_v21 = vsel %vm448_vm2, %v1021_v38, %v1023_v19 }
 0x291   : > { %1083 = vrot.lane.b32.xlu0 %v1024_v21, %s2860_s26 }
 0x293   : > { %v1018_v22 = vpop.permute.xlu0 %1017  ;;  %v1011_v47 = vpop.permute.xlu1 %1010 }
 0x294   : > { %1081 = vrot.lane.b32.xlu1 %v1018_v22, %s2860_s26  ;;  %v1019_v23 = vsel %vm435_vm4, %v1016_v20, %v1018_v22 }
 0x295   : > { %1079 = vrot.lane.b32.xlu0 %v1019_v23, %s2860_s26 }
 0x297   : > { %v1013_v24 = vpop.permute.xlu0 %1012  ;;  %v1056_v26 = vpop.permute.xlu1 %1055 }
 0x298   : > { %1727 = vrot.lane.b32.xlu1 %v3267_v3, %s2852_s24  ;;  %v1014_v27 = vsel %vm422_vm6, %v1011_v47, %v1013_v24 }
 0x299   : > { %1075 = vrot.lane.b32.xlu0 %v1014_v27, %s2860_s26 }
 0x29b   : > { %v1058_v28 = vpop.permute.xlu0 %1057  ;;  %v1394_v56 = vpop.permute.xlu1 %1393 }
 0x29c   : > { %1077 = vrot.lane.b32.xlu1 %v1013_v24, %s2860_s26  ;;  %v1059_v42 = vsel %vm513_vm8, %v1056_v26, %v1058_v28 }
 0x29d   : > { %1554 = vrot.lane.b32.xlu0 %v3280_v7, %s2852_s24 }
 0x29f   : > { %v1396_v31 = vpop.permute.xlu0 %1395  ;;  %v1223_v32 = vpop.permute.xlu1 %1222 }
 0x2a0   : > { %1556 = vrot.lane.b32.xlu1 %v3274_v6, %s2852_s24  ;;  %v1397_v51 = vsel %vm500_vm1, %v1394_v56, %v1396_v31 }
 0x2a1   : > { %1715 = vrot.lane.b32.xlu0 %v2681_v30, %s2855_s28 }
 0x2a3   : > { %v1225_v33 = vpop.permute.xlu0 %1224  ;;  %v1389_v34 = vpop.permute.xlu1 %1388 }
 0x2a4   : > { %1071 = vrot.lane.b32.xlu1 %v3199_v53, %s2860_s26  ;;  %v1226_v59 = vsel %vm500_vm1, %v1223_v32, %v1225_v33 }
 0x2a5   : > { %1073 = vrot.lane.b32.xlu0 %v3201_v54, %s2860_s26 }
 0x2a7   : > { %v1391_v36 = vpop.permute.xlu0 %1390  ;;  %v1218_v39 = vpop.permute.xlu1 %1217 }
 0x2a8   : > { %1705 = vrot.lane.b32.xlu1 %v3322_v35, %s2848_s20  ;;  %v1392_v9 = vsel %vm487_vm3, %v1389_v34, %v1391_v36 }
 0x2a9   : > { %1707 = vrot.lane.b32.xlu0 %v3326_v1, %s2848_s20 }
 0x2ab   : > { %v1220_v14 = vpop.permute.xlu0 %1219  ;;  %v1384_v25 = vpop.permute.xlu1 %1383 }
 0x2ac   : > { %1544 = vrot.lane.b32.xlu1 %v2685_v40, %s2855_s28  ;;  %v1221_v13 = vsel %vm487_vm3, %v1218_v39, %v1220_v14 }
 0x2ad   : > { %1101 = vrot.lane.b32.xlu0 %v1056_v26, %s2860_s26 }
 0x2af   : > { %v1386_v43 = vpop.permute.xlu0 %1385  ;;  %v1213_v44 = vpop.permute.xlu1 %1212 }
 0x2b0   : > { %1103 = vrot.lane.b32.xlu1 %v1059_v42, %s2860_s26  ;;  %v1387_v17 = vsel %vm474_vm5, %v1384_v25, %v1386_v43 }
 0x2b1   : > { %1534 = vrot.lane.b32.xlu0 %v3334_v37, %s2848_s20 }
 0x2b3   : > { %v1215_v46 = vpop.permute.xlu0 %1214  ;;  %v1374_v48 = vpop.permute.xlu1 %1373 }
 0x2b4   : > { %1536 = vrot.lane.b32.xlu1 %v3339_v45, %s2848_s20  ;;  %v1216_v20 = vsel %vm474_vm5, %v1213_v44, %v1215_v46  ;;  %v2697_v46 = vld [vmem:[#allocation3 + $0x14] ss:$8 sps:$4 sm:$0xff]  }
 0x2b5   : > { %1700 = vrot.lane.b32.xlu0 %v3322_v35, %s2851_s23  ;;  %2342 = vmatprep.mubr.msk.bf16.mxu0 %vm1123_vm10, %v2697_v46 }
 0x2b7   : > { %v1364_v49 = vpop.permute.xlu0 %1363  ;;  %v1366_v50 = vpop.permute.xlu1 %1365 }
 0x2b8   : > { %1702 = vrot.lane.b32.xlu1 %v3326_v1, %s2851_s23  ;;  %v1367_v47 = vsel %vm448_vm2, %v1364_v49, %v1366_v50 }
 0x2b9   : > { %1441 = vrot.lane.b32.xlu0 %v1394_v56, %s2860_s26 }
 0x2bb   : > { %v1203_v52 = vpop.permute.xlu0 %1202  ;;  %v1193_v53 = vpop.permute.xlu1 %1192 }
 0x2bc   : > { %1443 = vrot.lane.b32.xlu1 %v1397_v51, %s2860_s26 }
 0x2bd   : > { %1529 = vrot.lane.b32.xlu0 %v3334_v37, %s2851_s23 }
 0x2bf   : > { %v1195_v54 = vpop.permute.xlu0 %1194  ;;  %v1359_v55 = vpop.permute.xlu1 %1358 }
 0x2c0   : > { %1531 = vrot.lane.b32.xlu1 %v3339_v45, %s2851_s23  ;;  %v1196_v24 = vsel %vm448_vm2, %v1193_v53, %v1195_v54 }
 0x2c1   : > { %1695 = vrot.lane.b32.xlu0 %v3322_v35, %s2853_s25 }
 0x2c3   : > { %v1361_v57 = vpop.permute.xlu0 %1360  ;;  %v1188_v58 = vpop.permute.xlu1 %1187 }
 0x2c4   : > { %1697 = vrot.lane.b32.xlu1 %v3326_v1, %s2853_s25 }
 0x2c5   : > { %1270 = vrot.lane.b32.xlu0 %v1223_v32, %s2860_s26 }
 0x2c7   : > { %v1190_v60 = vpop.permute.xlu0 %1189  ;;  %v1354_v63 = vpop.permute.xlu1 %1353 }
 0x2c8   : > { %1272 = vrot.lane.b32.xlu1 %v1226_v59, %s2860_s26  ;;  %v1191_v28 = vsel %vm435_vm4, %v1188_v58, %v1190_v60 }
 0x2c9   : > { %1437 = vrot.lane.b32.xlu0 %v1389_v34, %s2860_s26 }
 0x2cb   : > { %v1356_v29 = vpop.permute.xlu0 %1355  ;;  %v1183_v10 = vpop.permute.xlu1 %1182 }
 0x2cc   : > { %1439 = vrot.lane.b32.xlu1 %v1392_v9, %s2860_s26  ;;  %v1357_v31 = vsel %vm422_vm6, %v1354_v63, %v1356_v29 }
 0x2cd   : > { %1524 = vrot.lane.b32.xlu0 %v3334_v37, %s2853_s25 }
 0x2cf   : > { %v1185_v11 = vpop.permute.xlu0 %1184  ;;  %v3368_v12 = vpop.permute.xlu1 %1398 }
 0x2d0   : > { %1526 = vrot.lane.b32.xlu1 %v3339_v45, %s2853_s25  ;;  %v1186_v36 = vsel %vm422_vm6, %v1183_v10, %v1185_v11 }
 0x2d1   : > { %1266 = vrot.lane.b32.xlu0 %v1218_v39, %s2860_s26 }
 0x2d3   : > { %v3374_v15 = vpop.permute.xlu0 %1400  ;;  %v3377_v16 = vpop.permute.xlu1 %1229 }
 0x2d4   : > { %1268 = vrot.lane.b32.xlu1 %v1221_v13, %s2860_s26 }
 0x2d5   : > { %1433 = vrot.lane.b32.xlu0 %v1384_v25, %s2860_s26 }
 0x2d7   : > { %v3381_v38 = vpop.permute.xlu0 %1227  ;;  %v3386_v18 = vpop.permute.xlu1 %1737 }
 0x2d8   : > { %1435 = vrot.lane.b32.xlu1 %v1387_v17, %s2860_s26  ;;  %v1231_v51 = vsel %vm513_vm8, %v3381_v38, %v3377_v16 }
 0x2d9   : > { %1740 = vrot.lane.b32.xlu0 %v3272_v4, %s3714_s10 }
 0x2db   : > { %v3388_v19 = vpop.permute.xlu0 %1735  ;;  %v3397_v22 = vpop.permute.xlu1 %1566 }
 0x2dc   : > { %1742 = vrot.lane.b32.xlu1 %v3267_v3, %s3714_s10 }
 0x2dd   : > { %1262 = vrot.lane.b32.xlu0 %v1213_v44, %s2860_s26 }
 0x2df   : > { %v3394_v21 = vpop.permute.xlu0 %1564  ;;  %v3406_v3 = vpop.permute.xlu1 %1732 }
 0x2e0   : > { %1264 = vrot.lane.b32.xlu1 %v1216_v20, %s2860_s26  ;;  %v1568_v59 = vsel %vm500_vm1, %v3394_v21, %v3397_v22 }
 0x2e1   : > { %1431 = vrot.lane.b32.xlu0 %v1374_v48, %s2860_s26 }
 0x2e3   : > { %v3404_v4 = vpop.permute.xlu0 %1730 }
 0x2e4   : > { %1569 = vrot.lane.b32.xlu1 %v3280_v7, %s3714_s10  ;;  %v3415_v7 = vpop.permute.xlu1 %1561 }
 0x2e5   : > { %1571 = vrot.lane.b32.xlu0 %v3274_v6, %s3714_s10  ;;  %v1362_v6 = vsel %vm435_vm4, %v1359_v55, %v1361_v57  ;;  %v1739_v55 = vsel %vm500_vm1, %v3388_v19, %v3386_v18  ;;  %v2692_v18 = vld [vmem:[#allocation3 + $0x24] ss:$8 sps:$4 sm:$0xff]  }
 0x2e7   : > { %v3411_v23 = vpop.permute.xlu0 %1559 }
 0x2e8   : > { %1427 = vrot.lane.b32.xlu1 %v1367_v47, %s2860_s26 }
 0x2e9   : > { %1429 = vrot.lane.b32.xlu0 %v1366_v50, %s2860_s26 }
 0x2eb   : > { %v3421_v26 = vpop.permute.xlu0 %1725 }
 0x2ec   : > { %1260 = vrot.lane.b32.xlu1 %v1203_v52, %s2860_s26 }
 0x2ed   : > { %1256 = vrot.lane.b32.xlu0 %v1196_v24, %s2860_s26 }
 0x2f0   : > { %1258 = vrot.lane.b32.xlu1 %v1195_v54, %s2860_s26 }
 0x2f1   : > { %1423 = vrot.lane.b32.xlu0 %v1362_v6, %s2860_s26 }
 0x2f2   : > { %v1098_v27 = vpop.permute.xlu1 %1097 }
 0x2f4   : > { %1425 = vrot.lane.b32.xlu1 %v1361_v57, %s2860_s26 }
 0x2f5   : > { %1252 = vrot.lane.b32.xlu0 %v1191_v28, %s2860_s26 }
 0x2f6   : > { %v1094_v56 = vpop.permute.xlu1 %1093 }
 0x2f7   : > { %v1100_v30 = vpop.permute.xlu0 %1099 }
 0x2f8   : > { %1254 = vrot.lane.b32.xlu1 %v1190_v60, %s2860_s26  ;;  %v1112_v32 = vsel %vm1105_vm11, %v1098_v27, %v1100_v30 }
 0x2f9   : > { %1419 = vrot.lane.b32.xlu0 %v1357_v31, %s2860_s26  ;;  %1128 = vmatpush1.bf16.msra.mxu1 %v1112_v32 }
 0x2fa   : > { %v1090_v33 = vpop.permute.xlu1 %1089  ;;  %1129 = vmatprep.subr.bf16.mxu1 %v2858_v8 }
 0x2fb   : > { %v1096_v34 = vpop.permute.xlu0 %1095 }
 0x2fc   : > { %1421 = vrot.lane.b32.xlu1 %v1356_v29, %s2860_s26  ;;  %v1111_v39 = vsel %vm1105_vm11, %v1094_v56, %v1096_v34  ;;  %v1734_v29 = vsel %vm487_vm3, %v3404_v4, %v3406_v3 }
 0x2fd   : > { %1248 = vrot.lane.b32.xlu0 %v1186_v36, %s2860_s26  ;;  %1130 = vmatpush1.bf16.msra.mxu1 %v1111_v39 }
 0x2fe   : > { %v1088_v40 = vpop.permute.xlu1 %1087  ;;  %1131 = vmatprep.subr.bf16.mxu1 %v2858_v8 }
 0x2ff   : > { %v1092_v14 = vpop.permute.xlu0 %1091 }
 0x300   : > { %1250 = vrot.lane.b32.xlu1 %v1185_v11, %s2860_s26  ;;  %v1110_v25 = vsel %vm1105_vm11, %v1090_v33, %v1092_v14 }
 0x301   : > { %1415 = vrot.lane.b32.xlu0 %v3231_v61, %s2860_s26  ;;  %1132 = vmatpush1.bf16.msra.mxu1 %v1110_v25 }
 0x302   : > { %v1086_v41 = vpop.permute.xlu1 %1085  ;;  %1133 = vmatprep.subr.bf16.mxu1 %v2858_v8 }
 0x303   : > { %v1084_v42 = vpop.permute.xlu0 %1083 }
 0x304   : > { %1417 = vrot.lane.b32.xlu1 %v3233_v62, %s2860_s26  ;;  %v1109_v61 = vsel %vm1105_vm11, %v1084_v42, %v1086_v41  ;;  %v1402_v62 = vsel %vm513_vm8, %v3368_v12, %v3374_v15 }
 0x305   : > { %1244 = vrot.lane.b32.xlu0 %v3239_v0, %s2860_s26  ;;  %1134 = vmatpush1.bf16.msra.mxu1 %v1088_v40 }
 0x306   : > { %v1082_v43 = vpop.permute.xlu1 %1081  ;;  %1135 = vmatprep.subr.bf16.mxu1 %v2858_v8 }
 0x307   : > { %v1080_v44 = vpop.permute.xlu0 %1079 }
 0x308   : > { %1246 = vrot.lane.b32.xlu1 %v3244_v2, %s2860_s26  ;;  %v1108_v2 = vsel %vm1105_vm11, %v1080_v44, %v1082_v43 }
 0x309   : > { %1445 = vrot.lane.b32.xlu0 %v3368_v12, %s2860_s26  ;;  %1136 = vmatpush1.bf16.msra.mxu1 %v1109_v61  ;;  %v1563_v12 = vsel %vm487_vm3, %v3411_v23, %v3415_v7 }
 0x30a   : > { %v1728_v48 = vpop.permute.xlu1 %1727  ;;  %1137 = vmatprep.subr.bf16.mxu1 %v2858_v8 }
 0x30b   : > { %v1076_v0 = vpop.permute.xlu0 %1075  ;;  %v1729_v15 = vsel %vm474_vm5, %v3421_v26, %v1728_v48 }
 0x30c   : > { %1447 = vrot.lane.b32.xlu1 %v1402_v62, %s2860_s26 }
 0x30d   : > { %1274 = vrot.lane.b32.xlu0 %v3381_v38, %s2860_s26  ;;  %1138 = vmatpush1.bf16.msra.mxu1 %v1108_v2  ;;  %v2689_v38 = vld [vmem:[#allocation3] ss:$8 sps:$4 sm:$0xff]  }
 0x30e   : > { %v1078_v49 = vpop.permute.xlu1 %1077  ;;  %1139 = vmatprep.subr.bf16.mxu1 %v2858_v8 }
 0x30f   : > { %v1555_v50 = vpop.permute.xlu0 %1554  ;;  %v1107_v52 = vsel %vm1105_vm11, %v1076_v0, %v1078_v49 }
 0x310   : > { %1276 = vrot.lane.b32.xlu1 %v1231_v51, %s2860_s26  ;;  %v1859_v51 = vld [vmem:[%s3705_s6 + $0x40] sm:$0xff] }
 0x311   : > { %1782 = vrot.lane.b32.xlu0 %v3388_v19, %s2860_s26  ;;  %1140 = vmatpush1.bf16.msra.mxu1 %v1107_v52 }
 0x312   : > { %v1557_v53 = vpop.permute.xlu1 %1556  ;;  %1141 = vmatprep.subr.bf16.mxu1 %v2858_v8 }
 0x313   : > { %v1716_v54 = vpop.permute.xlu0 %1715  ;;  %v1558_v20 = vsel %vm474_vm5, %v1555_v50, %v1557_v53  ;;  %v1860_v53 = vld [vmem:[%s3705_s6 + $0x48] sm:$0xff] }
 0x314   : > { %1784 = vrot.lane.b32.xlu1 %v1739_v55, %s2860_s26 }
 0x315   : > { %1612 = vrot.lane.b32.xlu0 %v3394_v21, %s2860_s26 }
 0x316   : > { %v1072_v57 = vpop.permute.xlu1 %1071 }
 0x317   : > { %v1074_v58 = vpop.permute.xlu0 %1073 }
 0x318   : > { %1614 = vrot.lane.b32.xlu1 %v1568_v59, %s2860_s26  ;;  %v1106_v60 = vsel %vm1105_vm11, %v1072_v57, %v1074_v58  ;;  %v1858_v57 = vld [vmem:[%s3705_s6 + $0x38] sm:$0xff]  ;;  %v1857_v59 = vld [vmem:[%s3705_s6 + $0x30] sm:$0xff] }
 0x319   : > { %1778 = vrot.lane.b32.xlu0 %v3404_v4, %s2860_s26  ;;  %1142 = vmatpush1.bf16.msra.mxu1 %v1106_v60 }
 0x31a   : > { %v1706_v63 = vpop.permute.xlu1 %1705  ;;  %1157 = vmatprep.subr.bf16.mxu1 %v2858_v8 }
 0x31b   : > { %v1708_v9 = vpop.permute.xlu0 %1707 }
 0x31c   : > { %1780 = vrot.lane.b32.xlu1 %v1734_v29, %s2860_s26  ;;  %v1709_v3 = vsel %vm448_vm2, %v1706_v63, %v1708_v9  ;;  %v1856_v63 = vld [vmem:[%s3705_s6 + $0x28] sm:$0xff]  ;;  %v1855_v29 = vld [vmem:[%s3705_s6 + $0x20] sm:$0xff] }
 0x31d   : > { %1608 = vrot.lane.b32.xlu0 %v3411_v23, %s2860_s26 }
 0x31e   : > { %v1545_v10 = vpop.permute.xlu1 %1544 }
 0x31f   : > { %v1102_v11 = vpop.permute.xlu0 %1101 }
 0x320   : > { %1610 = vrot.lane.b32.xlu1 %v1563_v12, %s2860_s26  ;;  %v1854_v12 = vld [vmem:[%s3705_s6 + $0x18] sm:$0xff] }
 0x321   : > { %1774 = vrot.lane.b32.xlu0 %v3421_v26, %s2860_s26 }
 0x322   : > { %v1104_v13 = vpop.permute.xlu1 %1103 }
 0x323   : > { %v1535_v16 = vpop.permute.xlu0 %1534  ;;  %v1113_v17 = vsel %vm1105_vm11, %v1102_v11, %v1104_v13 }
 0x324   : > { %1776 = vrot.lane.b32.xlu1 %v1729_v15, %s2860_s26  ;;  %1158 = vmatpush2.bf16.msra.mxu1 %v1113_v17  ;;  %v1853_v15 = vld [vmem:[%s3705_s6 + $0x10] sm:$0xff] }
 0x325   : > { %1604 = vrot.lane.b32.xlu0 %v1555_v50, %s2860_s26  ;;  %1469 = vmatprep.subr.bf16.mxu1 %v2858_v8 }
 0x326   : > { %v1537_v19 = vpop.permute.xlu1 %1536 }
 0x327   : > { %v1701_v21 = vpop.permute.xlu0 %1700  ;;  %1160 = vmatmul.mubr.bf16.vlgmr.msra.gmra.mxu1 %v2689_v38  ;;  %v1538_v7 = vsel %vm448_vm2, %v1535_v16, %v1537_v19  ;;  %v1852_v38 = vld [vmem:[%s3705_s6 + $0x8] sm:$0xff] }
 0x328   : > { %1606 = vrot.lane.b32.xlu1 %v1558_v20, %s2860_s26  ;;  %2350 = vmatprep.mubr.msk.bf16.mxu1 %vm1123_vm10, %v2692_v18 }
 0x329   : > { %1772 = vrot.lane.b32.xlu0 %v1716_v54, %s2860_s26 }
 0x32a   : > { %v1703_v22 = vpop.permute.xlu1 %1702 }
 0x32b   : > { %v1442_v4 = vpop.permute.xlu0 %1441  ;;  %v1704_v27 = vsel %vm435_vm4, %v1701_v21, %v1703_v22 }
 0x32c   : > { %1768 = vrot.lane.b32.xlu1 %v1709_v3, %s2860_s26  ;;  %v2005_v3 = vld [vmem:[#allocation7] sm:$0xff] }
 0x32d   : > { %1770 = vrot.lane.b32.xlu0 %v1708_v9, %s2860_s26 }
 0x32e   : > { %v1444_v47 = vpop.permute.xlu1 %1443 }
 0x32f   : > { %v1455_v23 = vsel %vm1105_vm11, %v1442_v4, %v1444_v47  ;;  %v1530_v24 = vpop.permute.xlu0 %1529 }
 0x330   : > { %1602 = vrot.lane.b32.xlu1 %v1545_v10, %s2860_s26  ;;  %1470 = vmatpush1.bf16.msra.mxu1 %v1455_v23 }
 0x331   : > { %1598 = vrot.lane.b32.xlu0 %v1538_v7, %s2860_s26  ;;  %1471 = vmatprep.subr.bf16.mxu1 %v2858_v8 }
 0x332   : > { %v1532_v6 = vpop.permute.xlu1 %1531 }
 0x333   : > { %v1696_v26 = vpop.permute.xlu0 %1695  ;;  %v1533_v30 = vsel %vm435_vm4, %v1530_v24, %v1532_v6  ;;  %v2008_v24 = vld [vmem:[#allocation7 + $0x18] sm:$0xff] }
 0x334   : > { %1600 = vrot.lane.b32.xlu1 %v1537_v19, %s2860_s26  ;;  %v1851_v19 = vld [vmem:[%s3705_s6] sm:$0xff] }
 0x335   : > { %1764 = vrot.lane.b32.xlu0 %v1704_v27, %s2860_s26 }
 0x336   : > { %v1698_v28 = vpop.permute.xlu1 %1697 }
 0x337   : > { %v1271_v56 = vpop.permute.xlu0 %1270  ;;  %v1699_v34 = vsel %vm422_vm6, %v1696_v26, %v1698_v28 }
 0x338   : > { %1766 = vrot.lane.b32.xlu1 %v1703_v22, %s2860_s26  ;;  %v2006_v22 = vld [vmem:[#allocation7 + $0x8] sm:$0xff] }
 0x339   : > { %1594 = vrot.lane.b32.xlu0 %v1533_v30, %s2860_s26  ;;  %v2009_v30 = vld [vmem:[#allocation7 + $0x20] sm:$0xff] }
 0x33a   : > { %v1273_v31 = vpop.permute.xlu1 %1272 }
 0x33b   : > { %v1438_v32 = vpop.permute.xlu0 %1437  ;;  %v1284_v33 = vsel %vm1105_vm11, %v1271_v56, %v1273_v31 }
 0x33c   : > { %1596 = vrot.lane.b32.xlu1 %v1532_v6, %s2860_s26  ;;  %1299 = vmatpush1.bf16.msra.mxu0 %v1284_v33  ;;  %v2007_v6 = vld [vmem:[#allocation7 + $0x10] sm:$0xff]  ;;  %v2012_v33 = vld [vmem:[#allocation7 + $0x38] sm:$0xff] }
 0x33d   : > { %1760 = vrot.lane.b32.xlu0 %v1699_v34, %s2860_s26  ;;  %1300 = vmatprep.subr.bf16.mxu0 %v2858_v8 }
 0x33e   : > { %v1440_v36 = vpop.permute.xlu1 %1439 }
 0x33f   : > { %v1454_v39 = vsel %vm1105_vm11, %v1438_v32, %v1440_v36  ;;  %v1525_v40 = vpop.permute.xlu0 %1524  ;;  %v2011_v36 = vld [vmem:[#allocation7 + $0x30] sm:$0xff] }
 0x340   : > { %1762 = vrot.lane.b32.xlu1 %v1698_v28, %s2860_s26  ;;  %1472 = vmatpush1.bf16.msra.mxu1 %v1454_v39  ;;  %v2010_v28 = vld [vmem:[#allocation7 + $0x28] sm:$0xff] }
 0x341   : > { %1473 = vmatprep.subr.bf16.mxu1 %v2858_v8 }
 0x342   : > { %v1527_v14 = vpop.permute.xlu1 %1526 }
 0x343   : > { %v1528_v25 = vsel %vm422_vm6, %v1525_v40, %v1527_v14  ;;  %v1267_v41 = vpop.permute.xlu0 %1266 }
 0x344   : > { %1590 = vrot.lane.b32.xlu0 %v1528_v25, %s2860_s26  ;;  %1592 = vrot.lane.b32.xlu1 %v1527_v14, %s2860_s26  ;;  %v2013_v25 = vld [vmem:[#allocation7 + $0x40] sm:$0xff] }
 0x346   : > { %v1269_v42 = vpop.permute.xlu1 %1268 }
 0x347   : > { %v1434_v43 = vpop.permute.xlu0 %1433  ;;  %v1283_v44 = vsel %vm1105_vm11, %v1267_v41, %v1269_v42 }
 0x348   : > { %1756 = vrot.lane.b32.xlu0 %v3322_v35, %s2860_s26  ;;  %1758 = vrot.lane.b32.xlu1 %v3326_v1, %s2860_s26 }
 0x349   : > { %1301 = vmatpush1.bf16.msra.mxu0 %v1283_v44  ;;  %v2698_v44 = vld [vmem:[#allocation5 + $0x4] ss:$8 sps:$4 sm:$0xff]  }
 0x34a   : > { %v1436_v46 = vpop.permute.xlu1 %1435  ;;  %1302 = vmatprep.subr.bf16.mxu0 %v2858_v8 }
 0x34b   : > { %v1453_v61 = vsel %vm1105_vm11, %v1434_v43, %v1436_v46  ;;  %v1741_v48 = vpop.permute.xlu0 %1740  ;;  %v2694_v43 = vld [vmem:[#allocation3 + $0x20] ss:$8 sps:$4 sm:$0xff]  }
 0x34c   : > { %1586 = vrot.lane.b32.xlu0 %v3334_v37, %s2860_s26  ;;  %1588 = vrot.lane.b32.xlu1 %v3339_v45, %s2860_s26 }
 0x34d   : > { %1474 = vmatpush1.bf16.msra.mxu1 %v1453_v61 }
 0x34e   : > { %v1743_v62 = vpop.permute.xlu1 %1742  ;;  %1475 = vmatprep.subr.bf16.mxu1 %v2858_v8 }
 0x34f   : > { %v1744_v35 = vsel %vm513_vm8, %v1741_v48, %v1743_v62  ;;  %v1263_v1 = vpop.permute.xlu0 %1262  ;;  %v2695_v62 = vld [vmem:[#allocation3 + $0x10] ss:$8 sps:$4 sm:$0xff]  }
 0x350   : > { %1786 = vrot.lane.b32.xlu0 %v1741_v48, %s2860_s26  ;;  %1788 = vrot.lane.b32.xlu1 %v1744_v35, %s2860_s26  ;;  %v2701_v35 = vld [vmem:[#allocation3 + $0x34] ss:$8 sps:$4 sm:$0xff]  }
 0x352   : > { %v1265_v0 = vpop.permute.xlu1 %1264 }
 0x353   : > { %v1432_v2 = vpop.permute.xlu0 %1431  ;;  %v1282_v49 = vsel %vm1105_vm11, %v1263_v1, %v1265_v0 }
 0x354   : > { %1303 = vmatpush1.bf16.msra.mxu0 %v1282_v49  ;;  %1476 = vmatpush1.bf16.msra.mxu1 %v1432_v2 }
 0x355   : > { %1477 = vmatprep.subr.bf16.mxu1 %v2858_v8  ;;  %1304 = vmatprep.subr.bf16.mxu0 %v2858_v8 }
 0x356   : > { %v1570_v37 = vpop.permute.xlu1 %1569 }
 0x357   : > { %v1572_v45 = vpop.permute.xlu0 %1571  ;;  %1616 = vrot.lane.b32.xlu0 %v1570_v37, %s2860_s26 }
 0x358   : > { %v1573_v50 = vsel %vm513_vm8, %v1570_v37, %v1572_v45 }
 0x359   : > { %1618 = vrot.lane.b32.xlu1 %v1573_v50, %s2860_s26 }
 0x35a   : > { %v1428_v52 = vpop.permute.xlu1 %1427 }
 0x35b   : > { %v1430_v54 = vpop.permute.xlu0 %1429  ;;  %1903 = vperm.xlu0 %2652, %v1859_v51  }
 0x35c   : > { %v1452_v55 = vsel %vm1105_vm11, %v1428_v52, %v1430_v54 }
 0x35d   : > { %1478 = vmatpush1.bf16.msra.mxu1 %v1452_v55  ;;  %1908 = vperm.xlu1 %2653, %v1860_v53  }
 0x35e   : > { %v1261_v58 = vpop.permute.xlu1 %1260  ;;  %1479 = vmatprep.subr.bf16.mxu1 %v2858_v8 }
 0x35f   : > { %v1257_v60 = vpop.permute.xlu0 %1256  ;;  %1305 = vmatpush1.bf16.msra.mxu0 %v1261_v58  ;;  %1898 = vperm.xlu0 %2652, %v1858_v57  }
 0x360   : > { %1306 = vmatprep.subr.bf16.mxu0 %v2858_v8 }
 0x361   : > { %1893 = vperm.xlu1 %2653, %v1857_v59  }
 0x362   : > { %v1259_v9 = vpop.permute.xlu1 %1258 }
 0x363   : > { %v1424_v10 = vpop.permute.xlu0 %1423  ;;  %v1281_v11 = vsel %vm1105_vm11, %v1257_v60, %v1259_v9  ;;  %1888 = vperm.xlu0 %2652, %v1856_v63  }
 0x364   : > { %1307 = vmatpush1.bf16.msra.mxu0 %v1281_v11 }
 0x365   : > { %1308 = vmatprep.subr.bf16.mxu0 %v2858_v8  ;;  %1883 = vperm.xlu1 %2653, %v1855_v29  }
 0x366   : > { %v1426_v13 = vpop.permute.xlu1 %1425 }
 0x367   : > { %v1451_v16 = vsel %vm1105_vm11, %v1424_v10, %v1426_v13  ;;  %v1253_v17 = vpop.permute.xlu0 %1252  ;;  %1878 = vperm.xlu0 %2652, %v1854_v12  }
 0x368   : > { %1480 = vmatpush1.bf16.msra.mxu1 %v1451_v16 }
 0x369   : > { %1481 = vmatprep.subr.bf16.mxu1 %v2858_v8  ;;  %1873 = vperm.xlu1 %2653, %v1853_v15  }
 0x36a   : > { %v1255_v18 = vpop.permute.xlu1 %1254 }
 0x36b   : > { %v1420_v20 = vpop.permute.xlu0 %1419  ;;  %v1280_v21 = vsel %vm1105_vm11, %v1253_v17, %v1255_v18  ;;  %1868 = vperm.xlu0 %2652, %v1852_v38  }
 0x36c   : > { %1309 = vmatpush1.bf16.msra.mxu0 %v1280_v21 }
 0x36d   : > { %1310 = vmatprep.subr.bf16.mxu0 %v2858_v8  ;;  %1863 = vperm.xlu1 %2653, %v1851_v19  }
 0x36e   : > { %v1422_v4 = vpop.permute.xlu1 %1421 }
 0x36f   : > { %v1450_v47 = vsel %vm1105_vm11, %v1420_v20, %v1422_v4  ;;  %v1249_v23 = vpop.permute.xlu0 %1248  ;;  %2021 = vperm.xlu0 %2652, %v2006_v22  }
 0x370   : > { %1482 = vmatpush1.bf16.msra.mxu1 %v1450_v47 }
 0x371   : > { %1483 = vmatprep.subr.bf16.mxu1 %v2858_v8  ;;  %2016 = vperm.xlu1 %2653, %v2005_v3  }
 0x372   : > { %v1251_v7 = vpop.permute.xlu1 %1250 }
 0x373   : > { %v1416_v26 = vpop.permute.xlu0 %1415  ;;  %v1279_v27 = vsel %vm1105_vm11, %v1249_v23, %v1251_v7  ;;  %2031 = vperm.xlu0 %2652, %v2008_v24  }
 0x374   : > { %1311 = vmatpush1.bf16.msra.mxu0 %v1279_v27 }
 0x375   : > { %1312 = vmatprep.subr.bf16.mxu0 %v2858_v8  ;;  %2026 = vperm.xlu1 %2653, %v2007_v6  }
 0x376   : > { %v1418_v56 = vpop.permute.xlu1 %1417 }
 0x377   : > { %v1449_v31 = vsel %vm1105_vm11, %v1416_v26, %v1418_v56  ;;  %v1245_v32 = vpop.permute.xlu0 %1244  ;;  %2041 = vperm.xlu0 %2652, %v2010_v28  }
 0x378   : > { %1484 = vmatpush1.bf16.msra.mxu1 %v1449_v31 }
 0x379   : > { %1499 = vmatprep.subr.bf16.mxu1 %v2858_v8  ;;  %2036 = vperm.xlu1 %2653, %v2009_v30  }
 0x37a   : > { %v1247_v34 = vpop.permute.xlu1 %1246 }
 0x37b   : > { %v1446_v39 = vpop.permute.xlu0 %1445  ;;  %v1278_v40 = vsel %vm1105_vm11, %v1245_v32, %v1247_v34  ;;  %2051 = vperm.xlu0 %2652, %v2012_v33   ;;  %v2700_v33 = vld [vmem:[#allocation5] ss:$8 sps:$4 sm:$0xff]  }
 0x37c   : > { %1313 = vmatpush1.bf16.msra.mxu0 %v1278_v40  ;;  %v2703_v40 = vld [vmem:[#allocation3 + $0x30] ss:$8 sps:$4 sm:$0xff]  }
 0x37d   : > { %1328 = vmatprep.subr.bf16.mxu0 %v2858_v8  ;;  %2046 = vperm.xlu1 %2653, %v2011_v36  }
 0x37e   : > { %v1448_v14 = vpop.permute.xlu1 %1447 }
 0x37f   : > { %v1456_v41 = vsel %vm1105_vm11, %v1446_v39, %v1448_v14  ;;  %v1275_v42 = vpop.permute.xlu0 %1274 }
 0x380   : > { %1500 = vmatpush2.bf16.msra.mxu1 %v1456_v41 }
 0x381   : > { %1810 = vmatprep.subr.bf16.mxu1 %v2858_v8  ;;  %2056 = vperm.xlu1 %2653, %v2013_v25  }
 0x382   : > { %v1277_v46 = vpop.permute.xlu1 %1276 }
 0x383   : > { %v1783_v61 = vpop.permute.xlu0 %1782  ;;  %v1285_v48 = vsel %vm1105_vm11, %v1275_v42, %v1277_v46  ;;  %1502 = vmatmul.mubr.bf16.vlgmr.msra.gmra.mxu1 %v2694_v43 }
 0x384   : > { %1329 = vmatpush2.bf16.msra.mxu0 %v1285_v48  ;;  %2366 = vmatprep.mubr.msk.bf16.mxu1 %vm1123_vm10, %v2698_v44 }
 0x385   : > { %1640 = vmatprep.subr.bf16.mxu0 %v2858_v8 }
 0x386   : > { %v1785_v1 = vpop.permute.xlu1 %1784 }
 0x387   : > { %v1796_v0 = vsel %vm1105_vm11, %v1783_v61, %v1785_v1  ;;  %v1613_v2 = vpop.permute.xlu0 %1612  ;;  %1331 = vmatmul.mubr.bf16.vlgmr.msra.gmra.mxu0 %v2695_v62 }
 0x388   : > { %1811 = vmatpush1.bf16.msra.mxu1 %v1796_v0  ;;  %2358 = vmatprep.mubr.msk.bf16.mxu0 %vm1123_vm10, %v2701_v35 }
 0x389   : > { %1812 = vmatprep.subr.bf16.mxu1 %v2858_v8 }
 0x38a   : > { %v1615_v49 = vpop.permute.xlu1 %1614 }
 0x38b   : > { %v1626_v37 = vsel %vm1105_vm11, %v1613_v2, %v1615_v49  ;;  %v1779_v45 = vpop.permute.xlu0 %1778 }
 0x38c   : > { %1641 = vmatpush1.bf16.msra.mxu0 %v1626_v37 }
 0x38d   : > { %1642 = vmatprep.subr.bf16.mxu0 %v2858_v8 }
 0x38e   : > { %v1781_v50 = vpop.permute.xlu1 %1780 }
 0x38f   : > { %v1795_v51 = vsel %vm1105_vm11, %v1779_v45, %v1781_v50  ;;  %v1609_v52 = vpop.permute.xlu0 %1608 }
 0x390   : > { %1813 = vmatpush1.bf16.msra.mxu1 %v1795_v51 }
 0x391   : > { %1814 = vmatprep.subr.bf16.mxu1 %v2858_v8 }
 0x392   : > { %v1611_v53 = vpop.permute.xlu1 %1610 }
 0x393   : > { %v1625_v54 = vsel %vm1105_vm11, %v1609_v52, %v1611_v53  ;;  %v1775_v55 = vpop.permute.xlu0 %1774 }
 0x394   : > { %1643 = vmatpush1.bf16.msra.mxu0 %v1625_v54 }
 0x395   : > { %1644 = vmatprep.subr.bf16.mxu0 %v2858_v8 }
 0x396   : > { %v1777_v57 = vpop.permute.xlu1 %1776 }
 0x397   : > { %v1794_v58 = vsel %vm1105_vm11, %v1775_v55, %v1777_v57  ;;  %v1605_v59 = vpop.permute.xlu0 %1604 }
 0x398   : > { %1815 = vmatpush1.bf16.msra.mxu1 %v1794_v58 }
 0x399   : > { %1816 = vmatprep.subr.bf16.mxu1 %v2858_v8 }
 0x39a   : > { %v1607_v60 = vpop.permute.xlu1 %1606 }
 0x39b   : > { %v1624_v63 = vsel %vm1105_vm11, %v1605_v59, %v1607_v60  ;;  %v1773_v9 = vpop.permute.xlu0 %1772 }
 0x39c   : > { %1645 = vmatpush1.bf16.msra.mxu0 %v1624_v63  ;;  %1817 = vmatpush1.bf16.msra.mxu1 %v1773_v9 }
 0x39d   : > { %1818 = vmatprep.subr.bf16.mxu1 %v2858_v8  ;;  %1646 = vmatprep.subr.bf16.mxu0 %v2858_v8 }
 0x39e   : > { %v1769_v29 = vpop.permute.xlu1 %1768 }
 0x39f   : > { %v1771_v10 = vpop.permute.xlu0 %1770 }
 0x3a0   : > { %v1793_v11 = vsel %vm1105_vm11, %v1769_v29, %v1771_v10 }
 0x3a1   : > { %1819 = vmatpush1.bf16.msra.mxu1 %v1793_v11 }
 0x3a2   : > { %v1603_v12 = vpop.permute.xlu1 %1602  ;;  %1820 = vmatprep.subr.bf16.mxu1 %v2858_v8 }
 0x3a3   : > { %v1599_v13 = vpop.permute.xlu0 %1598  ;;  %1647 = vmatpush1.bf16.msra.mxu0 %v1603_v12 }
 0x3a4   : > { %1648 = vmatprep.subr.bf16.mxu0 %v2858_v8 }
 0x3a6   : > { %v1601_v15 = vpop.permute.xlu1 %1600 }
 0x3a7   : > { %v1623_v16 = vsel %vm1105_vm11, %v1599_v13, %v1601_v15  ;;  %v1765_v17 = vpop.permute.xlu0 %1764 }
 0x3a8   : > { %1649 = vmatpush1.bf16.msra.mxu0 %v1623_v16 }
 0x3a9   : > { %1650 = vmatprep.subr.bf16.mxu0 %v2858_v8 }
 0x3aa   : > { %v1767_v38 = vpop.permute.xlu1 %1766 }
 0x3ab   : > { %v1792_v18 = vsel %vm1105_vm11, %v1765_v17, %v1767_v38  ;;  %v1595_v19 = vpop.permute.xlu0 %1594 }
 0x3ac   : > { %1821 = vmatpush1.bf16.msra.mxu1 %v1792_v18 }
 0x3ad   : > { %1822 = vmatprep.subr.bf16.mxu1 %v2858_v8 }
 0x3ae   : > { %v1597_v20 = vpop.permute.xlu1 %1596 }
 0x3af   : > { %v1622_v21 = vsel %vm1105_vm11, %v1595_v19, %v1597_v20  ;;  %v1761_v22 = vpop.permute.xlu0 %1760 }
 0x3b0   : > { %1651 = vmatpush1.bf16.msra.mxu0 %v1622_v21 }
 0x3b1   : > { %1652 = vmatprep.subr.bf16.mxu0 %v2858_v8 }
 0x3b2   : > { %v1763_v4 = vpop.permute.xlu1 %1762 }
 0x3b3   : > { %v1791_v3 = vsel %vm1105_vm11, %v1761_v22, %v1763_v4 }
 0x3b4   : > { %1823 = vmatpush1.bf16.msra.mxu1 %v1791_v3 }
 0x3b5   : > { %1824 = vmatprep.subr.bf16.mxu1 %v2858_v8 }
 0x3b6   : > { %v1591_v47 = vpop.permute.xlu0 %1590  ;;  %v1593_v23 = vpop.permute.xlu1 %1592 }
 0x3b7   : > { %v1621_v24 = vsel %vm1105_vm11, %v1591_v47, %v1593_v23 }
 0x3b8   : > { %1653 = vmatpush1.bf16.msra.mxu0 %v1621_v24 }
 0x3b9   : > { %1654 = vmatprep.subr.bf16.mxu0 %v2858_v8 }
 0x3ba   : > { %v1757_v7 = vpop.permute.xlu0 %1756  ;;  %v1759_v6 = vpop.permute.xlu1 %1758 }
 0x3bb   : > { %v1790_v26 = vsel %vm1105_vm11, %v1757_v7, %v1759_v6 }
 0x3bc   : > { %1825 = vmatpush1.bf16.msra.mxu1 %v1790_v26 }
 0x3bd   : > { %1840 = vmatprep.subr.bf16.mxu1 %v2858_v8 }
 0x3be   : > { %v1587_v27 = vpop.permute.xlu0 %1586  ;;  %v1589_v28 = vpop.permute.xlu1 %1588 }
 0x3bf   : > { %v1620_v56 = vsel %vm1105_vm11, %v1587_v27, %v1589_v28 }
 0x3c0   : > { %1655 = vmatpush1.bf16.msra.mxu0 %v1620_v56 }
 0x3c1   : > { %1670 = vmatprep.subr.bf16.mxu0 %v2858_v8 }
 0x3c2   : > { %v1787_v30 = vpop.permute.xlu0 %1786  ;;  %v1789_v31 = vpop.permute.xlu1 %1788 }
 0x3c3   : > { %v1797_v32 = vsel %vm1105_vm11, %v1787_v30, %v1789_v31 }
 0x3c4   : > { %1841 = vmatpush2.bf16.msra.mxu1 %v1797_v32 }
 0x3c5   : > { %2517 = vmatprep.subr.bf16.mxu1 %v2854_v5 }
 0x3c7   : > { %1843 = vmatmul.mubr.bf16.vlgmr.msra.gmra.mxu1 %v2700_v33 }
 0x3c8   : > { %2513 = vmatprep.mubr.msk.bf16.mxu1 %vm2856_vm0, %v2854_v5 }
 0x3c9   : > { %v1617_v34 = vpop.permute.xlu0 %1616 }
 0x3cb   : > { %v1619_v36 = vpop.permute.xlu1 %1618 }
 0x3cc   : > { %v1627_v39 = vsel %vm1105_vm11, %v1617_v34, %v1619_v36 }
 0x3cd   : > { %1671 = vmatpush2.bf16.msra.mxu0 %v1627_v39 }
 0x3ce   : > { %2487 = vmatprep.subr.bf16.mxu0 %v2854_v5 }
 0x3d0   : > { %1673 = vmatmul.mubr.bf16.vlgmr.msra.gmra.mxu0 %v2703_v40 }
 0x3d1   : > { %2497 = vmatprep.mubr.msk.bf16.mxu0 %vm2856_vm0, %v2854_v5 }
 0x3d6   : > { %v3642_v8 = vpop.permute.xlu0 %1903 }
 0x3d8   : > { %v3644_v14 = vpop.permute.xlu1 %1908 }
 0x3da   : > { %v3646_v25 = vpop.permute.xlu0 %1898 }
 0x3dc   : > { %v3648_v41 = vpop.permute.xlu1 %1893 }
 0x3de   : > { %v1889_v42 = vpop.permute.xlu0 %1888 }
 0x3e0   : > { %v1884_v43 = vpop.permute.xlu1 %1883 }
 0x3e2   : > { %v1879_v44 = vpop.permute.xlu0 %1878 }
 0x3e4   : > { %v1874_v46 = vpop.permute.xlu1 %1873 }
 0x3e6   : > { %v1869_v35 = vpop.permute.xlu0 %1868 }
 0x3e7   : > { %v1161_v61 = vpop.f32.mrf.mxu1 }
 0x3e8   : > { %v1864_v48 = vpop.permute.xlu1 %1863 }
 0x3e9   : > { %v1163_v62 = vpop.f32.mrf.mxu1  ;;  %v1911_v1 = vadd.f32 %v1864_v48, %v1161_v61 }
 0x3eb   : > { %v1164_v0 = vpop.f32.mrf.mxu1  ;;  %v2367_v2 = vmul.f32 -1.442695, %v1911_v1 }
 0x3ec   : > { %v1912_v49 = vadd.f32 %v1869_v35, %v1164_v0 }
 0x3ed   : > { %2709 = vpow2.f32 %v2367_v2  ;;  %v1166_v37 = vpop.f32.mrf.mxu1 }
 0x3ee   : > { %v2368_v45 = vmul.f32 -1.442695, %v1912_v49 }
 0x3f0   : > { %2711 = vpow2.f32 %v2368_v45 }
 0x3fa   : > { %v2710_v50 = vpop.eup %2709 }
 0x3fb   : > { %v1951_v51 = vadd.f32 1.0, %v2710_v50 }
 0x3fd   : > { %v2712_v52 = vpop.eup %2711  ;;  %2713 = vrcp.f32 %v1951_v51 }
 0x3fe   : > { %v1952_v53 = vadd.f32 1.0, %v2712_v52 }
 0x400   : > { %2715 = vrcp.f32 %v1952_v53 }
 0x40a   : > { %v2714_v54 = vpop.eup %2713 }
 0x40b   : > { %v1981_v55 = vmul.f32 %v2714_v54, %v1911_v1 }
 0x40d   : > { %v2716_v57 = vpop.eup %2715 }
 0x40e   : > { %v1982_v58 = vmul.f32 %v2716_v57, %v1912_v49 }
 0x410   : > { %v3650_v59 = vpack.c.bf16 %v1982_v58, %v1981_v55 }
 0x443   : > { %v1503_v60 = vpop.f32.mrf.mxu1 }
 0x444   : > { %v1915_v63 = vadd.f32 %v1884_v43, %v1503_v60 }
 0x445   : > { %v1505_v9 = vpop.f32.mrf.mxu1 }
 0x446   : > { %v2371_v29 = vmul.f32 -1.442695, %v1915_v63 }
 0x447   : > { %v1332_v10 = vpop.f32.mrf.mxu0  ;;  %v1506_v11 = vpop.f32.mrf.mxu1 }
 0x448   : > { %2717 = vpow2.f32 %v2371_v29  ;;  %v1913_v12 = vadd.f32 %v1874_v46, %v1332_v10  ;;  %v1916_v13 = vadd.f32 %v1889_v42, %v1506_v11 }
 0x449   : > { %v1334_v15 = vpop.f32.mrf.mxu0  ;;  %v1508_v16 = vpop.f32.mrf.mxu1 }
 0x44a   : > { %v2369_v17 = vmul.f32 -1.442695, %v1913_v12  ;;  %v2372_v38 = vmul.f32 -1.442695, %v1916_v13  ;;  %v2706_v15 = vld [vmem:[%s3706_s7 + $0x8] sm:$0xff]   ;;  %v2707_v16 = vld [vmem:[%s3706_s7 + $0x10] sm:$0xff]  }
 0x44b   : > { %v1335_v18 = vpop.f32.mrf.mxu0 }
 0x44c   : > { %2719 = vpow2.f32 %v2369_v17  ;;  %v1914_v19 = vadd.f32 %v1879_v44, %v1335_v18  ;;  %v2017_v17 = vpop.permute.xlu1 %2016 }
 0x44d   : > { %2721 = vpow2.f32 %v2372_v38  ;;  %v1337_v20 = vpop.f32.mrf.mxu0 }
 0x44e   : > { %v2370_v21 = vmul.f32 -1.442695, %v1914_v19 }
 0x450   : > { %2723 = vpow2.f32 %v2370_v21  ;;  %v2027_v38 = vpop.permute.xlu1 %2026 }
 0x454   : > { %v2037_v18 = vpop.permute.xlu1 %2036 }
 0x455   : > { %v2718_v22 = vpop.eup %2717 }
 0x456   : > { %v1955_v4 = vadd.f32 1.0, %v2718_v22 }
 0x458   : > { %2725 = vrcp.f32 %v1955_v4 }
 0x459   : > { %v2720_v3 = vpop.eup %2719 }
 0x45a   : > { %v2722_v47 = vpop.eup %2721  ;;  %v1953_v23 = vadd.f32 1.0, %v2720_v3 }
 0x45b   : > { %v1956_v24 = vadd.f32 1.0, %v2722_v47 }
 0x45c   : > { %2727 = vrcp.f32 %v1953_v23 }
 0x45d   : > { %v2724_v7 = vpop.eup %2723  ;;  %2729 = vrcp.f32 %v1956_v24 }
 0x45e   : > { %v1954_v6 = vadd.f32 1.0, %v2724_v7 }
 0x460   : > { %2731 = vrcp.f32 %v1954_v6 }
 0x465   : > { %v2726_v26 = vpop.eup %2725 }
 0x466   : > { %v1985_v28 = vmul.f32 %v2726_v26, %v1915_v63 }
 0x469   : > { %v2728_v27 = vpop.eup %2727 }
 0x46a   : > { %v2730_v56 = vpop.eup %2729  ;;  %v1983_v31 = vmul.f32 %v2728_v27, %v1913_v12  ;;  %v2704_v12 = vld [vmem:[%s3706_s7] sm:$0xff]  }
 0x46b   : > { %v1986_v30 = vmul.f32 %v2730_v56, %v1916_v13  ;;  %v2705_v13 = vld [vmem:[%s3706_s7 + $0x20] ss:$0 sps:$4 sm:$0xff]  }
 0x46d   : > { %v2732_v32 = vpop.eup %2731  ;;  %v2002_v33 = vpack.c.bf16 %v1986_v30, %v1985_v28 }
 0x46e   : > { %v1984_v34 = vmul.f32 %v2732_v32, %v1914_v19  ;;  %v2047_v19 = vpop.permute.xlu1 %2046 }
 0x470   : > { %v2001_v36 = vpack.c.bf16 %v1984_v34, %v1983_v31 }
 0x472   : > { %v2057_v20 = vpop.permute.xlu1 %2056 }
 0x487   : > { %v1844_v39 = vpop.f32.mrf.mxu1 }
 0x488   : > { %v1919_v40 = vadd.f32 %v3642_v8, %v1844_v39 }
 0x489   : > { %v1846_v42 = vpop.f32.mrf.mxu1 }
 0x48a   : > { %v2375_v43 = vmul.f32 -1.442695, %v1919_v40 }
 0x48b   : > { %v1847_v44 = vpop.f32.mrf.mxu1 }
 0x48c   : > { %2733 = vpow2.f32 %v2375_v43  ;;  %v1920_v46 = vadd.f32 %v3644_v14, %v1847_v44 }
 0x48d   : > { %v1849_v61 = vpop.f32.mrf.mxu1 }
 0x48e   : > { %v2376_v48 = vmul.f32 -1.442695, %v1920_v46 }
 0x490   : > { %2735 = vpow2.f32 %v2376_v48  ;;  %v1674_v62 = vpop.f32.mrf.mxu0 }
 0x491   : > { %v1917_v35 = vadd.f32 %v3648_v41, %v1674_v62 }
 0x492   : > { %v1676_v1 = vpop.f32.mrf.mxu0 }
 0x493   : > { %v2373_v0 = vmul.f32 -1.442695, %v1917_v35 }
 0x494   : > { %v1677_v2 = vpop.f32.mrf.mxu0 }
 0x495   : > { %2737 = vpow2.f32 %v2373_v0  ;;  %v1918_v49 = vadd.f32 %v3646_v25, %v1677_v2 }
 0x496   : > { %v1679_v37 = vpop.f32.mrf.mxu0 }
 0x497   : > { %v2374_v8 = vmul.f32 -1.442695, %v1918_v49 }
 0x499   : > { %v2734_v45 = vpop.eup %2733  ;;  %2739 = vpow2.f32 %v2374_v8 }
 0x49a   : > { %v1959_v50 = vadd.f32 1.0, %v2734_v45 }
 0x49c   : > { %2741 = vrcp.f32 %v1959_v50 }
 0x49d   : > { %v2736_v51 = vpop.eup %2735 }
 0x49e   : > { %v1960_v14 = vadd.f32 1.0, %v2736_v51 }
 0x4a0   : > { %2743 = vrcp.f32 %v1960_v14 }
 0x4a2   : > { %v2738_v52 = vpop.eup %2737 }
 0x4a3   : > { %v1957_v53 = vadd.f32 1.0, %v2738_v52 }
 0x4a5   : > { %2745 = vrcp.f32 %v1957_v53 }
 0x4a6   : > { %v2740_v54 = vpop.eup %2739 }
 0x4a7   : > { %v1958_v41 = vadd.f32 1.0, %v2740_v54 }
 0x4a9   : > { %2747 = vrcp.f32 %v1958_v41  ;;  %v2742_v55 = vpop.eup %2741 }
 0x4aa   : > { %v1989_v58 = vmul.f32 %v2742_v55, %v1919_v40 }
 0x4ad   : > { %v2744_v57 = vpop.eup %2743 }
 0x4ae   : > { %v1990_v60 = vmul.f32 %v2744_v57, %v1920_v46 }
 0x4b0   : > { %v2004_v25 = vpack.c.bf16 %v1990_v60, %v1989_v58 }
 0x4b2   : > { %2488 = vmatpush3.bf16.msra.mxu0 %v2004_v25  ;;  %2522 = vmatpush3.bf16.msra.mxu1 %v2004_v25  ;;  %v2746_v63 = vpop.eup %2745 }
 0x4b3   : > { %2489 = vmatprep.subr.bf16.mxu0 %v2854_v5  ;;  %2518 = vmatprep.subr.bf16.mxu1 %v2854_v5  ;;  %v1987_v29 = vmul.f32 %v2746_v63, %v1917_v35 }
 0x4b6   : > { %v2748_v9 = vpop.eup %2747 }
 0x4b7   : > { %v1988_v10 = vmul.f32 %v2748_v9, %v1918_v49 }
 0x4b9   : > { %v2003_v11 = vpack.c.bf16 %v1988_v10, %v1987_v29 }
 0x4bb   : > { %2490 = vmatpush3.bf16.msra.mxu0 %v2003_v11  ;;  %2523 = vmatpush3.bf16.msra.mxu1 %v2003_v11 }
 0x4bc   : > { %2491 = vmatprep.subr.bf16.mxu0 %v2854_v5  ;;  %2519 = vmatprep.subr.bf16.mxu1 %v2854_v5 }
 0x4bf   : > { %2492 = vmatpush3.bf16.msra.mxu0 %v2002_v33  ;;  %2524 = vmatpush3.bf16.msra.mxu1 %v2002_v33 }
 0x4c0   : > { %2493 = vmatprep.subr.bf16.mxu0 %v2854_v5  ;;  %2520 = vmatprep.subr.bf16.mxu1 %v2854_v5 }
 0x4c3   : > { %2494 = vmatpush3.bf16.msra.mxu0 %v2001_v36  ;;  %2525 = vmatpush3.bf16.msra.mxu1 %v2001_v36 }
 0x4c4   : > { %2495 = vmatprep.subr.bf16.mxu0 %v2854_v5  ;;  %2521 = vmatprep.subr.bf16.mxu1 %v2854_v5 }
 0x4c7   : > { %2496 = vmatpush3.bf16.msra.mxu0 %v3650_v59  ;;  %2526 = vmatpush3.bf16.msra.mxu1 %v3650_v59  ;;  %v2708_v59 = vld [vmem:[%s3706_s7 + $0x18] sm:$0xff]  }
 0x4ca   : > { %2498 = vmatmul.mubr.msk.bf16.vlgmr.msra.gmra.mxu0 %vm2082_vm12, %v2704_v12  ;;  %2514 = vmatmul.mubr.msk.bf16.vlgmr.msra.gmra.mxu1 %vm2082_vm12, %v2705_v13 }
 0x4cb   : > { %2501 = vmatprep.mubr.msk.bf16.mxu0 %vm2856_vm0, %v2854_v5 }
 0x4d2   : > { %2502 = vmatmul.mubr.msk.bf16.gmra.mxu0 %vm2082_vm12, %v2706_v15 }
 0x4d3   : > { %2505 = vmatprep.mubr.msk.bf16.mxu0 %vm2856_vm0, %v2854_v5 }
 0x4da   : > { %2506 = vmatmul.mubr.msk.bf16.gmra.mxu0 %vm2082_vm12, %v2707_v16 }
 0x4db   : > { %2509 = vmatprep.mubr.msk.bf16.mxu0 %vm2856_vm0, %v2854_v5  ;;  %v2022_v5 = vpop.permute.xlu0 %2021 }
 0x4df   : > { %v2032_v31 = vpop.permute.xlu0 %2031 }
 0x4e2   : > { %2510 = vmatmul.mubr.msk.bf16.gmra.mxu0 %vm2082_vm12, %v2708_v59 }
 0x4e3   : > { %v2042_v42 = vpop.permute.xlu0 %2041 }
 0x4e7   : > { %v2052_v35 = vpop.permute.xlu0 %2051 }
 0x58a   : > { %v2132_v21 = vpop.f32.mrf.mxu0  ;;  %v2164_v22 = vpop.f32.mrf.mxu1 }
 0x58b   : > { %v2133_v4 = vadd.f32 %v2132_v21, %v2017_v17  ;;  %v2165_v3 = vadd.f32 %v2164_v22, %v2057_v20 }
 0x58c   : > { %v2499_v47 = vpop.f32.mrf.mxu0  ;;  %v2515_v23 = vpop.f32.mrf.mxu1 }
 0x58d   : > { %2170 = vst [vmem:[%s2988_s19] sm:$0xff] %v2133_v4  ;;  %2178 = vst [vmem:[%s2988_s19 + $0x40] sm:$0xff] %v2165_v3 }
 0x58e   : > { %v2135_v24 = vpop.f32.mrf.mxu0  ;;  %v2167_v7 = vpop.f32.mrf.mxu1 }
 0x58f   : > { %v2136_v6 = vadd.f32 %v2135_v24, %v2022_v5 }
 0x590   : > { %v2500_v26 = vpop.f32.mrf.mxu0  ;;  %v2516_v27 = vpop.f32.mrf.mxu1 }
 0x591   : > { %2171 = vst [vmem:[%s2988_s19 + $0x8] sm:$0xff] %v2136_v6 }
 0x592   : > { %v2140_v28 = vpop.f32.mrf.mxu0 }
 0x593   : > { %v2141_v56 = vadd.f32 %v2140_v28, %v2027_v38 }
 0x594   : > { %v2503_v30 = vpop.f32.mrf.mxu0 }
 0x595   : > { %2172 = vst [vmem:[%s2988_s19 + $0x10] sm:$0xff] %v2141_v56 }
 0x596   : > { %v2143_v32 = vpop.f32.mrf.mxu0 }
 0x597   : > { %v2144_v33 = vadd.f32 %v2143_v32, %v2032_v31 }
 0x598   : > { %v2504_v34 = vpop.f32.mrf.mxu0 }
 0x599   : > { %2173 = vst [vmem:[%s2988_s19 + $0x18] sm:$0xff] %v2144_v33 }
 0x59a   : > { %v2148_v36 = vpop.f32.mrf.mxu0 }
 0x59b   : > { %v2149_v39 = vadd.f32 %v2148_v36, %v2037_v18 }
 0x59c   : > { %v2507_v40 = vpop.f32.mrf.mxu0 }
 0x59d   : > { %2174 = vst [vmem:[%s2988_s19 + $0x20] sm:$0xff] %v2149_v39 }
 0x59e   : > { %v2151_v43 = vpop.f32.mrf.mxu0 }
 0x59f   : > { %v2152_v44 = vadd.f32 %v2151_v43, %v2042_v42 }
 0x5a0   : > { %v2508_v46 = vpop.f32.mrf.mxu0 }
 0x5a1   : > { %2175 = vst [vmem:[%s2988_s19 + $0x28] sm:$0xff] %v2152_v44 }
 0x5a2   : > { %v2156_v61 = vpop.f32.mrf.mxu0 }
 0x5a3   : > { %v2157_v48 = vadd.f32 %v2156_v61, %v2047_v19 }
 0x5a4   : > { %v2511_v62 = vpop.f32.mrf.mxu0 }
 0x5a5   : > { %2176 = vst [vmem:[%s2988_s19 + $0x30] sm:$0xff] %v2157_v48 }
 0x5a6   : > { %v2159_v1 = vpop.f32.mrf.mxu0 }
 0x5a7   : > { %v2160_v0 = vadd.f32 %v2159_v1, %v2052_v35 }
 0x5a8   : > { %v2512_v2 = vpop.f32.mrf.mxu0 }
 0x5a9   : > { %2177 = vst [vmem:[%s2988_s19 + $0x38] sm:$0xff] %v2160_v0 }
 0x5aa PF: > { %s21_s30 = sadd.s32 1, %s2841_s30  }
 0x5ab   : > { %p18_p4 = scmp.ge.s32.totalorder %s21_s30, 4  }
 0x5ad   :  { %20 = sbr.rel (!%p18_p4) target bundleno = 2 (0x2), region = 106 }
 0x5b2   :  { %2200 = vsyncpa [#allocation4], 1 }
 0x5b3   :  { %2202 = vsyncpa [#allocation4 + $0x1], 1 }
 0x5b4   :  { %2203 = vsyncpa [#allocation6], 1 }

</bundles_post_ra>
